<compile_context>
chip_gen: v7x
topology: tpu7x:2x2x1
jax: 0.10.0
libtpu: 0.0.40
codegen_flags: <defaults>
</compile_context>

<pallas_src>
import jax
import jax.numpy as jnp
from jax.experimental import pallas as pl
from jax.experimental.pallas import tpu as pltpu

# ---- model hyper-parameters (small, consistent with the module) ----
MODEL_DIM   = 32          # model_dim
NUM_HEADS   = 4           # num_heads
NUM_LAYERS  = 2           # num_encoder_layers
NUM_CLASSES = 2
SEQ_LEN     = 16          # input height  -> sequence length
IN_WIDTH    = 16          # input width   -> linear_proj in_features
BATCH       = 2
HEAD_DIM    = MODEL_DIM // NUM_HEADS
FFN_DIM     = MODEL_DIM * 4
EPS         = 1e-5        # nn.LayerNorm default eps
LANE        = 128         # lane-padded classifier / output width


def _layernorm(z, g, b):
    mu = jnp.mean(z, axis=-1, keepdims=True)
    var = jnp.mean((z - mu) ** 2, axis=-1, keepdims=True)
    return (z - mu) * jax.lax.rsqrt(var + EPS) * g + b


# --------------------------- the kernel ---------------------------
def ecgformer_kernel(x_ref, wp_ref, posb_ref,
                     wqkv_ref, bqkv_ref, wo_ref, w1_ref, b1_ref, w2_ref,
                     vecs_ref, wc_ref, bc_ref, out_ref):
    B, S, W = x_ref.shape
    D, HD, NH, L = MODEL_DIM, HEAD_DIM, NUM_HEADS, NUM_LAYERS
    BS = B * S

    # linear_proj on (B*S) rows, then add (pos_enc + proj_bias), pre-tiled.
    xf = x_ref[...].reshape(BS, W)
    h = jnp.dot(xf, wp_ref[...], preferred_element_type=jnp.float32) + posb_ref[...]

    for l in range(L):                           # static, unrolled (L = 2)
        residual = h

        vec = vecs_ref[l]                        # (8, D): packed per-layer vectors
        ln1g, ln1b = vec[0:1, :], vec[1:2, :]
        bo         = vec[2:3, :]
        ln2g, ln2b = vec[3:4, :], vec[4:5, :]
        b2         = vec[5:6, :]
        lng, lnb   = vec[6:7, :], vec[7:8, :]

        # --- self-attention block (norm_first) ---
        z = _layernorm(h, ln1g, ln1b)
        # 1/sqrt(HD) is pre-folded into the Q columns of wqkv / bqkv.
        qkv = jnp.dot(z, wqkv_ref[l], preferred_element_type=jnp.float32) + bqkv_ref[l]
        qkv3 = qkv.reshape(B, S, 3 * D)
        wo_l = wo_ref[l]                         # (D, D)

        attn = jnp.zeros((BS, D), jnp.float32)
        for hh in range(NH):                     # static, unrolled; batched over B
            q = qkv3[:, :,          hh * HD:(hh + 1) * HD]          # (B, S, HD)
            k = qkv3[:, :,     D +  hh * HD: D + (hh + 1) * HD]
            v = qkv3[:, :, 2 * D +  hh * HD: 2 * D + (hh + 1) * HD]
            s = jnp.einsum('bqd,bkd->bqk', q, k,
                           preferred_element_type=jnp.float32)      # (B, S, S)
            s = s - jnp.max(s, axis=-1, keepdims=True)
            p = jnp.exp(s)
            p = p * pl.reciprocal(jnp.sum(p, axis=-1, keepdims=True), approx=True)
            o = jnp.einsum('bqk,bkd->bqd', p, v,
                           preferred_element_type=jnp.float32)      # (B, S, HD)
            # fold head output straight into the output projection (no concat)
            attn = attn + jnp.dot(o.reshape(BS, HD),
                                  wo_l[hh * HD:(hh + 1) * HD, :],
                                  preferred_element_type=jnp.float32)
        h = h + attn + bo

        # --- feed-forward block (norm_first) ---
        z2 = _layernorm(h, ln2g, ln2b)
        f = jnp.dot(z2, w1_ref[l], preferred_element_type=jnp.float32) + b1_ref[l]
        f = jnp.maximum(f, 0.0)                                     # relu
        f = jnp.dot(f, w2_ref[l], preferred_element_type=jnp.float32) + b2
        h = h + f

        # --- outer shared LayerNorm(encoder_layer(src) + residual) ---
        h = _layernorm(h + residual, lng, lnb)

    # dropout -> identity (inference); per-sample max over seq; classifier.
    pooled = jnp.max(h.reshape(B, S, D), axis=1)                    # (B, D)
    out_ref[...] = (jnp.dot(pooled, wc_ref[...], preferred_element_type=jnp.float32)
                    + bc_ref[...])                                  # (B, 128) lane-dense


# ---------------- parameter packing for the kernel ----------------
PACKED_ORDER = ["wp", "posb", "wqkv", "bqkv", "wo", "w1", "b1", "w2",
                "vecs", "wc", "bc"]


def pack_params(p, batch):
    """Fold attention scale / biases and stack small vectors into VMEM slabs."""
    D, L = MODEL_DIM, NUM_LAYERS
    scale = 1.0 / (HEAD_DIM ** 0.5)
    qscale = jnp.concatenate([jnp.full((D,), scale, jnp.float32),
                              jnp.ones((2 * D,), jnp.float32)])
    wqkv = p["wqkv"] * qscale[None, None, :]
    bqkv = p["bqkv"] * qscale[None, None, :]
    # pos encoding + linear_proj bias, tiled to all (batch*seq) rows
    posb = jnp.tile(p["pos"] + p["bp"], (batch, 1))                 # (B*S, D)
    # per-layer (1, D)-shaped vectors stacked into one (L, 8, D) slab
    vecs = jnp.concatenate(
        [p["ln1g"], p["ln1b"], p["bo"], p["ln2g"], p["ln2b"], p["b2"],
         jnp.broadcast_to(p["lng"][None], (L, 1, D)),
         jnp.broadcast_to(p["lnb"][None], (L, 1, D))], axis=1)      # (L, 8, D)
    # lane-padded classifier (last dim 128 -> unmasked vector stores)
    wc_pad = jnp.zeros((D, LANE), jnp.float32).at[:, :NUM_CLASSES].set(p["wc"])
    bc_pad = jnp.zeros((1, LANE), jnp.float32).at[:, :NUM_CLASSES].set(p["bc"])
    return {"wp": p["wp"], "posb": posb, "wqkv": wqkv, "bqkv": bqkv,
            "wo": p["wo"], "w1": p["w1"], "b1": p["b1"], "w2": p["w2"],
            "vecs": vecs, "wc": wc_pad, "bc": bc_pad}


def _forward_impl(x, params):
    B = x.shape[0]
    packed = pack_params(params, B)
    ordered = [packed[name] for name in PACKED_ORDER]
    vmem = pl.BlockSpec(memory_space=pltpu.MemorySpace.VMEM)        # whole-array, resident
    out = pl.pallas_call(
        ecgformer_kernel,
        out_shape=jax.ShapeDtypeStruct((B, LANE), jnp.float32),
        in_specs=[vmem] * (1 + len(ordered)),
        out_specs=vmem,
    )(x, *ordered)
    return out[:, :NUM_CLASSES]


ecgformer_forward = jax.jit(_forward_impl)


# ---------------- deterministic parameter init (natural layout) ----------------
def init_params(key):
    D, W, S, L, C, F = MODEL_DIM, IN_WIDTH, SEQ_LEN, NUM_LAYERS, NUM_CLASSES, FFN_DIM
    ks = jax.random.split(key, 16)

    def nrm(k, shape, scale=0.02):
        return (scale * jax.random.normal(k, shape)).astype(jnp.float32)

    return {
        "wp":   nrm(ks[0], (W, D)),
        "bp":   jnp.zeros((1, D), jnp.float32),
        # learned positional encoding (zeros in the torch __init__; small
        # deterministic values so the add path is exercised non-trivially)
        "pos":  nrm(ks[1], (S, D)),
        "ln1g": jnp.ones((L, 1, D), jnp.float32),
        "ln1b": jnp.zeros((L, 1, D), jnp.float32),
        "wqkv": nrm(ks[2], (L, D, 3 * D)),
        "bqkv": jnp.zeros((L, 1, 3 * D), jnp.float32),
        "wo":   nrm(ks[3], (L, D, D)),
        "bo":   jnp.zeros((L, 1, D), jnp.float32),
        "ln2g": jnp.ones((L, 1, D), jnp.float32),
        "ln2b": jnp.zeros((L, 1, D), jnp.float32),
        "w1":   nrm(ks[4], (L, D, F)),
        "b1":   jnp.zeros((L, 1, F), jnp.float32),
        "w2":   nrm(ks[5], (L, F, D)),
        "b2":   jnp.zeros((L, 1, D), jnp.float32),
        "lng":  jnp.ones((1, D), jnp.float32),
        "lnb":  jnp.zeros((1, D), jnp.float32),
        "wc":   nrm(ks[6], (D, C)),
        "bc":   jnp.zeros((1, C), jnp.float32),
    }


# ---------------- pure-JAX reference (natural params, same math) ----------------
def reference_forward(x, p):
    D, HD, NH = MODEL_DIM, HEAD_DIM, NUM_HEADS
    h = jnp.einsum("bsw,wd->bsd", x, p["wp"]) + p["bp"]
    h = h + p["pos"][None]
    scale = 1.0 / (HD ** 0.5)
    for l in range(NUM_LAYERS):
        residual = h
        z = _layernorm(h, p["ln1g"][l], p["ln1b"][l])
        qkv = jnp.einsum("bsd,de->bse", z, p["wqkv"][l]) + p["bqkv"][l]
        q, k, v = qkv[..., :D], qkv[..., D:2 * D], qkv[..., 2 * D:]
        outs = []
        for hh in range(NH):
            qh = q[..., hh * HD:(hh + 1) * HD] * scale
            kh = k[..., hh * HD:(hh + 1) * HD]
            vh = v[..., hh * HD:(hh + 1) * HD]
            s = jnp.einsum("bqd,bkd->bqk", qh, kh)
            s = s - jnp.max(s, axis=-1, keepdims=True)
            pr = jnp.exp(s)
            pr = pr / jnp.sum(pr, axis=-1, keepdims=True)
            outs.append(jnp.einsum("bqk,bkd->bqd", pr, vh))
        attn = jnp.concatenate(outs, axis=-1)
        attn = jnp.einsum("bsd,de->bse", attn, p["wo"][l]) + p["bo"][l]
        h = h + attn
        z2 = _layernorm(h, p["ln2g"][l], p["ln2b"][l])
        f = jnp.maximum(jnp.einsum("bsd,df->bsf", z2, p["w1"][l]) + p["b1"][l], 0.0)
        f = jnp.einsum("bsf,fd->bsd", f, p["w2"][l]) + p["b2"][l]
        h = h + f
        h = _layernorm(h + residual, p["lng"], p["lnb"])
    pooled = jnp.max(h, axis=1)
    return pooled @ p["wc"] + p["bc"]


if __name__ == "__main__":
    key = jax.random.PRNGKey(0)
    kx, kp = jax.random.split(key)
    x = jax.random.normal(kx, (BATCH, SEQ_LEN, IN_WIDTH), dtype=jnp.float32)
    params = init_params(kp)

    logits = jax.block_until_ready(ecgformer_forward(x, params))
    ref = jax.block_until_ready(reference_forward(x, params))

    assert logits.shape == (BATCH, NUM_CLASSES), logits.shape
    # tolerance covers the approx EUP reciprocal in the softmax normalization
    assert jnp.allclose(logits, ref, atol=2e-3, rtol=2e-3), (logits, ref)
    print("KERNEL_OK")
</pallas_src>

<mosaic_0001>
module attributes {stable_mosaic.version = 11 : i64} {
  func.func @ecgformer_kernel(%arg0: memref<2x16x16xf32, #tpu.memory_space<vmem>>, %arg1: memref<16x32xf32, #tpu.memory_space<vmem>>, %arg2: memref<32x32xf32, #tpu.memory_space<vmem>>, %arg3: memref<2x32x96xf32, #tpu.memory_space<vmem>>, %arg4: memref<2x1x96xf32, #tpu.memory_space<vmem>>, %arg5: memref<2x32x32xf32, #tpu.memory_space<vmem>>, %arg6: memref<2x32x128xf32, #tpu.memory_space<vmem>>, %arg7: memref<2x1x128xf32, #tpu.memory_space<vmem>>, %arg8: memref<2x128x32xf32, #tpu.memory_space<vmem>>, %arg9: memref<2x8x32xf32, #tpu.memory_space<vmem>>, %arg10: memref<32x128xf32, #tpu.memory_space<vmem>>, %arg11: memref<1x128xf32, #tpu.memory_space<vmem>>, %arg12: memref<2x128xf32, #tpu.memory_space<vmem>>) attributes {dimension_semantics = [], scalar_prefetch = 0 : i64, scratch_operands = 0 : i64, tpu.core_type = #tpu.core_type<tc>} {
    %c0 = arith.constant 0 : index
    %c0_0 = arith.constant 0 : index
    %c0_1 = arith.constant 0 : index
    %0 = vector.load %arg0[%c0, %c0_0, %c0_1] : memref<2x16x16xf32, #tpu.memory_space<vmem>>, vector<2x16x16xf32>
    %1 = vector.shape_cast %0 : vector<2x16x16xf32> to vector<32x16xf32>
    %c0_2 = arith.constant 0 : index
    %c0_3 = arith.constant 0 : index
    %2 = vector.load %arg1[%c0_2, %c0_3] : memref<16x32xf32, #tpu.memory_space<vmem>>, vector<16x32xf32>
    %cst = arith.constant dense<0.000000e+00> : vector<32x32xf32>
    %3 = tpu.matmul %1, %2, %cst {dimension_numbers = #tpu.dot_dimension_numbers<[1], [0], [0], [1], [0, 0, 1, 1], [], []>} : vector<32x16xf32>, vector<16x32xf32>, vector<32x32xf32> -> vector<32x32xf32>
    %c0_4 = arith.constant 0 : index
    %c0_5 = arith.constant 0 : index
    %4 = vector.load %arg2[%c0_4, %c0_5] : memref<32x32xf32, #tpu.memory_space<vmem>>, vector<32x32xf32>
    %5 = arith.addf %3, %4 : vector<32x32xf32>
    %c0_6 = arith.constant 0 : index
    %c0_7 = arith.constant 0 : index
    %c0_8 = arith.constant 0 : index
    %6 = vector.load %arg9[%c0_6, %c0_7, %c0_8] : memref<2x8x32xf32, #tpu.memory_space<vmem>>, vector<1x8x32xf32>
    %7 = vector.shape_cast %6 : vector<1x8x32xf32> to vector<8x32xf32>
    %8 = vector.extract_strided_slice %7 {offsets = [0, 0], sizes = [1, 32], strides = [1, 1]} : vector<8x32xf32> to vector<1x32xf32>
    %9 = vector.extract_strided_slice %7 {offsets = [1, 0], sizes = [1, 32], strides = [1, 1]} : vector<8x32xf32> to vector<1x32xf32>
    %10 = vector.extract_strided_slice %7 {offsets = [2, 0], sizes = [1, 32], strides = [1, 1]} : vector<8x32xf32> to vector<1x32xf32>
    %11 = vector.extract_strided_slice %7 {offsets = [3, 0], sizes = [1, 32], strides = [1, 1]} : vector<8x32xf32> to vector<1x32xf32>
    %12 = vector.extract_strided_slice %7 {offsets = [4, 0], sizes = [1, 32], strides = [1, 1]} : vector<8x32xf32> to vector<1x32xf32>
    %13 = vector.extract_strided_slice %7 {offsets = [5, 0], sizes = [1, 32], strides = [1, 1]} : vector<8x32xf32> to vector<1x32xf32>
    %14 = vector.extract_strided_slice %7 {offsets = [6, 0], sizes = [1, 32], strides = [1, 1]} : vector<8x32xf32> to vector<1x32xf32>
    %15 = vector.extract_strided_slice %7 {offsets = [7, 0], sizes = [1, 32], strides = [1, 1]} : vector<8x32xf32> to vector<1x32xf32>
    %cst_9 = arith.constant dense<0.000000e+00> : vector<32xf32>
    %16 = vector.multi_reduction <add>, %5, %cst_9 [1] : vector<32x32xf32> to vector<32xf32>
    %17 = vector.shape_cast %16 : vector<32xf32> to vector<32x1xf32>
    %cst_10 = arith.constant 3.200000e+01 : f32
    %18 = vector.broadcast %cst_10 : f32 to vector<32x1xf32>
    %19 = arith.divf %17, %18 : vector<32x1xf32>
    %20 = vector.broadcast %19 : vector<32x1xf32> to vector<32x32xf32>
    %21 = arith.subf %5, %20 : vector<32x32xf32>
    %22 = arith.mulf %21, %21 : vector<32x32xf32>
    %cst_11 = arith.constant dense<0.000000e+00> : vector<32xf32>
    %23 = vector.multi_reduction <add>, %22, %cst_11 [1] : vector<32x32xf32> to vector<32xf32>
    %24 = vector.shape_cast %23 : vector<32xf32> to vector<32x1xf32>
    %cst_12 = arith.constant 3.200000e+01 : f32
    %25 = vector.broadcast %cst_12 : f32 to vector<32x1xf32>
    %26 = arith.divf %24, %25 : vector<32x1xf32>
    %27 = vector.broadcast %19 : vector<32x1xf32> to vector<32x32xf32>
    %28 = arith.subf %5, %27 : vector<32x32xf32>
    %cst_13 = arith.constant 9.99999974E-6 : f32
    %29 = vector.broadcast %cst_13 : f32 to vector<32x1xf32>
    %30 = arith.addf %26, %29 : vector<32x1xf32>
    %31 = math.rsqrt %30 : vector<32x1xf32>
    %32 = vector.broadcast %31 : vector<32x1xf32> to vector<32x32xf32>
    %33 = arith.mulf %28, %32 : vector<32x32xf32>
    %34 = vector.broadcast %8 : vector<1x32xf32> to vector<32x32xf32>
    %35 = arith.mulf %33, %34 : vector<32x32xf32>
    %36 = vector.broadcast %9 : vector<1x32xf32> to vector<32x32xf32>
    %37 = arith.addf %35, %36 : vector<32x32xf32>
    %c0_14 = arith.constant 0 : index
    %c0_15 = arith.constant 0 : index
    %c0_16 = arith.constant 0 : index
    %38 = vector.load %arg3[%c0_14, %c0_15, %c0_16] : memref<2x32x96xf32, #tpu.memory_space<vmem>>, vector<1x32x96xf32>
    %39 = vector.shape_cast %38 : vector<1x32x96xf32> to vector<32x96xf32>
    %cst_17 = arith.constant dense<0.000000e+00> : vector<32x96xf32>
    %40 = tpu.matmul %37, %39, %cst_17 {dimension_numbers = #tpu.dot_dimension_numbers<[1], [0], [0], [1], [0, 0, 1, 1], [], []>} : vector<32x32xf32>, vector<32x96xf32>, vector<32x96xf32> -> vector<32x96xf32>
    %c0_18 = arith.constant 0 : index
    %c0_19 = arith.constant 0 : index
    %c0_20 = arith.constant 0 : index
    %41 = vector.load %arg4[%c0_18, %c0_19, %c0_20] : memref<2x1x96xf32, #tpu.memory_space<vmem>>, vector<1x1x96xf32>
    %42 = vector.shape_cast %41 : vector<1x1x96xf32> to vector<1x96xf32>
    %43 = vector.broadcast %42 : vector<1x96xf32> to vector<32x96xf32>
    %44 = arith.addf %40, %43 : vector<32x96xf32>
    %45 = vector.shape_cast %44 : vector<32x96xf32> to vector<2x16x96xf32>
    %c0_21 = arith.constant 0 : index
    %c0_22 = arith.constant 0 : index
    %c0_23 = arith.constant 0 : index
    %46 = vector.load %arg5[%c0_21, %c0_22, %c0_23] : memref<2x32x32xf32, #tpu.memory_space<vmem>>, vector<1x32x32xf32>
    %47 = vector.shape_cast %46 : vector<1x32x32xf32> to vector<32x32xf32>
    %cst_24 = arith.constant 0.000000e+00 : f32
    %48 = vector.broadcast %cst_24 : f32 to vector<32x32xf32>
    %49 = vector.extract_strided_slice %45 {offsets = [0, 0, 0], sizes = [2, 16, 8], strides = [1, 1, 1]} : vector<2x16x96xf32> to vector<2x16x8xf32>
    %50 = vector.extract_strided_slice %45 {offsets = [0, 0, 32], sizes = [2, 16, 8], strides = [1, 1, 1]} : vector<2x16x96xf32> to vector<2x16x8xf32>
    %51 = vector.extract_strided_slice %45 {offsets = [0, 0, 64], sizes = [2, 16, 8], strides = [1, 1, 1]} : vector<2x16x96xf32> to vector<2x16x8xf32>
    "tpu.trace_start"() <{level = 10 : i32, message = "bqd,bkd->bqk"}> : () -> ()
    %cst_25 = arith.constant dense<0.000000e+00> : vector<2x16x16xf32>
    %52 = tpu.matmul %49, %50, %cst_25 {dimension_numbers = #tpu.dot_dimension_numbers<[2], [2], [1], [1], [0, 0, 0, 1, 1, 1], [0], [0]>} : vector<2x16x8xf32>, vector<2x16x8xf32>, vector<2x16x16xf32> -> vector<2x16x16xf32>
    "tpu.trace_stop"() : () -> ()
    %cst_26 = arith.constant dense<0xFF800000> : vector<2x16xf32>
    %53 = vector.multi_reduction <maximumf>, %52, %cst_26 [2] : vector<2x16x16xf32> to vector<2x16xf32>
    %54 = vector.shape_cast %53 : vector<2x16xf32> to vector<2x16x1xf32>
    %55 = vector.broadcast %54 : vector<2x16x1xf32> to vector<2x16x16xf32>
    %56 = arith.subf %52, %55 : vector<2x16x16xf32>
    %57 = math.exp %56 : vector<2x16x16xf32>
    %cst_27 = arith.constant dense<0.000000e+00> : vector<2x16xf32>
    %58 = vector.multi_reduction <add>, %57, %cst_27 [2] : vector<2x16x16xf32> to vector<2x16xf32>
    %59 = vector.shape_cast %58 : vector<2x16xf32> to vector<2x16x1xf32>
    %60 = tpu.reciprocal %59 {approx = true} : vector<2x16x1xf32> -> vector<2x16x1xf32>
    %61 = vector.broadcast %60 : vector<2x16x1xf32> to vector<2x16x16xf32>
    %62 = arith.mulf %57, %61 : vector<2x16x16xf32>
    "tpu.trace_start"() <{level = 10 : i32, message = "bqk,bkd->bqd"}> : () -> ()
    %cst_28 = arith.constant dense<0.000000e+00> : vector<2x16x8xf32>
    %63 = tpu.matmul %62, %51, %cst_28 {dimension_numbers = #tpu.dot_dimension_numbers<[2], [1], [1], [2], [0, 0, 0, 1, 1, 2], [0], [0]>} : vector<2x16x16xf32>, vector<2x16x8xf32>, vector<2x16x8xf32> -> vector<2x16x8xf32>
    "tpu.trace_stop"() : () -> ()
    %64 = vector.shape_cast %63 : vector<2x16x8xf32> to vector<32x8xf32>
    %65 = vector.extract_strided_slice %47 {offsets = [0, 0], sizes = [8, 32], strides = [1, 1]} : vector<32x32xf32> to vector<8x32xf32>
    %cst_29 = arith.constant dense<0.000000e+00> : vector<32x32xf32>
    %66 = tpu.matmul %64, %65, %cst_29 {dimension_numbers = #tpu.dot_dimension_numbers<[1], [0], [0], [1], [0, 0, 1, 1], [], []>} : vector<32x8xf32>, vector<8x32xf32>, vector<32x32xf32> -> vector<32x32xf32>
    %67 = arith.addf %48, %66 : vector<32x32xf32>
    %68 = vector.extract_strided_slice %45 {offsets = [0, 0, 8], sizes = [2, 16, 8], strides = [1, 1, 1]} : vector<2x16x96xf32> to vector<2x16x8xf32>
    %69 = vector.extract_strided_slice %45 {offsets = [0, 0, 40], sizes = [2, 16, 8], strides = [1, 1, 1]} : vector<2x16x96xf32> to vector<2x16x8xf32>
    %70 = vector.extract_strided_slice %45 {offsets = [0, 0, 72], sizes = [2, 16, 8], strides = [1, 1, 1]} : vector<2x16x96xf32> to vector<2x16x8xf32>
    "tpu.trace_start"() <{level = 10 : i32, message = "bqd,bkd->bqk"}> : () -> ()
    %cst_30 = arith.constant dense<0.000000e+00> : vector<2x16x16xf32>
    %71 = tpu.matmul %68, %69, %cst_30 {dimension_numbers = #tpu.dot_dimension_numbers<[2], [2], [1], [1], [0, 0, 0, 1, 1, 1], [0], [0]>} : vector<2x16x8xf32>, vector<2x16x8xf32>, vector<2x16x16xf32> -> vector<2x16x16xf32>
    "tpu.trace_stop"() : () -> ()
    %cst_31 = arith.constant dense<0xFF800000> : vector<2x16xf32>
    %72 = vector.multi_reduction <maximumf>, %71, %cst_31 [2] : vector<2x16x16xf32> to vector<2x16xf32>
    %73 = vector.shape_cast %72 : vector<2x16xf32> to vector<2x16x1xf32>
    %74 = vector.broadcast %73 : vector<2x16x1xf32> to vector<2x16x16xf32>
    %75 = arith.subf %71, %74 : vector<2x16x16xf32>
    %76 = math.exp %75 : vector<2x16x16xf32>
    %cst_32 = arith.constant dense<0.000000e+00> : vector<2x16xf32>
    %77 = vector.multi_reduction <add>, %76, %cst_32 [2] : vector<2x16x16xf32> to vector<2x16xf32>
    %78 = vector.shape_cast %77 : vector<2x16xf32> to vector<2x16x1xf32>
    %79 = tpu.reciprocal %78 {approx = true} : vector<2x16x1xf32> -> vector<2x16x1xf32>
    %80 = vector.broadcast %79 : vector<2x16x1xf32> to vector<2x16x16xf32>
    %81 = arith.mulf %76, %80 : vector<2x16x16xf32>
    "tpu.trace_start"() <{level = 10 : i32, message = "bqk,bkd->bqd"}> : () -> ()
    %cst_33 = arith.constant dense<0.000000e+00> : vector<2x16x8xf32>
    %82 = tpu.matmul %81, %70, %cst_33 {dimension_numbers = #tpu.dot_dimension_numbers<[2], [1], [1], [2], [0, 0, 0, 1, 1, 2], [0], [0]>} : vector<2x16x16xf32>, vector<2x16x8xf32>, vector<2x16x8xf32> -> vector<2x16x8xf32>
    "tpu.trace_stop"() : () -> ()
    %83 = vector.shape_cast %82 : vector<2x16x8xf32> to vector<32x8xf32>
    %84 = vector.extract_strided_slice %47 {offsets = [8, 0], sizes = [8, 32], strides = [1, 1]} : vector<32x32xf32> to vector<8x32xf32>
    %cst_34 = arith.constant dense<0.000000e+00> : vector<32x32xf32>
    %85 = tpu.matmul %83, %84, %cst_34 {dimension_numbers = #tpu.dot_dimension_numbers<[1], [0], [0], [1], [0, 0, 1, 1], [], []>} : vector<32x8xf32>, vector<8x32xf32>, vector<32x32xf32> -> vector<32x32xf32>
    %86 = arith.addf %67, %85 : vector<32x32xf32>
    %87 = vector.extract_strided_slice %45 {offsets = [0, 0, 16], sizes = [2, 16, 8], strides = [1, 1, 1]} : vector<2x16x96xf32> to vector<2x16x8xf32>
    %88 = vector.extract_strided_slice %45 {offsets = [0, 0, 48], sizes = [2, 16, 8], strides = [1, 1, 1]} : vector<2x16x96xf32> to vector<2x16x8xf32>
    %89 = vector.extract_strided_slice %45 {offsets = [0, 0, 80], sizes = [2, 16, 8], strides = [1, 1, 1]} : vector<2x16x96xf32> to vector<2x16x8xf32>
    "tpu.trace_start"() <{level = 10 : i32, message = "bqd,bkd->bqk"}> : () -> ()
    %cst_35 = arith.constant dense<0.000000e+00> : vector<2x16x16xf32>
    %90 = tpu.matmul %87, %88, %cst_35 {dimension_numbers = #tpu.dot_dimension_numbers<[2], [2], [1], [1], [0, 0, 0, 1, 1, 1], [0], [0]>} : vector<2x16x8xf32>, vector<2x16x8xf32>, vector<2x16x16xf32> -> vector<2x16x16xf32>
    "tpu.trace_stop"() : () -> ()
    %cst_36 = arith.constant dense<0xFF800000> : vector<2x16xf32>
    %91 = vector.multi_reduction <maximumf>, %90, %cst_36 [2] : vector<2x16x16xf32> to vector<2x16xf32>
    %92 = vector.shape_cast %91 : vector<2x16xf32> to vector<2x16x1xf32>
    %93 = vector.broadcast %92 : vector<2x16x1xf32> to vector<2x16x16xf32>
    %94 = arith.subf %90, %93 : vector<2x16x16xf32>
    %95 = math.exp %94 : vector<2x16x16xf32>
    %cst_37 = arith.constant dense<0.000000e+00> : vector<2x16xf32>
    %96 = vector.multi_reduction <add>, %95, %cst_37 [2] : vector<2x16x16xf32> to vector<2x16xf32>
    %97 = vector.shape_cast %96 : vector<2x16xf32> to vector<2x16x1xf32>
    %98 = tpu.reciprocal %97 {approx = true} : vector<2x16x1xf32> -> vector<2x16x1xf32>
    %99 = vector.broadcast %98 : vector<2x16x1xf32> to vector<2x16x16xf32>
    %100 = arith.mulf %95, %99 : vector<2x16x16xf32>
    "tpu.trace_start"() <{level = 10 : i32, message = "bqk,bkd->bqd"}> : () -> ()
    %cst_38 = arith.constant dense<0.000000e+00> : vector<2x16x8xf32>
    %101 = tpu.matmul %100, %89, %cst_38 {dimension_numbers = #tpu.dot_dimension_numbers<[2], [1], [1], [2], [0, 0, 0, 1, 1, 2], [0], [0]>} : vector<2x16x16xf32>, vector<2x16x8xf32>, vector<2x16x8xf32> -> vector<2x16x8xf32>
    "tpu.trace_stop"() : () -> ()
    %102 = vector.shape_cast %101 : vector<2x16x8xf32> to vector<32x8xf32>
    %103 = vector.extract_strided_slice %47 {offsets = [16, 0], sizes = [8, 32], strides = [1, 1]} : vector<32x32xf32> to vector<8x32xf32>
    %cst_39 = arith.constant dense<0.000000e+00> : vector<32x32xf32>
    %104 = tpu.matmul %102, %103, %cst_39 {dimension_numbers = #tpu.dot_dimension_numbers<[1], [0], [0], [1], [0, 0, 1, 1], [], []>} : vector<32x8xf32>, vector<8x32xf32>, vector<32x32xf32> -> vector<32x32xf32>
    %105 = arith.addf %86, %104 : vector<32x32xf32>
    %106 = vector.extract_strided_slice %45 {offsets = [0, 0, 24], sizes = [2, 16, 8], strides = [1, 1, 1]} : vector<2x16x96xf32> to vector<2x16x8xf32>
    %107 = vector.extract_strided_slice %45 {offsets = [0, 0, 56], sizes = [2, 16, 8], strides = [1, 1, 1]} : vector<2x16x96xf32> to vector<2x16x8xf32>
    %108 = vector.extract_strided_slice %45 {offsets = [0, 0, 88], sizes = [2, 16, 8], strides = [1, 1, 1]} : vector<2x16x96xf32> to vector<2x16x8xf32>
    "tpu.trace_start"() <{level = 10 : i32, message = "bqd,bkd->bqk"}> : () -> ()
    %cst_40 = arith.constant dense<0.000000e+00> : vector<2x16x16xf32>
    %109 = tpu.matmul %106, %107, %cst_40 {dimension_numbers = #tpu.dot_dimension_numbers<[2], [2], [1], [1], [0, 0, 0, 1, 1, 1], [0], [0]>} : vector<2x16x8xf32>, vector<2x16x8xf32>, vector<2x16x16xf32> -> vector<2x16x16xf32>
    "tpu.trace_stop"() : () -> ()
    %cst_41 = arith.constant dense<0xFF800000> : vector<2x16xf32>
    %110 = vector.multi_reduction <maximumf>, %109, %cst_41 [2] : vector<2x16x16xf32> to vector<2x16xf32>
    %111 = vector.shape_cast %110 : vector<2x16xf32> to vector<2x16x1xf32>
    %112 = vector.broadcast %111 : vector<2x16x1xf32> to vector<2x16x16xf32>
    %113 = arith.subf %109, %112 : vector<2x16x16xf32>
    %114 = math.exp %113 : vector<2x16x16xf32>
    %cst_42 = arith.constant dense<0.000000e+00> : vector<2x16xf32>
    %115 = vector.multi_reduction <add>, %114, %cst_42 [2] : vector<2x16x16xf32> to vector<2x16xf32>
    %116 = vector.shape_cast %115 : vector<2x16xf32> to vector<2x16x1xf32>
    %117 = tpu.reciprocal %116 {approx = true} : vector<2x16x1xf32> -> vector<2x16x1xf32>
    %118 = vector.broadcast %117 : vector<2x16x1xf32> to vector<2x16x16xf32>
    %119 = arith.mulf %114, %118 : vector<2x16x16xf32>
    "tpu.trace_start"() <{level = 10 : i32, message = "bqk,bkd->bqd"}> : () -> ()
    %cst_43 = arith.constant dense<0.000000e+00> : vector<2x16x8xf32>
    %120 = tpu.matmul %119, %108, %cst_43 {dimension_numbers = #tpu.dot_dimension_numbers<[2], [1], [1], [2], [0, 0, 0, 1, 1, 2], [0], [0]>} : vector<2x16x16xf32>, vector<2x16x8xf32>, vector<2x16x8xf32> -> vector<2x16x8xf32>
    "tpu.trace_stop"() : () -> ()
    %121 = vector.shape_cast %120 : vector<2x16x8xf32> to vector<32x8xf32>
    %122 = vector.extract_strided_slice %47 {offsets = [24, 0], sizes = [8, 32], strides = [1, 1]} : vector<32x32xf32> to vector<8x32xf32>
    %cst_44 = arith.constant dense<0.000000e+00> : vector<32x32xf32>
    %123 = tpu.matmul %121, %122, %cst_44 {dimension_numbers = #tpu.dot_dimension_numbers<[1], [0], [0], [1], [0, 0, 1, 1], [], []>} : vector<32x8xf32>, vector<8x32xf32>, vector<32x32xf32> -> vector<32x32xf32>
    %124 = arith.addf %105, %123 : vector<32x32xf32>
    %125 = arith.addf %5, %124 : vector<32x32xf32>
    %126 = vector.broadcast %10 : vector<1x32xf32> to vector<32x32xf32>
    %127 = arith.addf %125, %126 : vector<32x32xf32>
    %cst_45 = arith.constant dense<0.000000e+00> : vector<32xf32>
    %128 = vector.multi_reduction <add>, %127, %cst_45 [1] : vector<32x32xf32> to vector<32xf32>
    %129 = vector.shape_cast %128 : vector<32xf32> to vector<32x1xf32>
    %cst_46 = arith.constant 3.200000e+01 : f32
    %130 = vector.broadcast %cst_46 : f32 to vector<32x1xf32>
    %131 = arith.divf %129, %130 : vector<32x1xf32>
    %132 = vector.broadcast %131 : vector<32x1xf32> to vector<32x32xf32>
    %133 = arith.subf %127, %132 : vector<32x32xf32>
    %134 = arith.mulf %133, %133 : vector<32x32xf32>
    %cst_47 = arith.constant dense<0.000000e+00> : vector<32xf32>
    %135 = vector.multi_reduction <add>, %134, %cst_47 [1] : vector<32x32xf32> to vector<32xf32>
    %136 = vector.shape_cast %135 : vector<32xf32> to vector<32x1xf32>
    %cst_48 = arith.constant 3.200000e+01 : f32
    %137 = vector.broadcast %cst_48 : f32 to vector<32x1xf32>
    %138 = arith.divf %136, %137 : vector<32x1xf32>
    %139 = vector.broadcast %131 : vector<32x1xf32> to vector<32x32xf32>
    %140 = arith.subf %127, %139 : vector<32x32xf32>
    %cst_49 = arith.constant 9.99999974E-6 : f32
    %141 = vector.broadcast %cst_49 : f32 to vector<32x1xf32>
    %142 = arith.addf %138, %141 : vector<32x1xf32>
    %143 = math.rsqrt %142 : vector<32x1xf32>
    %144 = vector.broadcast %143 : vector<32x1xf32> to vector<32x32xf32>
    %145 = arith.mulf %140, %144 : vector<32x32xf32>
    %146 = vector.broadcast %11 : vector<1x32xf32> to vector<32x32xf32>
    %147 = arith.mulf %145, %146 : vector<32x32xf32>
    %148 = vector.broadcast %12 : vector<1x32xf32> to vector<32x32xf32>
    %149 = arith.addf %147, %148 : vector<32x32xf32>
    %c0_50 = arith.constant 0 : index
    %c0_51 = arith.constant 0 : index
    %c0_52 = arith.constant 0 : index
    %150 = vector.load %arg6[%c0_50, %c0_51, %c0_52] : memref<2x32x128xf32, #tpu.memory_space<vmem>>, vector<1x32x128xf32>
    %151 = vector.shape_cast %150 : vector<1x32x128xf32> to vector<32x128xf32>
    %cst_53 = arith.constant dense<0.000000e+00> : vector<32x128xf32>
    %152 = tpu.matmul %149, %151, %cst_53 {dimension_numbers = #tpu.dot_dimension_numbers<[1], [0], [0], [1], [0, 0, 1, 1], [], []>} : vector<32x32xf32>, vector<32x128xf32>, vector<32x128xf32> -> vector<32x128xf32>
    %c0_54 = arith.constant 0 : index
    %c0_55 = arith.constant 0 : index
    %c0_56 = arith.constant 0 : index
    %153 = vector.load %arg7[%c0_54, %c0_55, %c0_56] : memref<2x1x128xf32, #tpu.memory_space<vmem>>, vector<1x1x128xf32>
    %154 = vector.shape_cast %153 : vector<1x1x128xf32> to vector<1x128xf32>
    %155 = vector.broadcast %154 : vector<1x128xf32> to vector<32x128xf32>
    %156 = arith.addf %152, %155 : vector<32x128xf32>
    %cst_57 = arith.constant 0.000000e+00 : f32
    %157 = vector.broadcast %cst_57 : f32 to vector<32x128xf32>
    %158 = arith.maximumf %156, %157 : vector<32x128xf32>
    %c0_58 = arith.constant 0 : index
    %c0_59 = arith.constant 0 : index
    %c0_60 = arith.constant 0 : index
    %159 = vector.load %arg8[%c0_58, %c0_59, %c0_60] : memref<2x128x32xf32, #tpu.memory_space<vmem>>, vector<1x128x32xf32>
    %160 = vector.shape_cast %159 : vector<1x128x32xf32> to vector<128x32xf32>
    %cst_61 = arith.constant dense<0.000000e+00> : vector<32x32xf32>
    %161 = tpu.matmul %158, %160, %cst_61 {dimension_numbers = #tpu.dot_dimension_numbers<[1], [0], [0], [1], [0, 0, 1, 1], [], []>} : vector<32x128xf32>, vector<128x32xf32>, vector<32x32xf32> -> vector<32x32xf32>
    %162 = vector.broadcast %13 : vector<1x32xf32> to vector<32x32xf32>
    %163 = arith.addf %161, %162 : vector<32x32xf32>
    %164 = arith.addf %127, %163 : vector<32x32xf32>
    %165 = arith.addf %164, %5 : vector<32x32xf32>
    %cst_62 = arith.constant dense<0.000000e+00> : vector<32xf32>
    %166 = vector.multi_reduction <add>, %165, %cst_62 [1] : vector<32x32xf32> to vector<32xf32>
    %167 = vector.shape_cast %166 : vector<32xf32> to vector<32x1xf32>
    %cst_63 = arith.constant 3.200000e+01 : f32
    %168 = vector.broadcast %cst_63 : f32 to vector<32x1xf32>
    %169 = arith.divf %167, %168 : vector<32x1xf32>
    %170 = vector.broadcast %169 : vector<32x1xf32> to vector<32x32xf32>
    %171 = arith.subf %165, %170 : vector<32x32xf32>
    %172 = arith.mulf %171, %171 : vector<32x32xf32>
    %cst_64 = arith.constant dense<0.000000e+00> : vector<32xf32>
    %173 = vector.multi_reduction <add>, %172, %cst_64 [1] : vector<32x32xf32> to vector<32xf32>
    %174 = vector.shape_cast %173 : vector<32xf32> to vector<32x1xf32>
    %cst_65 = arith.constant 3.200000e+01 : f32
    %175 = vector.broadcast %cst_65 : f32 to vector<32x1xf32>
    %176 = arith.divf %174, %175 : vector<32x1xf32>
    %177 = vector.broadcast %169 : vector<32x1xf32> to vector<32x32xf32>
    %178 = arith.subf %165, %177 : vector<32x32xf32>
    %cst_66 = arith.constant 9.99999974E-6 : f32
    %179 = vector.broadcast %cst_66 : f32 to vector<32x1xf32>
    %180 = arith.addf %176, %179 : vector<32x1xf32>
    %181 = math.rsqrt %180 : vector<32x1xf32>
    %182 = vector.broadcast %181 : vector<32x1xf32> to vector<32x32xf32>
    %183 = arith.mulf %178, %182 : vector<32x32xf32>
    %184 = vector.broadcast %14 : vector<1x32xf32> to vector<32x32xf32>
    %185 = arith.mulf %183, %184 : vector<32x32xf32>
    %186 = vector.broadcast %15 : vector<1x32xf32> to vector<32x32xf32>
    %187 = arith.addf %185, %186 : vector<32x32xf32>
    %c1 = arith.constant 1 : index
    %c0_67 = arith.constant 0 : index
    %c0_68 = arith.constant 0 : index
    %188 = vector.load %arg9[%c1, %c0_67, %c0_68] : memref<2x8x32xf32, #tpu.memory_space<vmem>>, vector<1x8x32xf32>
    %189 = vector.shape_cast %188 : vector<1x8x32xf32> to vector<8x32xf32>
    %190 = vector.extract_strided_slice %189 {offsets = [0, 0], sizes = [1, 32], strides = [1, 1]} : vector<8x32xf32> to vector<1x32xf32>
    %191 = vector.extract_strided_slice %189 {offsets = [1, 0], sizes = [1, 32], strides = [1, 1]} : vector<8x32xf32> to vector<1x32xf32>
    %192 = vector.extract_strided_slice %189 {offsets = [2, 0], sizes = [1, 32], strides = [1, 1]} : vector<8x32xf32> to vector<1x32xf32>
    %193 = vector.extract_strided_slice %189 {offsets = [3, 0], sizes = [1, 32], strides = [1, 1]} : vector<8x32xf32> to vector<1x32xf32>
    %194 = vector.extract_strided_slice %189 {offsets = [4, 0], sizes = [1, 32], strides = [1, 1]} : vector<8x32xf32> to vector<1x32xf32>
    %195 = vector.extract_strided_slice %189 {offsets = [5, 0], sizes = [1, 32], strides = [1, 1]} : vector<8x32xf32> to vector<1x32xf32>
    %196 = vector.extract_strided_slice %189 {offsets = [6, 0], sizes = [1, 32], strides = [1, 1]} : vector<8x32xf32> to vector<1x32xf32>
    %197 = vector.extract_strided_slice %189 {offsets = [7, 0], sizes = [1, 32], strides = [1, 1]} : vector<8x32xf32> to vector<1x32xf32>
    %cst_69 = arith.constant dense<0.000000e+00> : vector<32xf32>
    %198 = vector.multi_reduction <add>, %187, %cst_69 [1] : vector<32x32xf32> to vector<32xf32>
    %199 = vector.shape_cast %198 : vector<32xf32> to vector<32x1xf32>
    %cst_70 = arith.constant 3.200000e+01 : f32
    %200 = vector.broadcast %cst_70 : f32 to vector<32x1xf32>
    %201 = arith.divf %199, %200 : vector<32x1xf32>
    %202 = vector.broadcast %201 : vector<32x1xf32> to vector<32x32xf32>
    %203 = arith.subf %187, %202 : vector<32x32xf32>
    %204 = arith.mulf %203, %203 : vector<32x32xf32>
    %cst_71 = arith.constant dense<0.000000e+00> : vector<32xf32>
    %205 = vector.multi_reduction <add>, %204, %cst_71 [1] : vector<32x32xf32> to vector<32xf32>
    %206 = vector.shape_cast %205 : vector<32xf32> to vector<32x1xf32>
    %cst_72 = arith.constant 3.200000e+01 : f32
    %207 = vector.broadcast %cst_72 : f32 to vector<32x1xf32>
    %208 = arith.divf %206, %207 : vector<32x1xf32>
    %209 = vector.broadcast %201 : vector<32x1xf32> to vector<32x32xf32>
    %210 = arith.subf %187, %209 : vector<32x32xf32>
    %cst_73 = arith.constant 9.99999974E-6 : f32
    %211 = vector.broadcast %cst_73 : f32 to vector<32x1xf32>
    %212 = arith.addf %208, %211 : vector<32x1xf32>
    %213 = math.rsqrt %212 : vector<32x1xf32>
    %214 = vector.broadcast %213 : vector<32x1xf32> to vector<32x32xf32>
    %215 = arith.mulf %210, %214 : vector<32x32xf32>
    %216 = vector.broadcast %190 : vector<1x32xf32> to vector<32x32xf32>
    %217 = arith.mulf %215, %216 : vector<32x32xf32>
    %218 = vector.broadcast %191 : vector<1x32xf32> to vector<32x32xf32>
    %219 = arith.addf %217, %218 : vector<32x32xf32>
    %c1_74 = arith.constant 1 : index
    %c0_75 = arith.constant 0 : index
    %c0_76 = arith.constant 0 : index
    %220 = vector.load %arg3[%c1_74, %c0_75, %c0_76] : memref<2x32x96xf32, #tpu.memory_space<vmem>>, vector<1x32x96xf32>
    %221 = vector.shape_cast %220 : vector<1x32x96xf32> to vector<32x96xf32>
    %cst_77 = arith.constant dense<0.000000e+00> : vector<32x96xf32>
    %222 = tpu.matmul %219, %221, %cst_77 {dimension_numbers = #tpu.dot_dimension_numbers<[1], [0], [0], [1], [0, 0, 1, 1], [], []>} : vector<32x32xf32>, vector<32x96xf32>, vector<32x96xf32> -> vector<32x96xf32>
    %c1_78 = arith.constant 1 : index
    %c0_79 = arith.constant 0 : index
    %c0_80 = arith.constant 0 : index
    %223 = vector.load %arg4[%c1_78, %c0_79, %c0_80] : memref<2x1x96xf32, #tpu.memory_space<vmem>>, vector<1x1x96xf32>
    %224 = vector.shape_cast %223 : vector<1x1x96xf32> to vector<1x96xf32>
    %225 = vector.broadcast %224 : vector<1x96xf32> to vector<32x96xf32>
    %226 = arith.addf %222, %225 : vector<32x96xf32>
    %227 = vector.shape_cast %226 : vector<32x96xf32> to vector<2x16x96xf32>
    %c1_81 = arith.constant 1 : index
    %c0_82 = arith.constant 0 : index
    %c0_83 = arith.constant 0 : index
    %228 = vector.load %arg5[%c1_81, %c0_82, %c0_83] : memref<2x32x32xf32, #tpu.memory_space<vmem>>, vector<1x32x32xf32>
    %229 = vector.shape_cast %228 : vector<1x32x32xf32> to vector<32x32xf32>
    %cst_84 = arith.constant 0.000000e+00 : f32
    %230 = vector.broadcast %cst_84 : f32 to vector<32x32xf32>
    %231 = vector.extract_strided_slice %227 {offsets = [0, 0, 0], sizes = [2, 16, 8], strides = [1, 1, 1]} : vector<2x16x96xf32> to vector<2x16x8xf32>
    %232 = vector.extract_strided_slice %227 {offsets = [0, 0, 32], sizes = [2, 16, 8], strides = [1, 1, 1]} : vector<2x16x96xf32> to vector<2x16x8xf32>
    %233 = vector.extract_strided_slice %227 {offsets = [0, 0, 64], sizes = [2, 16, 8], strides = [1, 1, 1]} : vector<2x16x96xf32> to vector<2x16x8xf32>
    "tpu.trace_start"() <{level = 10 : i32, message = "bqd,bkd->bqk"}> : () -> ()
    %cst_85 = arith.constant dense<0.000000e+00> : vector<2x16x16xf32>
    %234 = tpu.matmul %231, %232, %cst_85 {dimension_numbers = #tpu.dot_dimension_numbers<[2], [2], [1], [1], [0, 0, 0, 1, 1, 1], [0], [0]>} : vector<2x16x8xf32>, vector<2x16x8xf32>, vector<2x16x16xf32> -> vector<2x16x16xf32>
    "tpu.trace_stop"() : () -> ()
    %cst_86 = arith.constant dense<0xFF800000> : vector<2x16xf32>
    %235 = vector.multi_reduction <maximumf>, %234, %cst_86 [2] : vector<2x16x16xf32> to vector<2x16xf32>
    %236 = vector.shape_cast %235 : vector<2x16xf32> to vector<2x16x1xf32>
    %237 = vector.broadcast %236 : vector<2x16x1xf32> to vector<2x16x16xf32>
    %238 = arith.subf %234, %237 : vector<2x16x16xf32>
    %239 = math.exp %238 : vector<2x16x16xf32>
    %cst_87 = arith.constant dense<0.000000e+00> : vector<2x16xf32>
    %240 = vector.multi_reduction <add>, %239, %cst_87 [2] : vector<2x16x16xf32> to vector<2x16xf32>
    %241 = vector.shape_cast %240 : vector<2x16xf32> to vector<2x16x1xf32>
    %242 = tpu.reciprocal %241 {approx = true} : vector<2x16x1xf32> -> vector<2x16x1xf32>
    %243 = vector.broadcast %242 : vector<2x16x1xf32> to vector<2x16x16xf32>
    %244 = arith.mulf %239, %243 : vector<2x16x16xf32>
    "tpu.trace_start"() <{level = 10 : i32, message = "bqk,bkd->bqd"}> : () -> ()
    %cst_88 = arith.constant dense<0.000000e+00> : vector<2x16x8xf32>
    %245 = tpu.matmul %244, %233, %cst_88 {dimension_numbers = #tpu.dot_dimension_numbers<[2], [1], [1], [2], [0, 0, 0, 1, 1, 2], [0], [0]>} : vector<2x16x16xf32>, vector<2x16x8xf32>, vector<2x16x8xf32> -> vector<2x16x8xf32>
    "tpu.trace_stop"() : () -> ()
    %246 = vector.shape_cast %245 : vector<2x16x8xf32> to vector<32x8xf32>
    %247 = vector.extract_strided_slice %229 {offsets = [0, 0], sizes = [8, 32], strides = [1, 1]} : vector<32x32xf32> to vector<8x32xf32>
    %cst_89 = arith.constant dense<0.000000e+00> : vector<32x32xf32>
    %248 = tpu.matmul %246, %247, %cst_89 {dimension_numbers = #tpu.dot_dimension_numbers<[1], [0], [0], [1], [0, 0, 1, 1], [], []>} : vector<32x8xf32>, vector<8x32xf32>, vector<32x32xf32> -> vector<32x32xf32>
    %249 = arith.addf %230, %248 : vector<32x32xf32>
    %250 = vector.extract_strided_slice %227 {offsets = [0, 0, 8], sizes = [2, 16, 8], strides = [1, 1, 1]} : vector<2x16x96xf32> to vector<2x16x8xf32>
    %251 = vector.extract_strided_slice %227 {offsets = [0, 0, 40], sizes = [2, 16, 8], strides = [1, 1, 1]} : vector<2x16x96xf32> to vector<2x16x8xf32>
    %252 = vector.extract_strided_slice %227 {offsets = [0, 0, 72], sizes = [2, 16, 8], strides = [1, 1, 1]} : vector<2x16x96xf32> to vector<2x16x8xf32>
    "tpu.trace_start"() <{level = 10 : i32, message = "bqd,bkd->bqk"}> : () -> ()
    %cst_90 = arith.constant dense<0.000000e+00> : vector<2x16x16xf32>
    %253 = tpu.matmul %250, %251, %cst_90 {dimension_numbers = #tpu.dot_dimension_numbers<[2], [2], [1], [1], [0, 0, 0, 1, 1, 1], [0], [0]>} : vector<2x16x8xf32>, vector<2x16x8xf32>, vector<2x16x16xf32> -> vector<2x16x16xf32>
    "tpu.trace_stop"() : () -> ()
    %cst_91 = arith.constant dense<0xFF800000> : vector<2x16xf32>
    %254 = vector.multi_reduction <maximumf>, %253, %cst_91 [2] : vector<2x16x16xf32> to vector<2x16xf32>
    %255 = vector.shape_cast %254 : vector<2x16xf32> to vector<2x16x1xf32>
    %256 = vector.broadcast %255 : vector<2x16x1xf32> to vector<2x16x16xf32>
    %257 = arith.subf %253, %256 : vector<2x16x16xf32>
    %258 = math.exp %257 : vector<2x16x16xf32>
    %cst_92 = arith.constant dense<0.000000e+00> : vector<2x16xf32>
    %259 = vector.multi_reduction <add>, %258, %cst_92 [2] : vector<2x16x16xf32> to vector<2x16xf32>
    %260 = vector.shape_cast %259 : vector<2x16xf32> to vector<2x16x1xf32>
    %261 = tpu.reciprocal %260 {approx = true} : vector<2x16x1xf32> -> vector<2x16x1xf32>
    %262 = vector.broadcast %261 : vector<2x16x1xf32> to vector<2x16x16xf32>
    %263 = arith.mulf %258, %262 : vector<2x16x16xf32>
    "tpu.trace_start"() <{level = 10 : i32, message = "bqk,bkd->bqd"}> : () -> ()
    %cst_93 = arith.constant dense<0.000000e+00> : vector<2x16x8xf32>
    %264 = tpu.matmul %263, %252, %cst_93 {dimension_numbers = #tpu.dot_dimension_numbers<[2], [1], [1], [2], [0, 0, 0, 1, 1, 2], [0], [0]>} : vector<2x16x16xf32>, vector<2x16x8xf32>, vector<2x16x8xf32> -> vector<2x16x8xf32>
    "tpu.trace_stop"() : () -> ()
    %265 = vector.shape_cast %264 : vector<2x16x8xf32> to vector<32x8xf32>
    %266 = vector.extract_strided_slice %229 {offsets = [8, 0], sizes = [8, 32], strides = [1, 1]} : vector<32x32xf32> to vector<8x32xf32>
    %cst_94 = arith.constant dense<0.000000e+00> : vector<32x32xf32>
    %267 = tpu.matmul %265, %266, %cst_94 {dimension_numbers = #tpu.dot_dimension_numbers<[1], [0], [0], [1], [0, 0, 1, 1], [], []>} : vector<32x8xf32>, vector<8x32xf32>, vector<32x32xf32> -> vector<32x32xf32>
    %268 = arith.addf %249, %267 : vector<32x32xf32>
    %269 = vector.extract_strided_slice %227 {offsets = [0, 0, 16], sizes = [2, 16, 8], strides = [1, 1, 1]} : vector<2x16x96xf32> to vector<2x16x8xf32>
    %270 = vector.extract_strided_slice %227 {offsets = [0, 0, 48], sizes = [2, 16, 8], strides = [1, 1, 1]} : vector<2x16x96xf32> to vector<2x16x8xf32>
    %271 = vector.extract_strided_slice %227 {offsets = [0, 0, 80], sizes = [2, 16, 8], strides = [1, 1, 1]} : vector<2x16x96xf32> to vector<2x16x8xf32>
    "tpu.trace_start"() <{level = 10 : i32, message = "bqd,bkd->bqk"}> : () -> ()
    %cst_95 = arith.constant dense<0.000000e+00> : vector<2x16x16xf32>
    %272 = tpu.matmul %269, %270, %cst_95 {dimension_numbers = #tpu.dot_dimension_numbers<[2], [2], [1], [1], [0, 0, 0, 1, 1, 1], [0], [0]>} : vector<2x16x8xf32>, vector<2x16x8xf32>, vector<2x16x16xf32> -> vector<2x16x16xf32>
    "tpu.trace_stop"() : () -> ()
    %cst_96 = arith.constant dense<0xFF800000> : vector<2x16xf32>
    %273 = vector.multi_reduction <maximumf>, %272, %cst_96 [2] : vector<2x16x16xf32> to vector<2x16xf32>
    %274 = vector.shape_cast %273 : vector<2x16xf32> to vector<2x16x1xf32>
    %275 = vector.broadcast %274 : vector<2x16x1xf32> to vector<2x16x16xf32>
    %276 = arith.subf %272, %275 : vector<2x16x16xf32>
    %277 = math.exp %276 : vector<2x16x16xf32>
    %cst_97 = arith.constant dense<0.000000e+00> : vector<2x16xf32>
    %278 = vector.multi_reduction <add>, %277, %cst_97 [2] : vector<2x16x16xf32> to vector<2x16xf32>
    %279 = vector.shape_cast %278 : vector<2x16xf32> to vector<2x16x1xf32>
    %280 = tpu.reciprocal %279 {approx = true} : vector<2x16x1xf32> -> vector<2x16x1xf32>
    %281 = vector.broadcast %280 : vector<2x16x1xf32> to vector<2x16x16xf32>
    %282 = arith.mulf %277, %281 : vector<2x16x16xf32>
    "tpu.trace_start"() <{level = 10 : i32, message = "bqk,bkd->bqd"}> : () -> ()
    %cst_98 = arith.constant dense<0.000000e+00> : vector<2x16x8xf32>
    %283 = tpu.matmul %282, %271, %cst_98 {dimension_numbers = #tpu.dot_dimension_numbers<[2], [1], [1], [2], [0, 0, 0, 1, 1, 2], [0], [0]>} : vector<2x16x16xf32>, vector<2x16x8xf32>, vector<2x16x8xf32> -> vector<2x16x8xf32>
    "tpu.trace_stop"() : () -> ()
    %284 = vector.shape_cast %283 : vector<2x16x8xf32> to vector<32x8xf32>
    %285 = vector.extract_strided_slice %229 {offsets = [16, 0], sizes = [8, 32], strides = [1, 1]} : vector<32x32xf32> to vector<8x32xf32>
    %cst_99 = arith.constant dense<0.000000e+00> : vector<32x32xf32>
    %286 = tpu.matmul %284, %285, %cst_99 {dimension_numbers = #tpu.dot_dimension_numbers<[1], [0], [0], [1], [0, 0, 1, 1], [], []>} : vector<32x8xf32>, vector<8x32xf32>, vector<32x32xf32> -> vector<32x32xf32>
    %287 = arith.addf %268, %286 : vector<32x32xf32>
    %288 = vector.extract_strided_slice %227 {offsets = [0, 0, 24], sizes = [2, 16, 8], strides = [1, 1, 1]} : vector<2x16x96xf32> to vector<2x16x8xf32>
    %289 = vector.extract_strided_slice %227 {offsets = [0, 0, 56], sizes = [2, 16, 8], strides = [1, 1, 1]} : vector<2x16x96xf32> to vector<2x16x8xf32>
    %290 = vector.extract_strided_slice %227 {offsets = [0, 0, 88], sizes = [2, 16, 8], strides = [1, 1, 1]} : vector<2x16x96xf32> to vector<2x16x8xf32>
    "tpu.trace_start"() <{level = 10 : i32, message = "bqd,bkd->bqk"}> : () -> ()
    %cst_100 = arith.constant dense<0.000000e+00> : vector<2x16x16xf32>
    %291 = tpu.matmul %288, %289, %cst_100 {dimension_numbers = #tpu.dot_dimension_numbers<[2], [2], [1], [1], [0, 0, 0, 1, 1, 1], [0], [0]>} : vector<2x16x8xf32>, vector<2x16x8xf32>, vector<2x16x16xf32> -> vector<2x16x16xf32>
    "tpu.trace_stop"() : () -> ()
    %cst_101 = arith.constant dense<0xFF800000> : vector<2x16xf32>
    %292 = vector.multi_reduction <maximumf>, %291, %cst_101 [2] : vector<2x16x16xf32> to vector<2x16xf32>
    %293 = vector.shape_cast %292 : vector<2x16xf32> to vector<2x16x1xf32>
    %294 = vector.broadcast %293 : vector<2x16x1xf32> to vector<2x16x16xf32>
    %295 = arith.subf %291, %294 : vector<2x16x16xf32>
    %296 = math.exp %295 : vector<2x16x16xf32>
    %cst_102 = arith.constant dense<0.000000e+00> : vector<2x16xf32>
    %297 = vector.multi_reduction <add>, %296, %cst_102 [2] : vector<2x16x16xf32> to vector<2x16xf32>
    %298 = vector.shape_cast %297 : vector<2x16xf32> to vector<2x16x1xf32>
    %299 = tpu.reciprocal %298 {approx = true} : vector<2x16x1xf32> -> vector<2x16x1xf32>
    %300 = vector.broadcast %299 : vector<2x16x1xf32> to vector<2x16x16xf32>
    %301 = arith.mulf %296, %300 : vector<2x16x16xf32>
    "tpu.trace_start"() <{level = 10 : i32, message = "bqk,bkd->bqd"}> : () -> ()
    %cst_103 = arith.constant dense<0.000000e+00> : vector<2x16x8xf32>
    %302 = tpu.matmul %301, %290, %cst_103 {dimension_numbers = #tpu.dot_dimension_numbers<[2], [1], [1], [2], [0, 0, 0, 1, 1, 2], [0], [0]>} : vector<2x16x16xf32>, vector<2x16x8xf32>, vector<2x16x8xf32> -> vector<2x16x8xf32>
    "tpu.trace_stop"() : () -> ()
    %303 = vector.shape_cast %302 : vector<2x16x8xf32> to vector<32x8xf32>
    %304 = vector.extract_strided_slice %229 {offsets = [24, 0], sizes = [8, 32], strides = [1, 1]} : vector<32x32xf32> to vector<8x32xf32>
    %cst_104 = arith.constant dense<0.000000e+00> : vector<32x32xf32>
    %305 = tpu.matmul %303, %304, %cst_104 {dimension_numbers = #tpu.dot_dimension_numbers<[1], [0], [0], [1], [0, 0, 1, 1], [], []>} : vector<32x8xf32>, vector<8x32xf32>, vector<32x32xf32> -> vector<32x32xf32>
    %306 = arith.addf %287, %305 : vector<32x32xf32>
    %307 = arith.addf %187, %306 : vector<32x32xf32>
    %308 = vector.broadcast %192 : vector<1x32xf32> to vector<32x32xf32>
    %309 = arith.addf %307, %308 : vector<32x32xf32>
    %cst_105 = arith.constant dense<0.000000e+00> : vector<32xf32>
    %310 = vector.multi_reduction <add>, %309, %cst_105 [1] : vector<32x32xf32> to vector<32xf32>
    %311 = vector.shape_cast %310 : vector<32xf32> to vector<32x1xf32>
    %cst_106 = arith.constant 3.200000e+01 : f32
    %312 = vector.broadcast %cst_106 : f32 to vector<32x1xf32>
    %313 = arith.divf %311, %312 : vector<32x1xf32>
    %314 = vector.broadcast %313 : vector<32x1xf32> to vector<32x32xf32>
    %315 = arith.subf %309, %314 : vector<32x32xf32>
    %316 = arith.mulf %315, %315 : vector<32x32xf32>
    %cst_107 = arith.constant dense<0.000000e+00> : vector<32xf32>
    %317 = vector.multi_reduction <add>, %316, %cst_107 [1] : vector<32x32xf32> to vector<32xf32>
    %318 = vector.shape_cast %317 : vector<32xf32> to vector<32x1xf32>
    %cst_108 = arith.constant 3.200000e+01 : f32
    %319 = vector.broadcast %cst_108 : f32 to vector<32x1xf32>
    %320 = arith.divf %318, %319 : vector<32x1xf32>
    %321 = vector.broadcast %313 : vector<32x1xf32> to vector<32x32xf32>
    %322 = arith.subf %309, %321 : vector<32x32xf32>
    %cst_109 = arith.constant 9.99999974E-6 : f32
    %323 = vector.broadcast %cst_109 : f32 to vector<32x1xf32>
    %324 = arith.addf %320, %323 : vector<32x1xf32>
    %325 = math.rsqrt %324 : vector<32x1xf32>
    %326 = vector.broadcast %325 : vector<32x1xf32> to vector<32x32xf32>
    %327 = arith.mulf %322, %326 : vector<32x32xf32>
    %328 = vector.broadcast %193 : vector<1x32xf32> to vector<32x32xf32>
    %329 = arith.mulf %327, %328 : vector<32x32xf32>
    %330 = vector.broadcast %194 : vector<1x32xf32> to vector<32x32xf32>
    %331 = arith.addf %329, %330 : vector<32x32xf32>
    %c1_110 = arith.constant 1 : index
    %c0_111 = arith.constant 0 : index
    %c0_112 = arith.constant 0 : index
    %332 = vector.load %arg6[%c1_110, %c0_111, %c0_112] : memref<2x32x128xf32, #tpu.memory_space<vmem>>, vector<1x32x128xf32>
    %333 = vector.shape_cast %332 : vector<1x32x128xf32> to vector<32x128xf32>
    %cst_113 = arith.constant dense<0.000000e+00> : vector<32x128xf32>
    %334 = tpu.matmul %331, %333, %cst_113 {dimension_numbers = #tpu.dot_dimension_numbers<[1], [0], [0], [1], [0, 0, 1, 1], [], []>} : vector<32x32xf32>, vector<32x128xf32>, vector<32x128xf32> -> vector<32x128xf32>
    %c1_114 = arith.constant 1 : index
    %c0_115 = arith.constant 0 : index
    %c0_116 = arith.constant 0 : index
    %335 = vector.load %arg7[%c1_114, %c0_115, %c0_116] : memref<2x1x128xf32, #tpu.memory_space<vmem>>, vector<1x1x128xf32>
    %336 = vector.shape_cast %335 : vector<1x1x128xf32> to vector<1x128xf32>
    %337 = vector.broadcast %336 : vector<1x128xf32> to vector<32x128xf32>
    %338 = arith.addf %334, %337 : vector<32x128xf32>
    %cst_117 = arith.constant 0.000000e+00 : f32
    %339 = vector.broadcast %cst_117 : f32 to vector<32x128xf32>
    %340 = arith.maximumf %338, %339 : vector<32x128xf32>
    %c1_118 = arith.constant 1 : index
    %c0_119 = arith.constant 0 : index
    %c0_120 = arith.constant 0 : index
    %341 = vector.load %arg8[%c1_118, %c0_119, %c0_120] : memref<2x128x32xf32, #tpu.memory_space<vmem>>, vector<1x128x32xf32>
    %342 = vector.shape_cast %341 : vector<1x128x32xf32> to vector<128x32xf32>
    %cst_121 = arith.constant dense<0.000000e+00> : vector<32x32xf32>
    %343 = tpu.matmul %340, %342, %cst_121 {dimension_numbers = #tpu.dot_dimension_numbers<[1], [0], [0], [1], [0, 0, 1, 1], [], []>} : vector<32x128xf32>, vector<128x32xf32>, vector<32x32xf32> -> vector<32x32xf32>
    %344 = vector.broadcast %195 : vector<1x32xf32> to vector<32x32xf32>
    %345 = arith.addf %343, %344 : vector<32x32xf32>
    %346 = arith.addf %309, %345 : vector<32x32xf32>
    %347 = arith.addf %346, %187 : vector<32x32xf32>
    %cst_122 = arith.constant dense<0.000000e+00> : vector<32xf32>
    %348 = vector.multi_reduction <add>, %347, %cst_122 [1] : vector<32x32xf32> to vector<32xf32>
    %349 = vector.shape_cast %348 : vector<32xf32> to vector<32x1xf32>
    %cst_123 = arith.constant 3.200000e+01 : f32
    %350 = vector.broadcast %cst_123 : f32 to vector<32x1xf32>
    %351 = arith.divf %349, %350 : vector<32x1xf32>
    %352 = vector.broadcast %351 : vector<32x1xf32> to vector<32x32xf32>
    %353 = arith.subf %347, %352 : vector<32x32xf32>
    %354 = arith.mulf %353, %353 : vector<32x32xf32>
    %cst_124 = arith.constant dense<0.000000e+00> : vector<32xf32>
    %355 = vector.multi_reduction <add>, %354, %cst_124 [1] : vector<32x32xf32> to vector<32xf32>
    %356 = vector.shape_cast %355 : vector<32xf32> to vector<32x1xf32>
    %cst_125 = arith.constant 3.200000e+01 : f32
    %357 = vector.broadcast %cst_125 : f32 to vector<32x1xf32>
    %358 = arith.divf %356, %357 : vector<32x1xf32>
    %359 = vector.broadcast %351 : vector<32x1xf32> to vector<32x32xf32>
    %360 = arith.subf %347, %359 : vector<32x32xf32>
    %cst_126 = arith.constant 9.99999974E-6 : f32
    %361 = vector.broadcast %cst_126 : f32 to vector<32x1xf32>
    %362 = arith.addf %358, %361 : vector<32x1xf32>
    %363 = math.rsqrt %362 : vector<32x1xf32>
    %364 = vector.broadcast %363 : vector<32x1xf32> to vector<32x32xf32>
    %365 = arith.mulf %360, %364 : vector<32x32xf32>
    %366 = vector.broadcast %196 : vector<1x32xf32> to vector<32x32xf32>
    %367 = arith.mulf %365, %366 : vector<32x32xf32>
    %368 = vector.broadcast %197 : vector<1x32xf32> to vector<32x32xf32>
    %369 = arith.addf %367, %368 : vector<32x32xf32>
    %370 = vector.shape_cast %369 : vector<32x32xf32> to vector<2x16x32xf32>
    %cst_127 = arith.constant dense<0xFF800000> : vector<2x32xf32>
    %371 = vector.multi_reduction <maximumf>, %370, %cst_127 [1] : vector<2x16x32xf32> to vector<2x32xf32>
    %c0_128 = arith.constant 0 : index
    %c0_129 = arith.constant 0 : index
    %372 = vector.load %arg10[%c0_128, %c0_129] : memref<32x128xf32, #tpu.memory_space<vmem>>, vector<32x128xf32>
    %cst_130 = arith.constant dense<0.000000e+00> : vector<2x128xf32>
    %373 = tpu.matmul %371, %372, %cst_130 {dimension_numbers = #tpu.dot_dimension_numbers<[1], [0], [0], [1], [0, 0, 1, 1], [], []>} : vector<2x32xf32>, vector<32x128xf32>, vector<2x128xf32> -> vector<2x128xf32>
    %c0_131 = arith.constant 0 : index
    %c0_132 = arith.constant 0 : index
    %374 = vector.load %arg11[%c0_131, %c0_132] : memref<1x128xf32, #tpu.memory_space<vmem>>, vector<1x128xf32>
    %375 = vector.broadcast %374 : vector<1x128xf32> to vector<2x128xf32>
    %376 = arith.addf %373, %375 : vector<2x128xf32>
    %c0_133 = arith.constant 0 : index
    %c0_134 = arith.constant 0 : index
    %377 = vector.load %arg12[%c0_133, %c0_134] : memref<2x128xf32, #tpu.memory_space<vmem>>, vector<2x128xf32>
    tpu.vector_store %arg12[%c0_133, %c0_134], %376 {strides = array<i32>} : memref<2x128xf32, #tpu.memory_space<vmem>>, vector<2x128xf32>,
    return
  }
}

</mosaic_0001>

<bundles_post_ra>
// kernel: _forward_impl.1
= control target key start
LH: loop header
LB: loop body
LE: loop exit
PB: predicated region body
PF: predicated region fallthrough
CT: control target
= control target key end

     0   :  { %vm52_vm0 = vcmask 130048   ;;  %s7926_s0 = inlined_call_operand.vmem [shape: f32[2,16,16], index: 0, kind: input, shape index: {}]   ;;  %s7927_s1 = inlined_call_operand.vmem [shape: f32[16,32], index: 1, kind: input, shape index: {}]   ;;  %s7928_s2 = inlined_call_operand.vmem [shape: f32[32,32], index: 2, kind: input, shape index: {}]   ;;  %s7929_s3 = inlined_call_operand.vmem [shape: f32[2,32,96], index: 3, kind: input, shape index: {}]   ;;  %s7930_s4 = inlined_call_operand.vmem [shape: f32[2,1,96], index: 4, kind: input, shape index: {}]   ;;  %s7931_s5 = inlined_call_operand.vmem [shape: f32[2,32,32], index: 5, kind: input, shape index: {}]   ;;  %s7932_s6 = inlined_call_operand.vmem [shape: f32[2,32,128], index: 6, kind: input, shape index: {}]   ;;  %s7933_s7 = inlined_call_operand.vmem [shape: f32[2,1,128], index: 7, kind: input, shape index: {}]   ;;  %s7934_s8 = inlined_call_operand.vmem [shape: f32[2,128,32], index: 8, kind: input, shape index: {}]   ;;  %s7935_s9 = inlined_call_operand.vmem [shape: f32[2,8,32], index: 9, kind: input, shape index: {}]   ;;  %s7936_s10 = inlined_call_operand.vmem [shape: f32[32,128], index: 10, kind: input, shape index: {}]   ;;  %s7937_s11 = inlined_call_operand.vmem [shape: f32[1,128], index: 11, kind: input, shape index: {}]   ;;  %s7938_s12 = inlined_call_operand.hbm [shape: f32[2,128], index: 12, kind: output, shape index: {}]  }
   0x1   :  { %v46_v0 = vld [vmem:[%s7927_s1] sm:$0xff]  ;;  %v47_v1 = vld [vmem:[%s7927_s1 + $0x8] sm:$0xff] }
   0x2   :  { %v42_v2 = vld [vmem:[%s7926_s0] sm:$0xff]  ;;  %v6249_v3 = vpack.c.bf16 %v47_v1, %v46_v0 }
   0x3   :  { %5812 = vmatprep.mubr.msk.f32.mxu0 %vm52_vm0, %v42_v2 }
   0x4   :  { %17 = vsyncpa [#allocation3], 0  ;;  %6250 = vmatprep.subr.bf16.mxu0 %v6249_v3  ;;  %v43_v4 = vld [vmem:[%s7926_s0 + $0x8] sm:$0xff]  ;;  %v44_v5 = vld [vmem:[%s7926_s0 + $0x10] sm:$0xff]  ;;  %vm151_vm1 = vcmask 261120   ;;  %v205_v51 = vlaneseq  ;;  %vm339_vm2 = vcmask 64512  }
   0x5   :  { %6252 = vmatpush3.bf16.msra.mxu0 %v6249_v3  ;;  %v45_v6 = vld [vmem:[%s7926_s0 + $0x18] sm:$0xff]  ;;  %v48_v7 = vld [vmem:[%s7928_s2] sm:$0xff]  ;;  %v49_v9 = vld [vmem:[%s7928_s2 + $0x8] sm:$0xff]  ;;  %s6916_s13 = smov 96   ;;  %s6917_s14 = smov 64   ;;  %vm6928_vm4 = vmmov 0  }
   0x6   :  { %v51_v12 = vld [vmem:[%s7928_s2 + $0x18] sm:$0xff]  ;;  %v50_v13 = vld [vmem:[%s7928_s2 + $0x10] sm:$0xff]  ;;  %v221_v43 = vld [vmem:[%s7929_s3] sm:$0xff]  ;;  %v7066_v57 = vshrl.u32 %v205_v51, 7  ;;  %s6918_s15 = smov 88   ;;  %s6919_s16 = smov 120  }
   0x7   :  { %v222_v44 = vld [vmem:[%s7929_s3 + $0x8] sm:$0xff]  ;;  %v223_v46 = vld [vmem:[%s7929_s3 + $0x10] sm:$0xff]  ;;  %v224_v47 = vld [vmem:[%s7929_s3 + $0x18] sm:$0xff]  ;;  %s6920_s17 = smov 56   ;;  %s6921_s18 = smov 80   ;;  %vm5283_vm5 = vcmask 1041409  }
   0x8   :  { %5813 = vmatmul.mubr.msk.f32.vlgmr.msra.gmra.mrb[0].mxu0 %vm52_vm0, %v43_v4  ;;  %v6253_v45 = vpack.c.bf16 %v222_v44, %v221_v43  ;;  %v6257_v48 = vpack.c.bf16 %v224_v47, %v223_v46  ;;  %v207_v62 = vsub.s32 0, %v7066_v57  ;;  %v7072_v63 = vld [vmem:[%s7935_s9] sm:$0xff]  ;;  %v215_v1 = vsub.s32 1, %v7066_v57  ;;  %vm7114_vm3 = vmpackc.low %vm339_vm2, %vm339_vm2  ;;  %s6922_s19 = smov 112   ;;  %s6923_s22 = smov 48  }
   0x9   :  { %5815 = vmatprep.mubr.msk.f32.mxu0 %vm52_vm0, %v44_v5  ;;  %s6924_s23 = smov 72   ;;  %s6925_s24 = smov 104  }
   0xa   :  { %6254 = vmatprep.subr.bf16.mxu0 %v6253_v45  ;;  %v208_v2 = vrot.slane %v7072_v63, %v207_v62  ;;  %v216_v5 = vrot.slane %v7072_v63, %v215_v1  ;;  %s6926_s27 = smov 40  }
   0xb   :  { %6256 = vmatpush3.bf16.msra.mxu0 %v6253_v45 }
   0xc   :  { %5816 = vmatmul.mubr.msk.f32.gmra.mrb[2].mxu0 %vm52_vm0, %v45_v6  ;;  %6258 = vmatprep.subr.bf16.mxu0 %v6257_v48 }
   0xf   :  { %6260 = vmatpush3.bf16.msra.mxu0 %v6257_v48 }
  0xdb   :  { %v5814_v8 = vpop.f32.mrb[0].mxu0 }
  0xdc   :  { %v131_v10 = vpop.f32.mrb[1].mxu0  ;;  %v7032_v14 = vadd.f32 %v5814_v8, %v49_v9 }
  0xdd   :  { %v7024_v11 = vadd.f32 %v131_v10, %v48_v7 }
  0xde   :  { %v155_v21 = vsel %vm151_vm1, %v7032_v14, 0.0 }
  0xdf   :  { %v5817_v15 = vpop.f32.mrb[2].mxu0  ;;  %v152_v16 = vsel %vm151_vm1, %v7024_v11, 0.0 }
  0xe0   :  { %v141_v17 = vpop.f32.mrb[3].mxu0  ;;  %153 = vadd.xlane.f32.xlu0 %v152_v16  ;;  %v7036_v18 = vadd.f32 %v5817_v15, %v51_v12 }
  0xe1   :  { %v7038_v19 = vadd.f32 %v141_v17, %v50_v13 }
  0xe2   :  { %v161_v22 = vsel %vm151_vm1, %v7036_v18, 0.0 }
  0xe3   :  { %v158_v20 = vsel %vm151_vm1, %v7038_v19, 0.0 }
  0xe4   :  { %159 = vadd.xlane.f32.xlu1 %v158_v20  ;;  %156 = vadd.xlane.f32.xlu0 %v155_v21 }
  0xe8   :  { %162 = vadd.xlane.f32.xlu1 %v161_v22 }
 0x16d   :  { %v154_v23 = vpop.xlane.xlu0 %153 }
 0x16e   :  { %v165_v24 = vmul.f32 0.03125, %v154_v23 }
 0x170   :  { %v169_v25 = vsub.f32 %v7024_v11, %v165_v24  ;;  %v5376_v24 = vld [vmem:[%s7930_s4] ss:$0 sm:$0xff] }
 0x171   :  { %v160_v26 = vpop.xlane.xlu1 %159  ;;  %v157_v27 = vpop.xlane.xlu0 %156 }
 0x172   :  { %v167_v28 = vmul.f32 0.03125, %v160_v26  ;;  %v166_v29 = vmul.f32 0.03125, %v157_v27  ;;  %v173_v30 = vmul.f32 %v169_v25, %v169_v25 }
 0x174   :  { %v171_v31 = vsub.f32 %v7038_v19, %v167_v28  ;;  %v170_v32 = vsub.f32 %v7032_v14, %v166_v29  ;;  %v177_v33 = vsel %vm151_vm1, %v173_v30, 0.0 }
 0x175   :  { %v163_v34 = vpop.xlane.xlu1 %162  ;;  %178 = vadd.xlane.f32.xlu0 %v177_v33 }
 0x176   :  { %v168_v35 = vmul.f32 0.03125, %v163_v34  ;;  %v175_v36 = vmul.f32 %v171_v31, %v171_v31  ;;  %v174_v37 = vmul.f32 %v170_v32, %v170_v32 }
 0x178   :  { %v172_v38 = vsub.f32 %v7036_v18, %v168_v35  ;;  %v183_v39 = vsel %vm151_vm1, %v175_v36, 0.0  ;;  %v180_v40 = vsel %vm151_vm1, %v174_v37, 0.0 }
 0x179   :  { %184 = vadd.xlane.f32.xlu0 %v183_v39  ;;  %181 = vadd.xlane.f32.xlu1 %v180_v40 }
 0x17a   :  { %v176_v41 = vmul.f32 %v172_v38, %v172_v38 }
 0x17c   :  { %v186_v42 = vsel %vm151_vm1, %v176_v41, 0.0 }
 0x17d   :  { %187 = vadd.xlane.f32.xlu1 %v186_v42 }
 0x202   :  { %v179_v49 = vpop.xlane.xlu0 %178 }
 0x203   :  { %v189_v50 = vmul.f32 0.03125, %v179_v49 }
 0x205   :  { %v193_v52 = vadd.f32 1e-05, %v189_v50 }
 0x206   :  { %v182_v53 = vpop.xlane.xlu1 %181  ;;  %v185_v54 = vpop.xlane.xlu0 %184 }
 0x207   :  { %6714 = vrsqrt.f32 %v193_v52  ;;  %v190_v55 = vmul.f32 0.03125, %v182_v53  ;;  %v191_v56 = vmul.f32 0.03125, %v185_v54 }
 0x209   :  { %v194_v58 = vadd.f32 1e-05, %v190_v55  ;;  %v195_v59 = vadd.f32 1e-05, %v191_v56 }
 0x20a   :  { %v188_v60 = vpop.xlane.xlu1 %187 }
 0x20b   :  { %6716 = vrsqrt.f32 %v194_v58  ;;  %v192_v61 = vmul.f32 0.03125, %v188_v60 }
 0x20c   :  { %6718 = vrsqrt.f32 %v195_v59 }
 0x20d   :  { %v196_v0 = vadd.f32 1e-05, %v192_v61 }
 0x20f   :  { %6720 = vrsqrt.f32 %v196_v0 }
 0x211   :  { %v6715_v3 = vpop.eup %6714 }
 0x212   :  { %v201_v4 = vmul.f32 %v6715_v3, %v169_v25 }
 0x214   :  { %v209_v6 = vmul.f32 %v208_v2, %v201_v4 }
 0x215   :  { %v6717_v7 = vpop.eup %6716 }
 0x216   :  { %v6719_v8 = vpop.eup %6718  ;;  %v202_v9 = vmul.f32 %v6717_v7, %v170_v32  ;;  %v217_v10 = vadd.f32 %v216_v5, %v209_v6 }
 0x217   :  { %v203_v12 = vmul.f32 %v6719_v8, %v171_v31 }
 0x218   :  { %v210_v13 = vmul.f32 %v208_v2, %v202_v9  ;;  %5826 = vmatprep.mubr.msk.f32.mxu0 %vm151_vm1, %v217_v10 }
 0x219   :  { %v6721_v15 = vpop.eup %6720  ;;  %v211_v16 = vmul.f32 %v208_v2, %v203_v12 }
 0x21a   :  { %v218_v17 = vadd.f32 %v216_v5, %v210_v13  ;;  %v204_v20 = vmul.f32 %v6721_v15, %v172_v38 }
 0x21b   :  { %v219_v21 = vadd.f32 %v216_v5, %v211_v16 }
 0x21c   :  { %5827 = vmatmul.mubr.msk.f32.vlgmr.msra.gmra.mrb[4].mxu0 %vm151_vm1, %v218_v17  ;;  %v212_v22 = vmul.f32 %v208_v2, %v204_v20 }
 0x21d   :  { %5829 = vmatprep.mubr.msk.f32.mxu0 %vm151_vm1, %v219_v21 }
 0x21e   :  { %v220_v23 = vadd.f32 %v216_v5, %v212_v22 }
 0x220   :  { %5830 = vmatmul.mubr.msk.f32.gmra.mrb[6].mxu0 %vm151_vm1, %v220_v23 }
 0x2ef   :  { %v5828_v25 = vpop.f32.mrb[4].mxu0 }
 0x2f0   :  { %v7088_v26 = vadd.f32 %v5828_v25, %v5376_v24  ;;  %v310_v27 = vpop.f32.mrb[5].mxu0 }
 0x2f1   :  { %v7090_v28 = vadd.f32 %v5376_v24, %v310_v27 }
 0x2f3   :  { %v5831_v29 = vpop.f32.mrb[6].mxu0  ;;  %5836 = vmatprep.mubr.msk.f32.mxu0 %vm339_vm2, %v7090_v28  ;;  %v7096_v30 = vpack.i.bf16 %v7088_v26, %v7090_v28 }
 0x2f4   :  { %v7098_v31 = vadd.f32 %v5831_v29, %v5376_v24  ;;  %v320_v32 = vpop.f32.mrb[7].mxu0 }
 0x2f5   :  { %v7100_v33 = vadd.f32 %v5376_v24, %v320_v32  ;;  %6555 = vrot.lane.b32.xlu0 %v7096_v30, %s6916_s13 }
 0x2f7   :  { %5843 = vmatprep.mubr.msk.f32.mxu1 %vm339_vm2, %v7100_v33  ;;  %v7108_v34 = vpack.i.bf16 %v7098_v31, %v7100_v33 }
 0x2f9   :  { %6560 = vrot.lane.b32.xlu1 %v7108_v34, %s6916_s13 }
 0x367   :  { %v6556_v35 = vpop.permute.xlu0 %6555 }
 0x368   :  { %v6558_v36 = vunpack.i.h.bf16 %v6556_v35  ;;  %v6557_v37 = vunpack.i.l.bf16 %v6556_v35 }
 0x36a   :  { %v6261_v39 = vpack.c.bf16 %v6558_v36, %v6557_v37 }
 0x36b   :  { %v6561_v40 = vpop.permute.xlu1 %6560 }
 0x36c   :  { %6263 = vmatprep.subr.msk.bf16.mxu0 %vm7114_vm3, %v6261_v39  ;;  %v6563_v41 = vunpack.i.h.bf16 %v6561_v40  ;;  %v6562_v42 = vunpack.i.l.bf16 %v6561_v40 }
 0x36d   :  { %6266 = vmatpush3.bf16.xpose.msk.msra.mxu0 %vm7114_vm3, %v6261_v39 }
 0x36e   :  { %v6267_v43 = vpack.c.bf16 %v6563_v41, %v6562_v42 }
 0x370   :  { %6269 = vmatprep.subr.msk.bf16.mxu1 %vm7114_vm3, %v6267_v43 }
 0x371   :  { %6272 = vmatpush3.bf16.xpose.msk.msra.mxu1 %vm7114_vm3, %v6267_v43 }
 0x374   :  { %5837 = vmatmul.mubr.msk.f32.vlgmr.msra.gmra.mrb[8].mxu0 %vm339_vm2, %v7088_v26 }
 0x378   :  { %5844 = vmatmul.mubr.msk.f32.vlgmr.msra.gmra.mrb[0].mxu1 %vm339_vm2, %v7098_v31 }
 0x447   :  { %v5838_v44 = vpop.f32.mrb[8].mxu0 }
 0x448   :  { %v414_v45 = vpop.f32.mrb[9].mxu0  ;;  %v515_v46 = vsel %vm52_vm0, %v5838_v44, -inf }
 0x449   :  { %516 = vmax.xlane.f32.xlu0 %v515_v46  ;;  %v512_v47 = vsel %vm52_vm0, %v414_v45, -inf }
 0x44a   :  { %513 = vmax.xlane.f32.xlu1 %v512_v47 }
 0x44b   :  { %v5845_v48 = vpop.f32.mrb[0].mxu1 }
 0x44c   :  { %v503_v49 = vpop.f32.mrb[1].mxu1  ;;  %v521_v50 = vsel %vm52_vm0, %v5845_v48, -inf }
 0x44d   :  { %v518_v51 = vsel %vm52_vm0, %v503_v49, -inf }
 0x44e   :  { %519 = vmax.xlane.f32.xlu0 %v518_v51  ;;  %522 = vmax.xlane.f32.xlu1 %v521_v50 }
 0x45f   :  { %6570 = vrot.lane.b32.xlu1 %v7108_v34, %s6917_s14 }
 0x463   :  { %6575 = vrot.lane.b32.xlu1 %v7096_v30, %s6918_s15 }
 0x464   :  { %6565 = vrot.lane.b32.xlu0 %v7096_v30, %s6917_s14 }
 0x467   :  { %730 = vrot.lane.b32.xlu1 %v7090_v28, %s6919_s16 }
 0x4d6   :  { %v517_v52 = vpop.xlane.xlu0 %516 }
 0x4d7   :  { %v525_v53 = vsub.f32 %v5838_v44, %v517_v52  ;;  %v514_v54 = vpop.xlane.xlu1 %513 }
 0x4d8   :  { %v524_v55 = vsub.f32 %v414_v45, %v514_v54 }
 0x4d9   :  { %v530_v56 = vmul.f32 1.442695, %v525_v53 }
 0x4da   :  { %v528_v58 = vmul.f32 1.442695, %v524_v55 }
 0x4db   :  { %6722 = vpow2.f32 %v530_v56  ;;  %v520_v59 = vpop.xlane.xlu0 %519  ;;  %v523_v60 = vpop.xlane.xlu1 %522 }
 0x4dc   :  { %6724 = vpow2.f32 %v528_v58  ;;  %v526_v61 = vsub.f32 %v503_v49, %v520_v59  ;;  %v527_v0 = vsub.f32 %v5845_v48, %v523_v60 }
 0x4de   :  { %v532_v2 = vmul.f32 1.442695, %v526_v61  ;;  %v534_v3 = vmul.f32 1.442695, %v527_v0 }
 0x4df   :  { %v6566_v4 = vpop.permute.xlu0 %6565  ;;  %v6571_v5 = vpop.permute.xlu1 %6570 }
 0x4e0   :  { %6726 = vpow2.f32 %v532_v2  ;;  %v6568_v6 = vunpack.i.h.bf16 %v6566_v4  ;;  %v6567_v7 = vunpack.i.l.bf16 %v6566_v4  ;;  %v6573_v8 = vunpack.i.h.bf16 %v6571_v5 }
 0x4e1   :  { %6728 = vpow2.f32 %v534_v3  ;;  %v6572_v9 = vunpack.i.l.bf16 %v6571_v5 }
 0x4e2   :  { %v6273_v10 = vpack.c.bf16 %v6568_v6, %v6567_v7 }
 0x4e3   :  { %v6576_v12 = vpop.permute.xlu1 %6575  ;;  %v6277_v16 = vpack.c.bf16 %v6573_v8, %v6572_v9 }
 0x4e4   :  { %v6578_v13 = vunpack.i.h.bf16 %v6576_v12  ;;  %v6577_v15 = vunpack.i.l.bf16 %v6576_v12  ;;  %6274 = vmatprep.subr.bf16.mxu0 %v6273_v10 }
 0x4e5   :  { %v6723_v17 = vpop.eup %6722  ;;  %6276 = vmatpush3.bf16.msra.mxu0 %v6273_v10 }
 0x4e6   :  { %v6725_v20 = vpop.eup %6724  ;;  %v6281_v21 = vpack.c.bf16 %v6578_v13, %v6577_v15  ;;  %6278 = vmatprep.subr.bf16.mxu0 %v6277_v16  ;;  %v539_v22 = vsel %vm52_vm0, %v6723_v17, 0.0 }
 0x4e7   :  { %540 = vadd.xlane.f32.xlu1 %v539_v22  ;;  %v731_v23 = vpop.permute.xlu1 %730  ;;  %v536_v24 = vsel %vm52_vm0, %v6725_v20, 0.0 }
 0x4e8   :  { %537 = vadd.xlane.f32.xlu0 %v536_v24  ;;  %6283 = vmatprep.subr.msk.bf16.mxu1 %vm7114_vm3, %v6281_v21 }
 0x4e9   :  { %5864 = vmatprep.mubr.msk.f32.mxu1 %vm339_vm2, %v731_v23  ;;  %6286 = vmatpush3.bf16.xpose.msk.msra.mxu1 %vm7114_vm3, %v6281_v21 }
 0x4ea   :  { %v6727_v25 = vpop.eup %6726 }
 0x4eb   :  { %v6729_v27 = vpop.eup %6728  ;;  %v542_v29 = vsel %vm52_vm0, %v6727_v25, 0.0 }
 0x4ec   :  { %543 = vadd.xlane.f32.xlu0 %v542_v29  ;;  %v545_v32 = vsel %vm52_vm0, %v6729_v27, 0.0 }
 0x4ed   :  { %546 = vadd.xlane.f32.xlu1 %v545_v32 }
 0x4fe   :  { %732 = vrot.lane.b32.xlu1 %v7088_v26, %s6919_s16 }
 0x502   :  { %823 = vrot.lane.b32.xlu1 %v7098_v31, %s6919_s16  ;;  %6580 = vrot.lane.b32.xlu0 %v7108_v34, %s6918_s15 }
 0x506   :  { %821 = vrot.lane.b32.xlu0 %v7100_v33, %s6919_s16 }
 0x574   :  { %v541_v35 = vpop.xlane.xlu1 %540 }
 0x575   :  { %6730 = vrcp.f32 %v541_v35  ;;  %v538_v36 = vpop.xlane.xlu0 %537 }
 0x576   :  { %6732 = vrcp.f32 %v538_v36 }
 0x579   :  { %v544_v37 = vpop.xlane.xlu0 %543 }
 0x57a   :  { %6734 = vrcp.f32 %v544_v37  ;;  %v547_v39 = vpop.xlane.xlu1 %546 }
 0x57b   :  { %6736 = vrcp.f32 %v547_v39 }
 0x57d   :  { %v6581_v40 = vpop.permute.xlu0 %6580 }
 0x57e   :  { %v733_v41 = vpop.permute.xlu1 %732  ;;  %v6583_v44 = vunpack.i.h.bf16 %v6581_v40  ;;  %v6582_v45 = vunpack.i.l.bf16 %v6581_v40 }
 0x57f   :  { %v6731_v42 = vpop.eup %6730  ;;  %5865 = vmatmul.mubr.msk.f32.vlgmr.msra.gmra.mrb[2].mxu1 %vm339_vm2, %v733_v41 }
 0x580   :  { %v6733_v43 = vpop.eup %6732  ;;  %v553_v47 = vmul.f32 %v6731_v42, %v6723_v17  ;;  %v6287_v49 = vpack.c.bf16 %v6583_v44, %v6582_v45 }
 0x581   :  { %v552_v46 = vmul.f32 %v6733_v43, %v6725_v20  ;;  %v822_v53 = vpop.permute.xlu0 %821 }
 0x582   :  { %v824_v54 = vpop.permute.xlu1 %823 }
 0x583   :  { %5850 = vmatprep.mubr.msk.f32.mxu0 %vm52_vm0, %v552_v46 }
 0x584   :  { %v6735_v48 = vpop.eup %6734  ;;  %5851 = vmatmul.mubr.msk.f32.vlgmr.msra.gmra.mrb[10].mxu0 %vm52_vm0, %v553_v47 }
 0x585   :  { %v6737_v50 = vpop.eup %6736  ;;  %6280 = vmatpush3.bf16.msra.mxu0 %v6277_v16  ;;  %v554_v51 = vmul.f32 %v6735_v48, %v6727_v25 }
 0x586   :  { %6289 = vmatprep.subr.msk.bf16.mxu0 %vm7114_vm3, %v6287_v49  ;;  %v555_v52 = vmul.f32 %v6737_v50, %v6729_v27 }
 0x587   :  { %5857 = vmatprep.mubr.msk.f32.mxu0 %vm52_vm0, %v554_v51 }
 0x588   :  { %5858 = vmatmul.mubr.msk.f32.vlgmr.msra.gmra.mrb[12].mxu0 %vm52_vm0, %v555_v52 }
 0x589   :  { %5871 = vmatprep.mubr.msk.f32.mxu0 %vm339_vm2, %v822_v53 }
 0x58e   :  { %6292 = vmatpush3.bf16.xpose.msk.msra.mxu0 %vm7114_vm3, %v6287_v49 }
 0x595   :  { %5872 = vmatmul.mubr.msk.f32.vlgmr.msra.gmra.mrb[14].mxu0 %vm339_vm2, %v824_v54 }
 0x652   :  { %v5866_v55 = vpop.f32.mrb[2].mxu1 }
 0x653   :  { %v812_v56 = vpop.f32.mrb[3].mxu1  ;;  %v915_v58 = vsel %vm52_vm0, %v5866_v55, -inf }
 0x654   :  { %916 = vmax.xlane.f32.xlu1 %v915_v58  ;;  %v912_v59 = vsel %vm52_vm0, %v812_v56, -inf }
 0x655   :  { %913 = vmax.xlane.f32.xlu0 %v912_v59 }
 0x657   :  { %v7172_v60 = vpop.f32.mrb[10].mxu0 }
 0x658   :  { %v7174_v61 = vpop.f32.mrb[11].mxu0 }
 0x65b   :  { %v7176_v0 = vpop.f32.mrb[12].mxu0 }
 0x65c   :  { %v7178_v2 = vpop.f32.mrb[13].mxu0 }
 0x668   :  { %v5873_v3 = vpop.f32.mrb[14].mxu0 }
 0x669   :  { %v903_v4 = vpop.f32.mrb[15].mxu0  ;;  %v921_v6 = vsel %vm52_vm0, %v5873_v3, -inf }
 0x66a   :  { %v918_v5 = vsel %vm52_vm0, %v903_v4, -inf }
 0x66b   :  { %919 = vmax.xlane.f32.xlu0 %v918_v5 }
 0x66f   :  { %922 = vmax.xlane.f32.xlu0 %v921_v6 }
 0x6e1   :  { %v917_v7 = vpop.xlane.xlu1 %916 }
 0x6e2   :  { %v925_v8 = vsub.f32 %v5866_v55, %v917_v7  ;;  %v914_v9 = vpop.xlane.xlu0 %913 }
 0x6e3   :  { %v924_v10 = vsub.f32 %v812_v56, %v914_v9 }
 0x6e4   :  { %v930_v12 = vmul.f32 1.442695, %v925_v8 }
 0x6e5   :  { %v928_v13 = vmul.f32 1.442695, %v924_v10 }
 0x6e6   :  { %6738 = vpow2.f32 %v930_v12 }
 0x6e7   :  { %6740 = vpow2.f32 %v928_v13 }
 0x6f0   :  { %v6739_v15 = vpop.eup %6738 }
 0x6f1   :  { %v6741_v16 = vpop.eup %6740  ;;  %v939_v17 = vsel %vm52_vm0, %v6739_v15, 0.0 }
 0x6f2   :  { %940 = vadd.xlane.f32.xlu1 %v939_v17  ;;  %v936_v20 = vsel %vm52_vm0, %v6741_v16, 0.0  ;;  %v329_v17 = vld [vmem:[%s7931_s5] sm:$0xff] }
 0x6f3   :  { %937 = vadd.xlane.f32.xlu0 %v936_v20 }
 0x6f8   :  { %v920_v21 = vpop.xlane.xlu0 %919 }
 0x6f9   :  { %v926_v22 = vsub.f32 %v903_v4, %v920_v21 }
 0x6fb   :  { %v932_v23 = vmul.f32 1.442695, %v926_v22 }
 0x6fc   :  { %v923_v24 = vpop.xlane.xlu0 %922 }
 0x6fd   :  { %6742 = vpow2.f32 %v932_v23  ;;  %v927_v25 = vsub.f32 %v5873_v3, %v923_v24 }
 0x6ff   :  { %v934_v27 = vmul.f32 1.442695, %v927_v25 }
 0x701   :  { %6744 = vpow2.f32 %v934_v27 }
 0x707   :  { %v6743_v29 = vpop.eup %6742 }
 0x708   :  { %v942_v32 = vsel %vm52_vm0, %v6743_v29, 0.0 }
 0x709   :  { %943 = vadd.xlane.f32.xlu0 %v942_v32 }
 0x70b   :  { %v6745_v35 = vpop.eup %6744 }
 0x70c   :  { %v945_v36 = vsel %vm52_vm0, %v6745_v35, 0.0 }
 0x70d   :  { %946 = vadd.xlane.f32.xlu1 %v945_v36 }
 0x71e   :  { %6590 = vrot.lane.b32.xlu1 %v7108_v34, %s6920_s17 }
 0x71f   :  { %6585 = vrot.lane.b32.xlu0 %v7096_v30, %s6920_s17 }
 0x722   :  { %6595 = vrot.lane.b32.xlu1 %v7096_v30, %s6921_s18 }
 0x723   :  { %1324 = vrot.lane.b32.xlu0 %v7090_v28, %s6922_s19 }
 0x726   :  { %6600 = vrot.lane.b32.xlu1 %v7108_v34, %s6921_s18 }
 0x727   :  { %1415 = vrot.lane.b32.xlu0 %v7100_v33, %s6922_s19 }
 0x72a   :  { %1326 = vrot.lane.b32.xlu1 %v7088_v26, %s6922_s19 }
 0x72e   :  { %1417 = vrot.lane.b32.xlu1 %v7098_v31, %s6922_s19 }
 0x77f   :  { %v941_v41 = vpop.xlane.xlu1 %940 }
 0x780   :  { %v938_v37 = vpop.xlane.xlu0 %937 }
 0x781   :  { %6746 = vrcp.f32 %v938_v37 }
 0x782   :  { %6748 = vrcp.f32 %v941_v41 }
 0x78b   :  { %v6747_v39 = vpop.eup %6746 }
 0x78c   :  { %v952_v40 = vmul.f32 %v6747_v39, %v6741_v16  ;;  %v6749_v48 = vpop.eup %6748  ;;  %v330_v16 = vld [vmem:[%s7931_s5 + $0x8] sm:$0xff] }
 0x78d   :  { %v953_v53 = vmul.f32 %v6749_v48, %v6739_v15  ;;  %5888 = vmatprep.subr.mxu1 %v330_v16 }
 0x78e   :  { %5878 = vmatprep.mubr.msk.f32.mxu0 %vm52_vm0, %v952_v40  ;;  %5889 = vmatpush3.msra.mxu1 %v330_v16 }
 0x78f   :  { %5896 = vmatprep.subr.mxu1 %v329_v17 }
 0x796   :  { %v944_v42 = vpop.xlane.xlu0 %943 }
 0x797   :  { %6750 = vrcp.f32 %v944_v42 }
 0x79a   :  { %v947_v43 = vpop.xlane.xlu1 %946  ;;  %v6586_v44 = vpop.permute.xlu0 %6585 }
 0x79b   :  { %6752 = vrcp.f32 %v947_v43  ;;  %v6588_v45 = vunpack.i.h.bf16 %v6586_v44  ;;  %v6587_v46 = vunpack.i.l.bf16 %v6586_v44 }
 0x79d   :  { %v6293_v47 = vpack.c.bf16 %v6588_v45, %v6587_v46 }
 0x79e   :  { %v6591_v49 = vpop.permute.xlu1 %6590  ;;  %v1325_v7 = vpop.permute.xlu0 %1324 }
 0x79f   :  { %v6593_v50 = vunpack.i.h.bf16 %v6591_v49  ;;  %v6592_v51 = vunpack.i.l.bf16 %v6591_v49  ;;  %6294 = vmatprep.subr.bf16.mxu0 %v6293_v47 }
 0x7a0   :  { %6296 = vmatpush3.bf16.msra.mxu0 %v6293_v47 }
 0x7a1   :  { %v6751_v52 = vpop.eup %6750  ;;  %v6297_v54 = vpack.c.bf16 %v6593_v50, %v6592_v51 }
 0x7a2   :  { %v6596_v55 = vpop.permute.xlu1 %6595  ;;  %v954_v56 = vmul.f32 %v6751_v52, %v6743_v29  ;;  %v1416_v13 = vpop.permute.xlu0 %1415 }
 0x7a3   :  { %v6598_v58 = vunpack.i.h.bf16 %v6596_v55  ;;  %v6597_v59 = vunpack.i.l.bf16 %v6596_v55  ;;  %5879 = vmatmul.mubr.msk.f32.vlgmr.msra.gmra.mrb[16].mxu0 %vm52_vm0, %v953_v53  ;;  %6298 = vmatprep.subr.bf16.mxu0 %v6297_v54 }
 0x7a4   :  { %6300 = vmatpush3.bf16.msra.mxu0 %v6297_v54  ;;  %5885 = vmatprep.mubr.msk.f32.mxu0 %vm52_vm0, %v954_v56 }
 0x7a5   :  { %v6753_v3 = vpop.eup %6752  ;;  %v6301_v4 = vpack.c.bf16 %v6598_v58, %v6597_v59 }
 0x7a6   :  { %v6601_v5 = vpop.permute.xlu1 %6600  ;;  %v955_v6 = vmul.f32 %v6753_v3, %v6745_v35 }
 0x7a7   :  { %6303 = vmatprep.subr.msk.bf16.mxu0 %vm7114_vm3, %v6301_v4  ;;  %v6603_v8 = vunpack.i.h.bf16 %v6601_v5  ;;  %v6602_v9 = vunpack.i.l.bf16 %v6601_v5 }
 0x7a8   :  { %5886 = vmatmul.mubr.msk.f32.vlgmr.msra.gmra.mrb[18].mxu0 %vm52_vm0, %v955_v6 }
 0x7a9   :  { %5908 = vmatprep.mubr.msk.f32.mxu0 %vm339_vm2, %v1325_v7  ;;  %v6307_v10 = vpack.c.bf16 %v6603_v8, %v6602_v9 }
 0x7aa   :  { %v1327_v12 = vpop.permute.xlu1 %1326 }
 0x7ad   :  { %6306 = vmatpush3.bf16.xpose.msk.msra.mxu0 %vm7114_vm3, %v6301_v4 }
 0x7ae   :  { %6309 = vmatprep.subr.msk.bf16.mxu0 %vm7114_vm3, %v6307_v10  ;;  %v1418_v15 = vpop.permute.xlu1 %1417 }
 0x7b4   :  { %5909 = vmatmul.mubr.msk.f32.vlgmr.msra.gmra.mrb[20].mxu0 %vm339_vm2, %v1327_v12 }
 0x7b5   :  { %6312 = vmatpush3.bf16.xpose.msk.msra.mxu0 %vm7114_vm3, %v6307_v10  ;;  %5915 = vmatprep.mubr.msk.f32.mxu0 %vm339_vm2, %v1416_v13 }
 0x7bc   :  { %5916 = vmatmul.mubr.msk.f32.vlgmr.msra.gmra.mrb[22].mxu0 %vm339_vm2, %v1418_v15 }
 0x876   :  { %v5880_v20 = vpop.f32.mrb[16].mxu0 }
 0x877   :  { %v1034_v21 = vpop.f32.mrb[17].mxu0 }
 0x878   :  { %5890 = vmatprep.mubr.msk.f32.mxu1 %vm339_vm2, %v1034_v21 }
 0x879   :  { %5891 = vmatmul.mubr.msk.f32.vlgmr.msra.gmra.mrb[4].mxu1 %vm339_vm2, %v5880_v20 }
 0x87a   :  { %5897 = vmatpush3.msra.mxu1 %v329_v17 }
 0x87b   :  { %v5887_v22 = vpop.f32.mrb[18].mxu0 }
 0x87c   :  { %v1121_v23 = vpop.f32.mrb[19].mxu0 }
 0x87d   :  { %5893 = vmatprep.mubr.msk.f32.mxu1 %vm339_vm2, %v1121_v23 }
 0x87e   :  { %5894 = vmatmul.mubr.msk.f32.gmra.mrb[6].mxu1 %vm339_vm2, %v5887_v22 }
 0x87f   :  { %5898 = vmatprep.mubr.msk.f32.mxu1 %vm339_vm2, %v7174_v61 }
 0x882   :  { %5899 = vmatmul.mubr.msk.f32.vlgmr.msra.gmra.mrb[4].mxu1 %vm339_vm2, %v7172_v60 }
 0x883   :  { %5901 = vmatprep.mubr.msk.f32.mxu1 %vm339_vm2, %v7178_v2 }
 0x886   :  { %5902 = vmatmul.mubr.msk.f32.gmra.mrb[6].mxu1 %vm339_vm2, %v7176_v0 }
 0x887   :  { %v5910_v24 = vpop.f32.mrb[20].mxu0 }
 0x888   :  { %v1406_v25 = vpop.f32.mrb[21].mxu0  ;;  %v1509_v27 = vsel %vm52_vm0, %v5910_v24, -inf }
 0x889   :  { %1510 = vmax.xlane.f32.xlu1 %v1509_v27  ;;  %v1506_v29 = vsel %vm52_vm0, %v1406_v25, -inf }
 0x88a   :  { %1507 = vmax.xlane.f32.xlu0 %v1506_v29 }
 0x88f   :  { %v5917_v32 = vpop.f32.mrb[22].mxu0 }
 0x890   :  { %v1497_v35 = vpop.f32.mrb[23].mxu0  ;;  %v1515_v60 = vsel %vm52_vm0, %v5917_v32, -inf }
 0x891   :  { %v1512_v61 = vsel %vm52_vm0, %v1497_v35, -inf }
 0x892   :  { %1513 = vmax.xlane.f32.xlu0 %v1512_v61 }
 0x896   :  { %1516 = vmax.xlane.f32.xlu0 %v1515_v60 }
 0x916   :  { %v1511_v2 = vpop.xlane.xlu1 %1510 }
 0x917   :  { %v1519_v36 = vsub.f32 %v5910_v24, %v1511_v2  ;;  %v1508_v37 = vpop.xlane.xlu0 %1507 }
 0x918   :  { %v1518_v0 = vsub.f32 %v1406_v25, %v1508_v37 }
 0x919   :  { %v1524_v39 = vmul.f32 1.442695, %v1519_v36 }
 0x91a   :  { %v1522_v40 = vmul.f32 1.442695, %v1518_v0 }
 0x91b   :  { %6754 = vpow2.f32 %v1524_v39 }
 0x91c   :  { %6756 = vpow2.f32 %v1522_v40 }
 0x91f   :  { %v1514_v41 = vpop.xlane.xlu0 %1513 }
 0x920   :  { %v1520_v42 = vsub.f32 %v1497_v35, %v1514_v41 }
 0x922   :  { %v1526_v43 = vmul.f32 1.442695, %v1520_v42 }
 0x923   :  { %v1517_v44 = vpop.xlane.xlu0 %1516 }
 0x924   :  { %6758 = vpow2.f32 %v1526_v43  ;;  %v1521_v45 = vsub.f32 %v5917_v32, %v1517_v44 }
 0x925   :  { %v6755_v46 = vpop.eup %6754 }
 0x926   :  { %v6757_v47 = vpop.eup %6756  ;;  %v1528_v48 = vmul.f32 1.442695, %v1521_v45  ;;  %v1533_v49 = vsel %vm52_vm0, %v6755_v46, 0.0 }
 0x927   :  { %1534 = vadd.xlane.f32.xlu1 %v1533_v49  ;;  %v1530_v50 = vsel %vm52_vm0, %v6757_v47, 0.0 }
 0x928   :  { %6760 = vpow2.f32 %v1528_v48  ;;  %1531 = vadd.xlane.f32.xlu0 %v1530_v50 }
 0x92e   :  { %v6759_v51 = vpop.eup %6758 }
 0x92f   :  { %v1536_v52 = vsel %vm52_vm0, %v6759_v51, 0.0 }
 0x930   :  { %1537 = vadd.xlane.f32.xlu0 %v1536_v52 }
 0x932   :  { %v6761_v53 = vpop.eup %6760 }
 0x933   :  { %v1539_v54 = vsel %vm52_vm0, %v6761_v53, 0.0 }
 0x934   :  { %1540 = vadd.xlane.f32.xlu1 %v1539_v54 }
 0x945   :  { %6610 = vrot.lane.b32.xlu1 %v7108_v34, %s6923_s22 }
 0x946   :  { %6605 = vrot.lane.b32.xlu0 %v7096_v30, %s6923_s22 }
 0x949   :  { %6615 = vrot.lane.b32.xlu1 %v7096_v30, %s6924_s23 }
 0x94a   :  { %6620 = vrot.lane.b32.xlu0 %v7108_v34, %s6924_s23 }
 0x94d   :  { %1825 = vrot.lane.b32.xlu1 %v7090_v28, %s6925_s24 }
 0x94e   :  { %1916 = vrot.lane.b32.xlu0 %v7100_v33, %s6925_s24 }
 0x951   :  { %1827 = vrot.lane.b32.xlu1 %v7088_v26, %s6925_s24 }
 0x955   :  { %1918 = vrot.lane.b32.xlu1 %v7098_v31, %s6925_s24  ;;  %v331_v31 = vld [vmem:[%s7931_s5 + $0x10] sm:$0xff] }
 0x9b4   :  { %v1535_v56 = vpop.xlane.xlu1 %1534 }
 0x9b5   :  { %v1532_v55 = vpop.xlane.xlu0 %1531 }
 0x9b6   :  { %6762 = vrcp.f32 %v1532_v55 }
 0x9b7   :  { %6764 = vrcp.f32 %v1535_v56 }
 0x9bd   :  { %v1538_v58 = vpop.xlane.xlu0 %1537 }
 0x9be   :  { %6766 = vrcp.f32 %v1538_v58 }
 0x9c0   :  { %v6763_v59 = vpop.eup %6762 }
 0x9c1   :  { %v1541_v3 = vpop.xlane.xlu1 %1540  ;;  %v6606_v4 = vpop.permute.xlu0 %6605  ;;  %v1546_v5 = vmul.f32 %v6763_v59, %v6757_v47 }
 0x9c2   :  { %6768 = vrcp.f32 %v1541_v3  ;;  %v6608_v28 = vunpack.i.h.bf16 %v6606_v4  ;;  %v6607_v6 = vunpack.i.l.bf16 %v6606_v4  ;;  %v6765_v26 = vpop.eup %6764 }
 0x9c3   :  { %5922 = vmatprep.mubr.msk.f32.mxu1 %vm52_vm0, %v1546_v5  ;;  %v1547_v16 = vmul.f32 %v6765_v26, %v6755_v46 }
 0x9c4   :  { %v6313_v33 = vpack.c.bf16 %v6608_v28, %v6607_v6 }
 0x9c5   :  { %v6611_v7 = vpop.permute.xlu1 %6610  ;;  %v6621_v8 = vpop.permute.xlu0 %6620 }
 0x9c6   :  { %v6613_v9 = vunpack.i.h.bf16 %v6611_v7  ;;  %v6612_v10 = vunpack.i.l.bf16 %v6611_v7  ;;  %6314 = vmatprep.subr.bf16.mxu1 %v6313_v33  ;;  %v6623_v12 = vunpack.i.h.bf16 %v6621_v8  ;;  %v6622_v13 = vunpack.i.l.bf16 %v6621_v8 }
 0x9c7   :  { %6316 = vmatpush3.bf16.msra.mxu1 %v6313_v33 }
 0x9c8   :  { %v6767_v15 = vpop.eup %6766  ;;  %v6317_v17 = vpack.c.bf16 %v6613_v9, %v6612_v10  ;;  %5932 = vmatprep.subr.mxu1 %v331_v31  ;;  %v6327_v24 = vpack.c.bf16 %v6623_v12, %v6622_v13 }
 0x9c9   :  { %v6616_v20 = vpop.permute.xlu1 %6615  ;;  %v1548_v21 = vmul.f32 %v6767_v15, %v6759_v51  ;;  %v1917_v37 = vpop.permute.xlu0 %1916 }
 0x9ca   :  { %v6618_v22 = vunpack.i.h.bf16 %v6616_v20  ;;  %v6617_v23 = vunpack.i.l.bf16 %v6616_v20  ;;  %5923 = vmatmul.mubr.msk.f32.vlgmr.msra.gmra.mrb[8].mxu1 %vm52_vm0, %v1547_v16  ;;  %6318 = vmatprep.subr.bf16.mxu0 %v6317_v17 }
 0x9cb   :  { %6320 = vmatpush3.bf16.msra.mxu0 %v6317_v17  ;;  %5929 = vmatprep.mubr.msk.f32.mxu0 %vm52_vm0, %v1548_v21 }
 0x9cc   :  { %v6769_v25 = vpop.eup %6768  ;;  %v6321_v27 = vpack.c.bf16 %v6618_v22, %v6617_v23  ;;  %5933 = vmatpush3.msra.mxu1 %v331_v31 }
 0x9cd   :  { %6329 = vmatprep.subr.msk.bf16.mxu1 %vm7114_vm3, %v6327_v24  ;;  %v1549_v29 = vmul.f32 %v6769_v25, %v6761_v53  ;;  %v1826_v32 = vpop.permute.xlu1 %1825 }
 0x9ce   :  { %6323 = vmatprep.subr.msk.bf16.mxu0 %vm7114_vm3, %v6321_v27 }
 0x9cf   :  { %5930 = vmatmul.mubr.msk.f32.vlgmr.msra.gmra.mrb[24].mxu0 %vm52_vm0, %v1549_v29 }
 0x9d0   :  { %5944 = vmatprep.mubr.msk.f32.mxu0 %vm339_vm2, %v1826_v32 }
 0x9d1   :  { %v1828_v35 = vpop.permute.xlu1 %1827 }
 0x9d4   :  { %6326 = vmatpush3.bf16.xpose.msk.msra.mxu0 %vm7114_vm3, %v6321_v27 }
 0x9d5   :  { %v1919_v0 = vpop.permute.xlu1 %1918 }
 0x9db   :  { %5945 = vmatmul.mubr.msk.f32.vlgmr.msra.gmra.mrb[26].mxu0 %vm339_vm2, %v1828_v35  ;;  %v332_v35 = vld [vmem:[%s7931_s5 + $0x18] sm:$0xff] }
 0xa9d   :  { %v5924_v61 = vpop.f32.mrb[8].mxu1 }
 0xa9e   :  { %v1628_v60 = vpop.f32.mrb[9].mxu1 }
 0xa9f   :  { %5934 = vmatprep.mubr.msk.f32.mxu1 %vm339_vm2, %v1628_v60 }
 0xaa0   :  { %5935 = vmatmul.mubr.msk.f32.vlgmr.msra.gmra.mrb[4].mxu1 %vm339_vm2, %v5924_v61 }
 0xaa1   :  { %6332 = vmatpush3.bf16.xpose.msk.msra.mxu1 %vm7114_vm3, %v6327_v24 }
 0xaa2   :  { %v5931_v2 = vpop.f32.mrb[24].mxu0 }
 0xaa3   :  { %v1715_v36 = vpop.f32.mrb[25].mxu0 }
 0xaa4   :  { %5937 = vmatprep.mubr.msk.f32.mxu1 %vm339_vm2, %v1715_v36 }
 0xaa5   :  { %5938 = vmatmul.mubr.msk.f32.gmra.mrb[6].mxu1 %vm339_vm2, %v5931_v2 }
 0xaa6   :  { %5951 = vmatprep.mubr.msk.f32.mxu1 %vm339_vm2, %v1917_v37  ;;  %v2332_v37 = vsub.s32 2, %v7066_v57 }
 0xaa9   :  { %5952 = vmatmul.mubr.msk.f32.vlgmr.msra.gmra.mrb[10].mxu1 %vm339_vm2, %v1919_v0  ;;  %v2333_v0 = vrot.slane %v7072_v63, %v2332_v37 }
 0xaae   :  { %v5946_v39 = vpop.f32.mrb[26].mxu0 }
 0xaaf   :  { %v1907_v40 = vpop.f32.mrb[27].mxu0  ;;  %v2010_v41 = vsel %vm52_vm0, %v5946_v39, -inf }
 0xab0   :  { %2011 = vmax.xlane.f32.xlu1 %v2010_v41  ;;  %v2007_v42 = vsel %vm52_vm0, %v1907_v40, -inf }
 0xab1   :  { %2008 = vmax.xlane.f32.xlu0 %v2007_v42 }
 0xb3d   :  { %v2012_v43 = vpop.xlane.xlu1 %2011 }
 0xb3e   :  { %v2020_v44 = vsub.f32 %v5946_v39, %v2012_v43  ;;  %v2009_v48 = vpop.xlane.xlu0 %2008 }
 0xb3f   :  { %v2019_v49 = vsub.f32 %v1907_v40, %v2009_v48 }
 0xb40   :  { %v2025_v45 = vmul.f32 1.442695, %v2020_v44 }
 0xb41   :  { %v2023_v50 = vmul.f32 1.442695, %v2019_v49 }
 0xb42   :  { %6770 = vpow2.f32 %v2025_v45 }
 0xb43   :  { %6772 = vpow2.f32 %v2023_v50 }
 0xb4c   :  { %v6771_v46 = vpop.eup %6770 }
 0xb4d   :  { %v2034_v47 = vsel %vm52_vm0, %v6771_v46, 0.0  ;;  %v6773_v55 = vpop.eup %6772 }
 0xb4e   :  { %2035 = vadd.xlane.f32.xlu1 %v2034_v47  ;;  %v2031_v56 = vsel %vm52_vm0, %v6773_v55, 0.0 }
 0xb7c   :  { %v5953_v51 = vpop.f32.mrb[10].mxu1 }
 0xb7d   :  { %v1998_v52 = vpop.f32.mrb[11].mxu1  ;;  %v2016_v54 = vsel %vm52_vm0, %v5953_v51, -inf }
 0xb7e   :  { %v2013_v53 = vsel %vm52_vm0, %v1998_v52, -inf }
 0xb7f   :  { %2014 = vmax.xlane.f32.xlu0 %v2013_v53 }
 0xb83   :  { %2017 = vmax.xlane.f32.xlu0 %v2016_v54 }
 0xb87   :  { %2032 = vadd.xlane.f32.xlu0 %v2031_v56 }
 0xbdb   :  { %v2036_v10 = vpop.xlane.xlu1 %2035 }
 0xc0c   :  { %v2015_v58 = vpop.xlane.xlu0 %2014 }
 0xc0d   :  { %v2021_v59 = vsub.f32 %v1998_v52, %v2015_v58 }
 0xc0f   :  { %v2027_v3 = vmul.f32 1.442695, %v2021_v59 }
 0xc10   :  { %v2018_v4 = vpop.xlane.xlu0 %2017 }
 0xc11   :  { %6774 = vpow2.f32 %v2027_v3  ;;  %v2022_v5 = vsub.f32 %v5953_v51, %v2018_v4 }
 0xc13   :  { %v2029_v28 = vmul.f32 1.442695, %v2022_v5 }
 0xc14   :  { %v2033_v6 = vpop.xlane.xlu0 %2032 }
 0xc15   :  { %6776 = vpow2.f32 %v2029_v28 }
 0xc16   :  { %6778 = vrcp.f32 %v2033_v6 }
 0xc17   :  { %6780 = vrcp.f32 %v2036_v10 }
 0xc1b   :  { %v6775_v33 = vpop.eup %6774 }
 0xc1c   :  { %v2037_v26 = vsel %vm52_vm0, %v6775_v33, 0.0 }
 0xc1d   :  { %2038 = vadd.xlane.f32.xlu0 %v2037_v26 }
 0xc1f   :  { %v6777_v7 = vpop.eup %6776 }
 0xc20   :  { %v6779_v8 = vpop.eup %6778  ;;  %v2040_v31 = vsel %vm52_vm0, %v6777_v7, 0.0 }
 0xc21   :  { %2041 = vadd.xlane.f32.xlu1 %v2040_v31  ;;  %v2047_v9 = vmul.f32 %v6779_v8, %v6773_v55  ;;  %v6781_v21 = vpop.eup %6780 }
 0xc22   :  { %v2048_v25 = vmul.f32 %v6781_v21, %v6771_v46  ;;  %v2408_v21 = vld [vmem:[%s7932_s6 + $0x10] sm:$0xff] }
 0xc23   :  { %5958 = vmatprep.mubr.msk.f32.mxu0 %vm52_vm0, %v2047_v9 }
 0xc32   :  { %6630 = vrot.lane.b32.xlu1 %v7108_v34, %s6926_s27 }
 0xc33   :  { %6625 = vrot.lane.b32.xlu0 %v7096_v30, %s6926_s27 }
 0xcaa   :  { %v2039_v12 = vpop.xlane.xlu0 %2038 }
 0xcab   :  { %6782 = vrcp.f32 %v2039_v12 }
 0xcae   :  { %v2042_v13 = vpop.xlane.xlu1 %2041  ;;  %v6626_v15 = vpop.permute.xlu0 %6625 }
 0xcaf   :  { %6784 = vrcp.f32 %v2042_v13  ;;  %v6628_v16 = vunpack.i.h.bf16 %v6626_v15  ;;  %v6627_v17 = vunpack.i.l.bf16 %v6626_v15 }
 0xcb1   :  { %v6333_v20 = vpack.c.bf16 %v6628_v16, %v6627_v17  ;;  %v2406_v16 = vld [vmem:[%s7932_s6] sm:$0xff]  ;;  %v2407_v17 = vld [vmem:[%s7932_s6 + $0x8] sm:$0xff] }
 0xcb2   :  { %v6631_v22 = vpop.permute.xlu1 %6630 }
 0xcb3   :  { %v6633_v23 = vunpack.i.h.bf16 %v6631_v22  ;;  %v6632_v24 = vunpack.i.l.bf16 %v6631_v22  ;;  %6334 = vmatprep.subr.bf16.mxu0 %v6333_v20  ;;  %v2409_v22 = vld [vmem:[%s7932_s6 + $0x18] sm:$0xff] }
 0xcb4   :  { %6336 = vmatpush3.bf16.msra.mxu0 %v6333_v20  ;;  %v6341_v20 = vpack.c.bf16 %v2407_v17, %v2406_v16 }
 0xcb5   :  { %v6783_v34 = vpop.eup %6782  ;;  %v6337_v27 = vpack.c.bf16 %v6633_v23, %v6632_v24  ;;  %v6345_v23 = vpack.c.bf16 %v2409_v22, %v2408_v21  ;;  %v2518_v24 = vld [vmem:[%s7934_s8] sm:$0xff] }
 0xcb6   :  { %v2049_v30 = vmul.f32 %v6783_v34, %v6775_v33  ;;  %6342 = vmatprep.subr.bf16.mxu0 %v6341_v20  ;;  %v2519_v34 = vld [vmem:[%s7934_s8 + $0x8] sm:$0xff] }
 0xcb7   :  { %5959 = vmatmul.mubr.msk.f32.vlgmr.msra.gmra.mrb[28].mxu0 %vm52_vm0, %v2048_v25  ;;  %6338 = vmatprep.subr.bf16.mxu1 %v6337_v27  ;;  %v2520_v25 = vld [vmem:[%s7934_s8 + $0x10] sm:$0xff] }
 0xcb8   :  { %6340 = vmatpush3.bf16.msra.mxu1 %v6337_v27  ;;  %5965 = vmatprep.mubr.msk.f32.mxu1 %vm52_vm0, %v2049_v30  ;;  %v6349_v27 = vpack.c.bf16 %v2519_v34, %v2518_v24  ;;  %v2521_v30 = vld [vmem:[%s7934_s8 + $0x18] sm:$0xff] }
 0xcb9   :  { %v6785_v29 = vpop.eup %6784  ;;  %5968 = vmatprep.subr.mxu1 %v332_v35  ;;  %6344 = vmatpush3.bf16.msra.mxu0 %v6341_v20 }
 0xcba   :  { %v2050_v32 = vmul.f32 %v6785_v29, %v6777_v7  ;;  %6346 = vmatprep.subr.bf16.mxu0 %v6345_v23  ;;  %v6353_v29 = vpack.c.bf16 %v2521_v30, %v2520_v25 }
 0xcbc   :  { %5966 = vmatmul.mubr.msk.f32.vlgmr.msra.gmra.mrb[12].mxu1 %vm52_vm0, %v2050_v32  ;;  %v2522_v32 = vld [vmem:[%s7934_s8 + $0x20] sm:$0xff] }
 0xcbd   :  { %5969 = vmatpush3.msra.mxu1 %v332_v35  ;;  %6348 = vmatpush3.bf16.msra.mxu0 %v6345_v23  ;;  %v2523_v35 = vld [vmem:[%s7934_s8 + $0x28] sm:$0xff] }
 0xcbe   :  { %6350 = vmatprep.subr.bf16.mxu1 %v6349_v27 }
 0xd8a   :  { %v5960_v61 = vpop.f32.mrb[28].mxu0 }
 0xd8b   :  { %v2129_v60 = vpop.f32.mrb[29].mxu0 }
 0xd8c   :  { %5970 = vmatprep.mubr.msk.f32.mxu1 %vm339_vm2, %v2129_v60  ;;  %v2524_v60 = vld [vmem:[%s7934_s8 + $0x30] sm:$0xff] }
 0xd8d   :  { %5971 = vmatmul.mubr.msk.f32.vlgmr.msra.gmra.mrb[4].mxu1 %vm339_vm2, %v5960_v61  ;;  %v6357_v61 = vpack.c.bf16 %v2523_v35, %v2522_v32  ;;  %v5445_v32 = vld [vmem:[%s7933_s7] ss:$0 sm:$0xff] }
 0xd8e   :  { %6352 = vmatpush3.bf16.msra.mxu1 %v6349_v27 }
 0xd8f   :  { %v5967_v2 = vpop.f32.mrb[12].mxu1  ;;  %6354 = vmatprep.subr.bf16.mxu1 %v6353_v29 }
 0xd90   :  { %v2216_v36 = vpop.f32.mrb[13].mxu1 }
 0xd91   :  { %5973 = vmatprep.mubr.msk.f32.mxu1 %vm339_vm2, %v2216_v36 }
 0xd92   :  { %5974 = vmatmul.mubr.msk.f32.gmra.mrb[6].mxu1 %vm339_vm2, %v5967_v2  ;;  %v2525_v2 = vld [vmem:[%s7934_s8 + $0x38] sm:$0xff] }
 0xd93   :  { %6356 = vmatpush3.bf16.msra.mxu1 %v6353_v29  ;;  %v6361_v36 = vpack.c.bf16 %v2525_v2, %v2524_v60  ;;  %v2532_v29 = vld [vmem:[%s7934_s8 + $0x70] sm:$0xff] }
 0xd94   :  { %6358 = vmatprep.subr.bf16.mxu1 %v6357_v61 }
 0xd97   :  { %6360 = vmatpush3.bf16.msra.mxu1 %v6357_v61 }
 0xd98   :  { %6362 = vmatprep.subr.bf16.mxu1 %v6361_v36 }
 0xd9b   :  { %6364 = vmatpush3.bf16.msra.mxu1 %v6361_v36 }
 0xe60   :  { %v5972_v39 = vpop.f32.mrb[4].mxu1 }
 0xe61   :  { %v2327_v40 = vadd.f32 %v5972_v39, %v7032_v14  ;;  %v2303_v41 = vpop.f32.mrb[5].mxu1  ;;  %v2527_v39 = vld [vmem:[%s7934_s8 + $0x48] sm:$0xff] }
 0xe62   :  { %v2326_v42 = vadd.f32 %v2303_v41, %v7024_v11  ;;  %v2528_v41 = vld [vmem:[%s7934_s8 + $0x50] sm:$0xff] }
 0xe63   :  { %v7312_v43 = vadd.f32 %v2333_v0, %v2327_v40 }
 0xe64   :  { %v7314_v44 = vadd.f32 %v2333_v0, %v2326_v42  ;;  %v2529_v42 = vld [vmem:[%s7934_s8 + $0x58] sm:$0xff] }
 0xe65   :  { %v5975_v45 = vpop.f32.mrb[6].mxu1  ;;  %v2341_v46 = vsel %vm151_vm1, %v7312_v43, 0.0 }
 0xe66   :  { %v2329_v47 = vadd.f32 %v5975_v45, %v7036_v18  ;;  %2342 = vadd.xlane.f32.xlu0 %v2341_v46  ;;  %v2313_v48 = vpop.f32.mrb[7].mxu1  ;;  %v2338_v63 = vsel %vm151_vm1, %v7314_v44, 0.0  ;;  %v6369_v45 = vpack.c.bf16 %v2529_v42, %v2528_v41  ;;  %v2530_v46 = vld [vmem:[%s7934_s8 + $0x60] sm:$0xff] }
 0xe67   :  { %v2328_v49 = vadd.f32 %v2313_v48, %v7038_v19  ;;  %2339 = vadd.xlane.f32.xlu1 %v2338_v63 }
 0xe68   :  { %v7322_v50 = vadd.f32 %v2333_v0, %v2329_v47  ;;  %v2531_v47 = vld [vmem:[%s7934_s8 + $0x68] sm:$0xff] }
 0xe69   :  { %v7324_v51 = vadd.f32 %v2333_v0, %v2328_v49  ;;  %v2526_v0 = vld [vmem:[%s7934_s8 + $0x40] sm:$0xff]  ;;  %v6373_v48 = vpack.c.bf16 %v2531_v47, %v2530_v46  ;;  %v2536_v47 = vsub.s32 5, %v7066_v57 }
 0xe6a   :  { %v2347_v52 = vsel %vm151_vm1, %v7322_v50, 0.0  ;;  %v6365_v40 = vpack.c.bf16 %v2527_v39, %v2526_v0 }
 0xe6b   :  { %2348 = vadd.xlane.f32.xlu1 %v2347_v52  ;;  %v2344_v53 = vsel %vm151_vm1, %v7324_v51, 0.0 }
 0xe6c   :  { %2345 = vadd.xlane.f32.xlu0 %v2344_v53  ;;  %6366 = vmatprep.subr.bf16.mxu1 %v6365_v40 }
 0xe6d   :  { %6368 = vmatpush3.bf16.msra.mxu1 %v6365_v40 }
 0xe6e   :  { %6370 = vmatprep.subr.bf16.mxu1 %v6369_v45 }
 0xe71   :  { %6372 = vmatpush3.bf16.msra.mxu1 %v6369_v45 }
 0xe72   :  { %6374 = vmatprep.subr.bf16.mxu1 %v6373_v48 }
 0xe75   :  { %6376 = vmatpush3.bf16.msra.mxu1 %v6373_v48 }
 0xef3   :  { %v2343_v54 = vpop.xlane.xlu0 %2342 }
 0xef4   :  { %v2351_v55 = vmul.f32 0.03125, %v2343_v54  ;;  %v2340_v56 = vpop.xlane.xlu1 %2339 }
 0xef5   :  { %v2350_v58 = vmul.f32 0.03125, %v2340_v56 }
 0xef6   :  { %v7331_v59 = vsub.f32 %v7312_v43, %v2351_v55 }
 0xef7   :  { %v7334_v3 = vsub.f32 %v7314_v44, %v2350_v58 }
 0xef8   :  { %v2349_v4 = vpop.xlane.xlu1 %2348  ;;  %v2359_v5 = vmul.f32 %v7331_v59, %v7331_v59 }
 0xef9   :  { %v2353_v28 = vmul.f32 0.03125, %v2349_v4  ;;  %v2346_v6 = vpop.xlane.xlu0 %2345  ;;  %v2358_v33 = vmul.f32 %v7334_v3, %v7334_v3 }
 0xefa   :  { %v2352_v26 = vmul.f32 0.03125, %v2346_v6  ;;  %v2365_v7 = vsel %vm151_vm1, %v2359_v5, 0.0 }
 0xefb   :  { %v7342_v8 = vsub.f32 %v7322_v50, %v2353_v28  ;;  %2366 = vadd.xlane.f32.xlu1 %v2365_v7  ;;  %v2362_v31 = vsel %vm151_vm1, %v2358_v33, 0.0  ;;  %v2392_v33 = vsub.s32 3, %v7066_v57  ;;  %v7413_v7 = vld [vmem:[%s7935_s9] sm:$0xff] }
 0xefc   :  { %v7346_v9 = vsub.f32 %v7324_v51, %v2352_v26  ;;  %2363 = vadd.xlane.f32.xlu0 %v2362_v31  ;;  %v2400_v26 = vsub.s32 4, %v7066_v57  ;;  %v2537_v48 = vrot.slane %v7413_v7, %v2536_v47 }
 0xefd   :  { %v2361_v10 = vmul.f32 %v7342_v8, %v7342_v8  ;;  %v2393_v31 = vrot.slane %v7413_v7, %v2392_v33 }
 0xefe   :  { %v2360_v12 = vmul.f32 %v7346_v9, %v7346_v9  ;;  %v2401_v16 = vrot.slane %v7413_v7, %v2400_v26 }
 0xeff   :  { %v2371_v13 = vsel %vm151_vm1, %v2361_v10, 0.0 }
 0xf00   :  { %2372 = vadd.xlane.f32.xlu1 %v2371_v13  ;;  %v2368_v15 = vsel %vm151_vm1, %v2360_v12, 0.0 }
 0xf01   :  { %2369 = vadd.xlane.f32.xlu0 %v2368_v15 }
 0xf88   :  { %v2367_v63 = vpop.xlane.xlu1 %2366 }
 0xf89   :  { %v2375_v49 = vmul.f32 0.03125, %v2367_v63  ;;  %v2364_v52 = vpop.xlane.xlu0 %2363 }
 0xf8a   :  { %v2374_v53 = vmul.f32 0.03125, %v2364_v52 }
 0xf8b   :  { %v2379_v54 = vadd.f32 1e-05, %v2375_v49 }
 0xf8c   :  { %v2378_v55 = vadd.f32 1e-05, %v2374_v53 }
 0xf8d   :  { %6786 = vrsqrt.f32 %v2379_v54  ;;  %v2373_v56 = vpop.xlane.xlu1 %2372 }
 0xf8e   :  { %6788 = vrsqrt.f32 %v2378_v55  ;;  %v2377_v58 = vmul.f32 0.03125, %v2373_v56  ;;  %v2370_v4 = vpop.xlane.xlu0 %2369 }
 0xf8f   :  { %v2376_v5 = vmul.f32 0.03125, %v2370_v4 }
 0xf90   :  { %v2381_v28 = vadd.f32 1e-05, %v2377_v58 }
 0xf91   :  { %v2380_v6 = vadd.f32 1e-05, %v2376_v5 }
 0xf92   :  { %6790 = vrsqrt.f32 %v2381_v28 }
 0xf93   :  { %6792 = vrsqrt.f32 %v2380_v6 }
 0xf97   :  { %v6787_v10 = vpop.eup %6786 }
 0xf98   :  { %v6789_v12 = vpop.eup %6788  ;;  %v2387_v13 = vmul.f32 %v6787_v10, %v7331_v59 }
 0xf99   :  { %v2386_v15 = vmul.f32 %v6789_v12, %v7334_v3 }
 0xf9a   :  { %v2395_v17 = vmul.f32 %v2393_v31, %v2387_v13 }
 0xf9b   :  { %v2394_v20 = vmul.f32 %v2393_v31, %v2386_v15 }
 0xf9c   :  { %v6791_v21 = vpop.eup %6790  ;;  %v2403_v34 = vadd.f32 %v2401_v16, %v2395_v17 }
 0xf9d   :  { %v6793_v22 = vpop.eup %6792  ;;  %v2402_v23 = vadd.f32 %v2401_v16, %v2394_v20  ;;  %v2389_v24 = vmul.f32 %v6791_v21, %v7342_v8  ;;  %v2533_v8 = vld [vmem:[%s7934_s8 + $0x78] sm:$0xff] }
 0xf9e   :  { %v2388_v25 = vmul.f32 %v6793_v22, %v7346_v9  ;;  %v6377_v9 = vpack.c.bf16 %v2533_v8, %v2532_v29 }
 0xf9f   :  { %5984 = vmatprep.mubr.msk.f32.mxu0 %vm151_vm1, %v2402_v23  ;;  %v2397_v27 = vmul.f32 %v2393_v31, %v2389_v24 }
 0xfa0   :  { %5985 = vmatmul.mubr.msk.f32.vlgmr.msra.gmra.mrb[30].mxu0 %vm151_vm1, %v2403_v34  ;;  %v2396_v59 = vmul.f32 %v2393_v31, %v2388_v25  ;;  %6378 = vmatprep.subr.bf16.mxu1 %v6377_v9 }
 0xfa1   :  { %v2405_v30 = vadd.f32 %v2401_v16, %v2397_v27  ;;  %6380 = vmatpush3.bf16.msra.mxu1 %v6377_v9 }
 0xfa2   :  { %v2404_v3 = vadd.f32 %v2401_v16, %v2396_v59 }
 0xfa4   :  { %5987 = vmatprep.mubr.msk.f32.mxu0 %vm151_vm1, %v2404_v3 }
 0xfa5   :  { %5988 = vmatmul.mubr.msk.f32.gmra.mrb[32].mxu0 %vm151_vm1, %v2405_v30 }
0x1073   :  { %v5986_v35 = vpop.f32.mrb[30].mxu0 }
0x1074   :  { %v2501_v61 = vadd.f32 %v5986_v35, %v5445_v32  ;;  %v2495_v60 = vpop.f32.mrb[31].mxu0 }
0x1075   :  { %v2496_v2 = vadd.f32 %v5445_v32, %v2495_v60 }
0x1076   :  { %v2515_v0 = vmax.f32 %v2501_v61, 0.0 }
0x1077   :  { %v2514_v36 = vmax.f32 %v2496_v2, 0.0 }
0x1078   :  { %v5989_v39 = vpop.f32.mrb[32].mxu0 }
0x1079   :  { %v2511_v40 = vadd.f32 %v5989_v39, %v5445_v32  ;;  %v2505_v41 = vpop.f32.mrb[33].mxu0  ;;  %6022 = vmatprep.mubr.f32.mxu1 %v2514_v36 }
0x107a   :  { %v2506_v42 = vadd.f32 %v5445_v32, %v2505_v41  ;;  %6023 = vmatmul.mubr.f32.vlgmr.msra.gmra.mrb[14].mxu1 %v2515_v0 }
0x107b   :  { %v2517_v46 = vmax.f32 %v2511_v40, 0.0 }
0x107c   :  { %v2516_v45 = vmax.f32 %v2506_v42, 0.0 }
0x107e   :  { %6025 = vmatprep.mubr.f32.mxu1 %v2516_v45  ;;  %v2685_v45 = vsub.s32 6, %v7066_v57 }
0x107f   :  { %6026 = vmatmul.mubr.f32.gmra.mrb[16].mxu1 %v2517_v46  ;;  %v2693_v46 = vsub.s32 7, %v7066_v57 }
0x114d   :  { %v6024_v63 = vpop.f32.mrb[14].mxu1 }
0x114e   :  { %v2610_v49 = vadd.f32 %v6024_v63, %v2537_v48  ;;  %v2604_v52 = vpop.f32.mrb[15].mxu1 }
0x114f   :  { %v2605_v53 = vadd.f32 %v2604_v52, %v2537_v48 }
0x1150   :  { %v2624_v54 = vadd.f32 %v2610_v49, %v7312_v43 }
0x1151   :  { %v2623_v55 = vadd.f32 %v2605_v53, %v7314_v44  ;;  %v2694_v53 = vrot.slane %v7413_v7, %v2693_v46 }
0x1152   :  { %v6027_v56 = vpop.f32.mrb[16].mxu1  ;;  %v2628_v58 = vadd.f32 %v2624_v54, %v7032_v14 }
0x1153   :  { %v2620_v4 = vadd.f32 %v6027_v56, %v2537_v48  ;;  %v2614_v5 = vpop.f32.mrb[17].mxu1  ;;  %v2627_v28 = vadd.f32 %v2623_v55, %v7024_v11 }
0x1154   :  { %v2615_v6 = vadd.f32 %v2614_v5, %v2537_v48  ;;  %v2634_v31 = vsel %vm151_vm1, %v2628_v58, 0.0  ;;  %v2686_v48 = vrot.slane %v7413_v7, %v2685_v45 }
0x1155   :  { %v2626_v10 = vadd.f32 %v2620_v4, %v7322_v50  ;;  %2635 = vadd.xlane.f32.xlu1 %v2634_v31  ;;  %v2631_v12 = vsel %vm151_vm1, %v2627_v28, 0.0 }
0x1156   :  { %v2625_v13 = vadd.f32 %v2615_v6, %v7324_v51  ;;  %2632 = vadd.xlane.f32.xlu0 %v2631_v12 }
0x1157   :  { %v2630_v43 = vadd.f32 %v2626_v10, %v7036_v18 }
0x1158   :  { %v2629_v44 = vadd.f32 %v2625_v13, %v7038_v19 }
0x1159   :  { %v2640_v14 = vsel %vm151_vm1, %v2630_v43, 0.0 }
0x115a   :  { %2641 = vadd.xlane.f32.xlu1 %v2640_v14  ;;  %v2637_v11 = vsel %vm151_vm1, %v2629_v44, 0.0 }
0x115b   :  { %2638 = vadd.xlane.f32.xlu0 %v2637_v11 }
0x11e2   :  { %v2636_v15 = vpop.xlane.xlu1 %2635 }
0x11e3   :  { %v2644_v16 = vmul.f32 0.03125, %v2636_v15  ;;  %v2633_v17 = vpop.xlane.xlu0 %2632 }
0x11e4   :  { %v2643_v50 = vmul.f32 0.03125, %v2633_v17 }
0x11e5   :  { %v2648_v20 = vsub.f32 %v2628_v58, %v2644_v16 }
0x11e6   :  { %v2647_v21 = vsub.f32 %v2627_v28, %v2643_v50 }
0x11e7   :  { %v2642_v22 = vpop.xlane.xlu1 %2641  ;;  %v2652_v23 = vmul.f32 %v2648_v20, %v2648_v20 }
0x11e8   :  { %v2646_v51 = vmul.f32 0.03125, %v2642_v22  ;;  %v2639_v24 = vpop.xlane.xlu0 %2638  ;;  %v2651_v34 = vmul.f32 %v2647_v21, %v2647_v21 }
0x11e9   :  { %v2645_v18 = vmul.f32 0.03125, %v2639_v24  ;;  %v2658_v19 = vsel %vm151_vm1, %v2652_v23, 0.0 }
0x11ea   :  { %v2650_v25 = vsub.f32 %v2630_v43, %v2646_v51  ;;  %2659 = vadd.xlane.f32.xlu1 %v2658_v19  ;;  %v2655_v27 = vsel %vm151_vm1, %v2651_v34, 0.0 }
0x11eb   :  { %v2649_v59 = vsub.f32 %v2629_v44, %v2645_v18  ;;  %2656 = vadd.xlane.f32.xlu0 %v2655_v27 }
0x11ec   :  { %v2654_v3 = vmul.f32 %v2650_v25, %v2650_v25 }
0x11ed   :  { %v2653_v30 = vmul.f32 %v2649_v59, %v2649_v59 }
0x11ee   :  { %v2664_v29 = vsel %vm151_vm1, %v2654_v3, 0.0 }
0x11ef   :  { %2665 = vadd.xlane.f32.xlu1 %v2664_v29  ;;  %v2661_v8 = vsel %vm151_vm1, %v2653_v30, 0.0 }
0x11f0   :  { %2662 = vadd.xlane.f32.xlu0 %v2661_v8 }
0x1277   :  { %v2660_v9 = vpop.xlane.xlu1 %2659 }
0x1278   :  { %v2668_v32 = vmul.f32 0.03125, %v2660_v9  ;;  %v2657_v35 = vpop.xlane.xlu0 %2656  ;;  %v5451_v9 = vld [vmem:[%s7929_s3 + $0x20] sm:$0xff] }
0x1279   :  { %v2667_v61 = vmul.f32 0.03125, %v2657_v35 }
0x127a   :  { %v2672_v60 = vadd.f32 1e-05, %v2668_v32  ;;  %v5452_v32 = vld [vmem:[%s7929_s3 + $0x28] sm:$0xff] }
0x127b   :  { %v2671_v2 = vadd.f32 1e-05, %v2667_v61  ;;  %v6381_v35 = vpack.c.bf16 %v5452_v32, %v5451_v9  ;;  %v5453_v61 = vld [vmem:[%s7929_s3 + $0x30] sm:$0xff] }
0x127c   :  { %6794 = vrsqrt.f32 %v2672_v60  ;;  %v2666_v36 = vpop.xlane.xlu1 %2665  ;;  %v5454_v60 = vld [vmem:[%s7929_s3 + $0x38] sm:$0xff] }
0x127d   :  { %6796 = vrsqrt.f32 %v2671_v2  ;;  %v2670_v0 = vmul.f32 0.03125, %v2666_v36  ;;  %v2663_v39 = vpop.xlane.xlu0 %2662  ;;  %6382 = vmatprep.subr.bf16.mxu0 %v6381_v35  ;;  %v6385_v2 = vpack.c.bf16 %v5454_v60, %v5453_v61 }
0x127e   :  { %v2669_v40 = vmul.f32 0.03125, %v2663_v39  ;;  %6384 = vmatpush3.bf16.msra.mxu0 %v6381_v35 }
0x127f   :  { %v2674_v41 = vadd.f32 1e-05, %v2670_v0  ;;  %6386 = vmatprep.subr.bf16.mxu0 %v6385_v2 }
0x1280   :  { %v2673_v42 = vadd.f32 1e-05, %v2669_v40 }
0x1281   :  { %6798 = vrsqrt.f32 %v2674_v41 }
0x1282   :  { %6800 = vrsqrt.f32 %v2673_v42  ;;  %6388 = vmatpush3.bf16.msra.mxu0 %v6385_v2 }
0x1286   :  { %v6795_v63 = vpop.eup %6794 }
0x1287   :  { %v6797_v49 = vpop.eup %6796  ;;  %v2680_v52 = vmul.f32 %v6795_v63, %v2648_v20 }
0x1288   :  { %v2679_v54 = vmul.f32 %v6797_v49, %v2647_v21 }
0x1289   :  { %v2688_v55 = vmul.f32 %v2686_v48, %v2680_v52 }
0x128a   :  { %v2687_v56 = vmul.f32 %v2686_v48, %v2679_v54 }
0x128b   :  { %v6799_v58 = vpop.eup %6798  ;;  %v7466_v4 = vadd.f32 %v2694_v53, %v2688_v55  ;;  %v7505_v55 = vld [vmem:[%s7935_s9 + $0x8] sm:$0xff] }
0x128c   :  { %v6801_v5 = vpop.eup %6800  ;;  %v7468_v28 = vadd.f32 %v2694_v53, %v2687_v56  ;;  %v2682_v6 = vmul.f32 %v6799_v58, %v2650_v25  ;;  %v2756_v56 = vrot.slane %v7505_v55, %v207_v62 }
0x128d   :  { %v2704_v31 = vsel %vm151_vm1, %v7466_v4, 0.0  ;;  %v2681_v10 = vmul.f32 %v6801_v5, %v2649_v59 }
0x128e   :  { %2705 = vadd.xlane.f32.xlu1 %v2704_v31  ;;  %v2701_v12 = vsel %vm151_vm1, %v7468_v28, 0.0  ;;  %v2690_v13 = vmul.f32 %v2686_v48, %v2682_v6 }
0x128f   :  { %2702 = vadd.xlane.f32.xlu0 %v2701_v12  ;;  %v2689_v7 = vmul.f32 %v2686_v48, %v2681_v10  ;;  %v2764_v10 = vrot.slane %v7505_v55, %v215_v1  ;;  %v5456_v1 = vld [vmem:[%s7930_s4 + $0x1] ss:$0 sm:$0xff] }
0x1290   :  { %v7474_v43 = vadd.f32 %v2694_v53, %v2690_v13 }
0x1291   :  { %v7476_v44 = vadd.f32 %v2694_v53, %v2689_v7 }
0x1292   :  { %v2710_v14 = vsel %vm151_vm1, %v7474_v43, 0.0 }
0x1293   :  { %2711 = vadd.xlane.f32.xlu1 %v2710_v14  ;;  %v2707_v11 = vsel %vm151_vm1, %v7476_v44, 0.0 }
0x1294   :  { %2708 = vadd.xlane.f32.xlu0 %v2707_v11 }
0x131b   :  { %v2706_v15 = vpop.xlane.xlu1 %2705 }
0x131c   :  { %v2714_v16 = vmul.f32 0.03125, %v2706_v15  ;;  %v2703_v17 = vpop.xlane.xlu0 %2702 }
0x131d   :  { %v2713_v50 = vmul.f32 0.03125, %v2703_v17 }
0x131e   :  { %v2718_v20 = vsub.f32 %v7466_v4, %v2714_v16 }
0x131f   :  { %v2717_v21 = vsub.f32 %v7468_v28, %v2713_v50 }
0x1320   :  { %v2712_v22 = vpop.xlane.xlu1 %2711  ;;  %v2722_v23 = vmul.f32 %v2718_v20, %v2718_v20 }
0x1321   :  { %v2716_v51 = vmul.f32 0.03125, %v2712_v22  ;;  %v2709_v24 = vpop.xlane.xlu0 %2708  ;;  %v2721_v34 = vmul.f32 %v2717_v21, %v2717_v21 }
0x1322   :  { %v2715_v18 = vmul.f32 0.03125, %v2709_v24  ;;  %v2728_v19 = vsel %vm151_vm1, %v2722_v23, 0.0 }
0x1323   :  { %v2720_v25 = vsub.f32 %v7474_v43, %v2716_v51  ;;  %2729 = vadd.xlane.f32.xlu1 %v2728_v19  ;;  %v2725_v27 = vsel %vm151_vm1, %v2721_v34, 0.0 }
0x1324   :  { %v2719_v59 = vsub.f32 %v7476_v44, %v2715_v18  ;;  %2726 = vadd.xlane.f32.xlu0 %v2725_v27 }
0x1325   :  { %v2724_v3 = vmul.f32 %v2720_v25, %v2720_v25 }
0x1326   :  { %v2723_v30 = vmul.f32 %v2719_v59, %v2719_v59 }
0x1327   :  { %v2734_v29 = vsel %vm151_vm1, %v2724_v3, 0.0 }
0x1328   :  { %2735 = vadd.xlane.f32.xlu1 %v2734_v29  ;;  %v2731_v8 = vsel %vm151_vm1, %v2723_v30, 0.0 }
0x1329   :  { %2732 = vadd.xlane.f32.xlu0 %v2731_v8 }
0x13b0   :  { %v2730_v36 = vpop.xlane.xlu1 %2729 }
0x13b1   :  { %v2738_v0 = vmul.f32 0.03125, %v2730_v36  ;;  %v2727_v39 = vpop.xlane.xlu0 %2726 }
0x13b2   :  { %v2737_v40 = vmul.f32 0.03125, %v2727_v39 }
0x13b3   :  { %v2742_v41 = vadd.f32 1e-05, %v2738_v0 }
0x13b4   :  { %v2741_v42 = vadd.f32 1e-05, %v2737_v40 }
0x13b5   :  { %6802 = vrsqrt.f32 %v2742_v41  ;;  %v2736_v48 = vpop.xlane.xlu1 %2735 }
0x13b6   :  { %6804 = vrsqrt.f32 %v2741_v42  ;;  %v2740_v63 = vmul.f32 0.03125, %v2736_v48  ;;  %v2733_v49 = vpop.xlane.xlu0 %2732 }
0x13b7   :  { %v2739_v52 = vmul.f32 0.03125, %v2733_v49 }
0x13b8   :  { %v2744_v53 = vadd.f32 1e-05, %v2740_v63 }
0x13b9   :  { %v2743_v54 = vadd.f32 1e-05, %v2739_v52 }
0x13ba   :  { %6806 = vrsqrt.f32 %v2744_v53 }
0x13bb   :  { %6808 = vrsqrt.f32 %v2743_v54 }
0x13bf   :  { %v6803_v58 = vpop.eup %6802 }
0x13c0   :  { %v6805_v5 = vpop.eup %6804  ;;  %v2750_v6 = vmul.f32 %v6803_v58, %v2718_v20 }
0x13c1   :  { %v2749_v31 = vmul.f32 %v6805_v5, %v2717_v21 }
0x13c2   :  { %v2758_v12 = vmul.f32 %v2756_v56, %v2750_v6 }
0x13c3   :  { %v2757_v13 = vmul.f32 %v2756_v56, %v2749_v31 }
0x13c4   :  { %v6807_v7 = vpop.eup %6806  ;;  %v2766_v16 = vadd.f32 %v2764_v10, %v2758_v12 }
0x13c5   :  { %v6809_v14 = vpop.eup %6808  ;;  %v2765_v11 = vadd.f32 %v2764_v10, %v2757_v13  ;;  %v2752_v15 = vmul.f32 %v6807_v7, %v2720_v25 }
0x13c6   :  { %v2751_v17 = vmul.f32 %v6809_v14, %v2719_v59 }
0x13c7   :  { %6036 = vmatprep.mubr.msk.f32.mxu0 %vm151_vm1, %v2765_v11  ;;  %v2760_v50 = vmul.f32 %v2756_v56, %v2752_v15 }
0x13c8   :  { %6037 = vmatmul.mubr.msk.f32.vlgmr.msra.gmra.mrb[34].mxu0 %vm151_vm1, %v2766_v16  ;;  %v2759_v62 = vmul.f32 %v2756_v56, %v2751_v17 }
0x13c9   :  { %v2768_v21 = vadd.f32 %v2764_v10, %v2760_v50 }
0x13ca   :  { %v2767_v20 = vadd.f32 %v2764_v10, %v2759_v62 }
0x13cc   :  { %6039 = vmatprep.mubr.msk.f32.mxu0 %vm151_vm1, %v2767_v20 }
0x13cd   :  { %6040 = vmatmul.mubr.msk.f32.gmra.mrb[36].mxu0 %vm151_vm1, %v2768_v21 }
0x149b   :  { %v6038_v22 = vpop.f32.mrb[34].mxu0 }
0x149c   :  { %v7520_v23 = vadd.f32 %v6038_v22, %v5456_v1  ;;  %v2860_v51 = vpop.f32.mrb[35].mxu0 }
0x149d   :  { %v7522_v24 = vadd.f32 %v5456_v1, %v2860_v51 }
0x149f   :  { %6046 = vmatprep.mubr.msk.f32.mxu0 %vm339_vm2, %v7522_v24  ;;  %v7528_v34 = vpack.i.bf16 %v7520_v23, %v7522_v24 }
0x14a0   :  { %v6041_v18 = vpop.f32.mrb[36].mxu0 }
0x14a1   :  { %v7530_v19 = vadd.f32 %v6041_v18, %v5456_v1  ;;  %6635 = vrot.lane.b32.xlu0 %v7528_v34, %s6916_s13  ;;  %v2870_v25 = vpop.f32.mrb[37].mxu0 }
0x14a2   :  { %v7534_v27 = vadd.f32 %v5456_v1, %v2870_v25 }
0x14a4   :  { %v7538_v59 = vpack.i.bf16 %v7530_v19, %v7534_v27 }
0x14a6   :  { %6640 = vrot.lane.b32.xlu1 %v7538_v59, %s6916_s13 }
0x1513   :  { %v6636_v3 = vpop.permute.xlu0 %6635 }
0x1514   :  { %v6638_v30 = vunpack.i.h.bf16 %v6636_v3  ;;  %v6637_v29 = vunpack.i.l.bf16 %v6636_v3 }
0x1516   :  { %v6389_v8 = vpack.c.bf16 %v6638_v30, %v6637_v29 }
0x1518   :  { %v6641_v9 = vpop.permute.xlu1 %6640  ;;  %6391 = vmatprep.subr.msk.bf16.mxu0 %vm7114_vm3, %v6389_v8 }
0x1519   :  { %v6643_v32 = vunpack.i.h.bf16 %v6641_v9  ;;  %v6642_v35 = vunpack.i.l.bf16 %v6641_v9  ;;  %6394 = vmatpush3.bf16.xpose.msk.msra.mxu0 %vm7114_vm3, %v6389_v8 }
0x151b   :  { %v6395_v61 = vpack.c.bf16 %v6643_v32, %v6642_v35 }
0x151d   :  { %6397 = vmatprep.subr.msk.bf16.mxu0 %vm7114_vm3, %v6395_v61 }
0x1520   :  { %6047 = vmatmul.mubr.msk.f32.vlgmr.msra.gmra.mrb[38].mxu0 %vm339_vm2, %v7520_v23 }
0x1521   :  { %6400 = vmatpush3.bf16.xpose.msk.msra.mxu0 %vm7114_vm3, %v6395_v61  ;;  %6053 = vmatprep.mubr.msk.f32.mxu0 %vm339_vm2, %v7534_v27 }
0x1528   :  { %6054 = vmatmul.mubr.msk.f32.vlgmr.msra.gmra.mrb[40].mxu0 %vm339_vm2, %v7530_v19 }
0x15f3   :  { %v6048_v60 = vpop.f32.mrb[38].mxu0 }
0x15f4   :  { %v2964_v2 = vpop.f32.mrb[39].mxu0  ;;  %v3065_v36 = vsel %vm52_vm0, %v6048_v60, -inf }
0x15f5   :  { %3066 = vmax.xlane.f32.xlu0 %v3065_v36  ;;  %v3062_v0 = vsel %vm52_vm0, %v2964_v2, -inf }
0x15f6   :  { %3063 = vmax.xlane.f32.xlu1 %v3062_v0 }
0x15fb   :  { %v6055_v39 = vpop.f32.mrb[40].mxu0 }
0x15fc   :  { %v3053_v40 = vpop.f32.mrb[41].mxu0  ;;  %v3071_v41 = vsel %vm52_vm0, %v6055_v39, -inf }
0x15fd   :  { %3072 = vmax.xlane.f32.xlu1 %v3071_v41  ;;  %v3068_v42 = vsel %vm52_vm0, %v3053_v40, -inf }
0x15fe   :  { %3069 = vmax.xlane.f32.xlu0 %v3068_v42 }
0x1682   :  { %v3067_v48 = vpop.xlane.xlu0 %3066 }
0x1683   :  { %v3075_v63 = vsub.f32 %v6048_v60, %v3067_v48  ;;  %v3064_v49 = vpop.xlane.xlu1 %3063 }
0x1684   :  { %v3074_v52 = vsub.f32 %v2964_v2, %v3064_v49 }
0x1685   :  { %v3080_v53 = vmul.f32 1.442695, %v3075_v63 }
0x1686   :  { %v3078_v54 = vmul.f32 1.442695, %v3074_v52 }
0x1687   :  { %6810 = vpow2.f32 %v3080_v53 }
0x1688   :  { %6812 = vpow2.f32 %v3078_v54 }
0x168a   :  { %v3073_v56 = vpop.xlane.xlu1 %3072 }
0x168b   :  { %v3077_v58 = vsub.f32 %v6055_v39, %v3073_v56  ;;  %v3070_v5 = vpop.xlane.xlu0 %3069 }
0x168c   :  { %v3076_v6 = vsub.f32 %v3053_v40, %v3070_v5 }
0x168d   :  { %v3084_v31 = vmul.f32 1.442695, %v3077_v58 }
0x168e   :  { %v3082_v10 = vmul.f32 1.442695, %v3076_v6 }
0x168f   :  { %6814 = vpow2.f32 %v3084_v31 }
0x1690   :  { %6816 = vpow2.f32 %v3082_v10 }
0x1691   :  { %v6811_v12 = vpop.eup %6810 }
0x1692   :  { %v6813_v13 = vpop.eup %6812  ;;  %v3089_v7 = vsel %vm52_vm0, %v6811_v12, 0.0 }
0x1693   :  { %3090 = vadd.xlane.f32.xlu1 %v3089_v7  ;;  %v3086_v14 = vsel %vm52_vm0, %v6813_v13, 0.0 }
0x1694   :  { %3087 = vadd.xlane.f32.xlu0 %v3086_v14 }
0x1699   :  { %v6815_v11 = vpop.eup %6814 }
0x169a   :  { %v6817_v15 = vpop.eup %6816  ;;  %v3095_v16 = vsel %vm52_vm0, %v6815_v11, 0.0 }
0x169b   :  { %3096 = vadd.xlane.f32.xlu1 %v3095_v16  ;;  %v3092_v17 = vsel %vm52_vm0, %v6817_v15, 0.0 }
0x169c   :  { %3093 = vadd.xlane.f32.xlu0 %v3092_v17 }
0x16ac   :  { %6650 = vrot.lane.b32.xlu1 %v7538_v59, %s6917_s14 }
0x16b0   :  { %6655 = vrot.lane.b32.xlu1 %v7538_v59, %s6918_s15 }
0x16b2   :  { %6645 = vrot.lane.b32.xlu0 %v7528_v34, %s6917_s14 }
0x16b4   :  { %3371 = vrot.lane.b32.xlu1 %v7534_v27, %s6919_s16 }
0x16b6   :  { %3373 = vrot.lane.b32.xlu0 %v7530_v19, %s6919_s16 }
0x16b8   :  { %6660 = vrot.lane.b32.xlu1 %v7528_v34, %s6918_s15 }
0x16ba   :  { %3280 = vrot.lane.b32.xlu0 %v7522_v24, %s6919_s16 }
0x16bc   :  { %3282 = vrot.lane.b32.xlu1 %v7520_v23, %s6919_s16 }
0x1720   :  { %v3091_v62 = vpop.xlane.xlu1 %3090 }
0x1721   :  { %v3088_v50 = vpop.xlane.xlu0 %3087 }
0x1722   :  { %6818 = vrcp.f32 %v3088_v50 }
0x1723   :  { %6820 = vrcp.f32 %v3091_v62 }
0x1728   :  { %v3097_v20 = vpop.xlane.xlu1 %3096 }
0x1729   :  { %v3094_v21 = vpop.xlane.xlu0 %3093 }
0x172a   :  { %6822 = vrcp.f32 %v3094_v21 }
0x172b   :  { %6824 = vrcp.f32 %v3097_v20 }
0x172c   :  { %v6819_v1 = vpop.eup %6818  ;;  %v6651_v22 = vpop.permute.xlu1 %6650 }
0x172d   :  { %v6646_v51 = vpop.permute.xlu0 %6645  ;;  %v3102_v18 = vmul.f32 %v6819_v1, %v6813_v13  ;;  %v6653_v25 = vunpack.i.h.bf16 %v6651_v22  ;;  %v6652_v3 = vunpack.i.l.bf16 %v6651_v22  ;;  %v6821_v32 = vpop.eup %6820 }
0x172e   :  { %v6648_v30 = vunpack.i.h.bf16 %v6646_v51  ;;  %v6647_v29 = vunpack.i.l.bf16 %v6646_v51  ;;  %v3103_v0 = vmul.f32 %v6821_v32, %v6811_v12 }
0x172f   :  { %6060 = vmatprep.mubr.msk.f32.mxu0 %vm52_vm0, %v3102_v18  ;;  %v6405_v61 = vpack.c.bf16 %v6653_v25, %v6652_v3 }
0x1730   :  { %v6401_v8 = vpack.c.bf16 %v6648_v30, %v6647_v29  ;;  %v6656_v9 = vpop.permute.xlu1 %6655 }
0x1731   :  { %v3374_v35 = vpop.permute.xlu0 %3373  ;;  %v6658_v60 = vunpack.i.h.bf16 %v6656_v9  ;;  %v6657_v2 = vunpack.i.l.bf16 %v6656_v9 }
0x1732   :  { %6402 = vmatprep.subr.bf16.mxu0 %v6401_v8 }
0x1733   :  { %6404 = vmatpush3.bf16.msra.mxu0 %v6401_v8  ;;  %v6415_v48 = vpack.c.bf16 %v6658_v60, %v6657_v2 }
0x1734   :  { %v6823_v36 = vpop.eup %6822  ;;  %v3372_v39 = vpop.permute.xlu1 %3371  ;;  %6406 = vmatprep.subr.bf16.mxu0 %v6405_v61 }
0x1735   :  { %v6825_v40 = vpop.eup %6824  ;;  %v3281_v41 = vpop.permute.xlu0 %3280  ;;  %v3104_v42 = vmul.f32 %v6823_v36, %v6817_v15 }
0x1736   :  { %6061 = vmatmul.mubr.msk.f32.vlgmr.msra.gmra.mrb[42].mxu0 %vm52_vm0, %v3103_v0  ;;  %6074 = vmatprep.mubr.msk.f32.mxu1 %vm339_vm2, %v3281_v41  ;;  %v3105_v63 = vmul.f32 %v6825_v40, %v6815_v11 }
0x1737   :  { %6408 = vmatpush3.bf16.msra.mxu0 %v6405_v61  ;;  %6067 = vmatprep.mubr.msk.f32.mxu0 %vm52_vm0, %v3104_v42 }
0x1738   :  { %v6661_v49 = vpop.permute.xlu1 %6660  ;;  %6417 = vmatprep.subr.msk.bf16.mxu0 %vm7114_vm3, %v6415_v48 }
0x1739   :  { %v6663_v52 = vunpack.i.h.bf16 %v6661_v49  ;;  %v6662_v53 = vunpack.i.l.bf16 %v6661_v49 }
0x173a   :  { %6068 = vmatmul.mubr.msk.f32.vlgmr.msra.gmra.mrb[44].mxu0 %vm52_vm0, %v3105_v63 }
0x173b   :  { %v6409_v54 = vpack.c.bf16 %v6663_v52, %v6662_v53  ;;  %6081 = vmatprep.mubr.msk.f32.mxu0 %vm339_vm2, %v3372_v39 }
0x173c   :  { %v3283_v56 = vpop.permute.xlu1 %3282 }
0x173d   :  { %6411 = vmatprep.subr.msk.bf16.mxu1 %vm7114_vm3, %v6409_v54 }
0x173e   :  { %6414 = vmatpush3.bf16.xpose.msk.msra.mxu1 %vm7114_vm3, %v6409_v54 }
0x1740   :  { %6420 = vmatpush3.bf16.xpose.msk.msra.mxu0 %vm7114_vm3, %v6415_v48 }
0x1745   :  { %6075 = vmatmul.mubr.msk.f32.vlgmr.msra.gmra.mrb[18].mxu1 %vm339_vm2, %v3283_v56 }
0x1747   :  { %6082 = vmatmul.mubr.msk.f32.vlgmr.msra.gmra.mrb[46].mxu0 %vm339_vm2, %v3374_v35 }
0x1809   :  { %v7596_v58 = vpop.f32.mrb[42].mxu0 }
0x180a   :  { %v7598_v5 = vpop.f32.mrb[43].mxu0 }
0x180d   :  { %v7600_v6 = vpop.f32.mrb[44].mxu0 }
0x180e   :  { %v7602_v31 = vpop.f32.mrb[45].mxu0 }
0x1818   :  { %v7604_v10 = vpop.f32.mrb[18].mxu1 }
0x1819   :  { %v3362_v12 = vpop.f32.mrb[19].mxu1  ;;  %v3465_v36 = vsel %vm52_vm0, %v7604_v10, -inf }
0x181a   :  { %v6083_v13 = vpop.f32.mrb[46].mxu0  ;;  %v3462_v15 = vsel %vm52_vm0, %v3362_v12, -inf }
0x181b   :  { %v3453_v7 = vpop.f32.mrb[47].mxu0  ;;  %v3471_v14 = vsel %vm52_vm0, %v6083_v13, -inf }
0x181c   :  { %3472 = vmax.xlane.f32.xlu1 %v3471_v14  ;;  %v3468_v11 = vsel %vm52_vm0, %v3453_v7, -inf }
0x181d   :  { %3469 = vmax.xlane.f32.xlu0 %v3468_v11 }
0x182d   :  { %6670 = vrot.lane.b32.xlu1 %v7528_v34, %s6921_s18 }
0x1831   :  { %6675 = vrot.lane.b32.xlu1 %v7538_v59, %s6921_s18 }
0x1835   :  { %3874 = vrot.lane.b32.xlu1 %v7522_v24, %s6922_s19 }
0x1839   :  { %3965 = vrot.lane.b32.xlu1 %v7534_v27, %s6922_s19 }
0x185d   :  { %3463 = vmax.xlane.f32.xlu1 %v3462_v15 }
0x186e   :  { %6680 = vrot.lane.b32.xlu1 %v7528_v34, %s6920_s17 }
0x18a9   :  { %v3473_v16 = vpop.xlane.xlu1 %3472 }
0x18aa   :  { %v3477_v17 = vsub.f32 %v6083_v13, %v3473_v16  ;;  %v3470_v50 = vpop.xlane.xlu0 %3469 }
0x18ab   :  { %v3476_v62 = vsub.f32 %v3453_v7, %v3470_v50 }
0x18ac   :  { %v3484_v20 = vmul.f32 1.442695, %v3477_v17 }
0x18ad   :  { %v3482_v21 = vmul.f32 1.442695, %v3476_v62  ;;  %v6671_v25 = vpop.permute.xlu1 %6670 }
0x18ae   :  { %6826 = vpow2.f32 %v3484_v20  ;;  %v6673_v48 = vunpack.i.h.bf16 %v6671_v25  ;;  %v6672_v63 = vunpack.i.l.bf16 %v6671_v25 }
0x18af   :  { %6828 = vpow2.f32 %v3482_v21 }
0x18b0   :  { %v6429_v54 = vpack.c.bf16 %v6673_v48, %v6672_v63 }
0x18b1   :  { %v6676_v3 = vpop.permute.xlu1 %6675 }
0x18b2   :  { %v6678_v14 = vunpack.i.h.bf16 %v6676_v3  ;;  %v6677_v11 = vunpack.i.l.bf16 %v6676_v3 }
0x18b4   :  { %v6435_v15 = vpack.c.bf16 %v6678_v14, %v6677_v11 }
0x18b5   :  { %v3875_v30 = vpop.permute.xlu1 %3874 }
0x18b8   :  { %v6827_v1 = vpop.eup %6826 }
0x18b9   :  { %v3495_v22 = vsel %vm52_vm0, %v6827_v1, 0.0  ;;  %v6829_v51 = vpop.eup %6828  ;;  %v3966_v29 = vpop.permute.xlu1 %3965 }
0x18ba   :  { %3496 = vadd.xlane.f32.xlu0 %v3495_v22  ;;  %v3492_v18 = vsel %vm52_vm0, %v6829_v51, 0.0 }
0x18be   :  { %3493 = vadd.xlane.f32.xlu0 %v3492_v18 }
0x18d4   :  { %6665 = vrot.lane.b32.xlu0 %v7538_v59, %s6920_s17 }
0x18d8   :  { %3876 = vrot.lane.b32.xlu0 %v7520_v23, %s6922_s19 }
0x18dc   :  { %3967 = vrot.lane.b32.xlu0 %v7530_v19, %s6922_s19 }
0x18ea   :  { %v3464_v8 = vpop.xlane.xlu1 %3463 }
0x18eb   :  { %v3474_v9 = vsub.f32 %v3362_v12, %v3464_v8 }
0x18ed   :  { %v3478_v32 = vmul.f32 1.442695, %v3474_v9 }
0x18ee   :  { %v6681_v35 = vpop.permute.xlu1 %6680 }
0x18ef   :  { %v6683_v61 = vunpack.i.h.bf16 %v6681_v35  ;;  %v6682_v60 = vunpack.i.l.bf16 %v6681_v35  ;;  %6830 = vpow2.f32 %v3478_v32 }
0x18f1   :  { %v6421_v2 = vpack.c.bf16 %v6683_v61, %v6682_v60 }
0x18f3   :  { %6422 = vmatprep.subr.bf16.mxu1 %v6421_v2 }
0x18f4   :  { %6424 = vmatpush3.bf16.msra.mxu1 %v6421_v2 }
0x18f9   :  { %v6831_v0 = vpop.eup %6830 }
0x18fa   :  { %v3486_v39 = vsel %vm52_vm0, %v6831_v0, 0.0 }
0x18fb   :  { %3466 = vmax.xlane.f32.xlu0 %v3465_v36 }
0x18ff   :  { %3487 = vadd.xlane.f32.xlu0 %v3486_v39  ;;  %v5461_v39 = vld [vmem:[%s7931_s5 + $0x20] sm:$0xff] }
0x1947   :  { %v3497_v40 = vpop.xlane.xlu0 %3496 }
0x1948   :  { %6832 = vrcp.f32 %v3497_v40 }
0x194b   :  { %v3494_v41 = vpop.xlane.xlu0 %3493 }
0x194c   :  { %6834 = vrcp.f32 %v3494_v41 }
0x194f   :  { %v6666_v42 = vpop.permute.xlu0 %6665 }
0x1950   :  { %v6668_v49 = vunpack.i.h.bf16 %v6666_v42  ;;  %v6667_v52 = vunpack.i.l.bf16 %v6666_v42 }
0x1952   :  { %v6425_v53 = vpack.c.bf16 %v6668_v49, %v6667_v52  ;;  %v6833_v56 = vpop.eup %6832 }
0x1953   :  { %v3505_v7 = vmul.f32 %v6833_v56, %v6827_v1  ;;  %v3877_v16 = vpop.permute.xlu0 %3876 }
0x1954   :  { %6426 = vmatprep.subr.bf16.mxu0 %v6425_v53 }
0x1955   :  { %6428 = vmatpush3.bf16.msra.mxu0 %v6425_v53 }
0x1956   :  { %v6835_v12 = vpop.eup %6834  ;;  %6431 = vmatprep.subr.msk.bf16.mxu0 %vm7114_vm3, %v6429_v54 }
0x1957   :  { %v3504_v13 = vmul.f32 %v6835_v12, %v6829_v51  ;;  %v3968_v17 = vpop.permute.xlu0 %3967 }
0x1959   :  { %6095 = vmatprep.mubr.msk.f32.mxu0 %vm52_vm0, %v3504_v13 }
0x195a   :  { %6096 = vmatmul.mubr.msk.f32.vlgmr.msra.gmra.mrb[48].mxu0 %vm52_vm0, %v3505_v7 }
0x195b   :  { %6118 = vmatprep.mubr.msk.f32.mxu0 %vm339_vm2, %v3875_v30 }
0x195e   :  { %6434 = vmatpush3.bf16.xpose.msk.msra.mxu0 %vm7114_vm3, %v6429_v54 }
0x195f   :  { %6437 = vmatprep.subr.msk.bf16.mxu0 %vm7114_vm3, %v6435_v15 }
0x1965   :  { %6119 = vmatmul.mubr.msk.f32.vlgmr.msra.gmra.mrb[50].mxu0 %vm339_vm2, %v3877_v16 }
0x1966   :  { %6440 = vmatpush3.bf16.xpose.msk.msra.mxu0 %vm7114_vm3, %v6435_v15  ;;  %6125 = vmatprep.mubr.msk.f32.mxu0 %vm339_vm2, %v3966_v29 }
0x196d   :  { %6126 = vmatmul.mubr.msk.f32.vlgmr.msra.gmra.mrb[52].mxu0 %vm339_vm2, %v3968_v17 }
0x1988   :  { %v3467_v50 = vpop.xlane.xlu0 %3466 }
0x1989   :  { %v3475_v62 = vsub.f32 %v7604_v10, %v3467_v50 }
0x198b   :  { %v3480_v20 = vmul.f32 1.442695, %v3475_v62 }
0x198c   :  { %v3488_v21 = vpop.xlane.xlu0 %3487 }
0x198d   :  { %6836 = vpow2.f32 %v3480_v20 }
0x198e   :  { %6838 = vrcp.f32 %v3488_v21 }
0x1997   :  { %v6837_v1 = vpop.eup %6836 }
0x1998   :  { %v6839_v22 = vpop.eup %6838  ;;  %v3489_v51 = vsel %vm52_vm0, %v6837_v1, 0.0 }
0x1999   :  { %3490 = vadd.xlane.f32.xlu0 %v3489_v51  ;;  %v3502_v18 = vmul.f32 %v6839_v22, %v6831_v0  ;;  %v5462_v0 = vld [vmem:[%s7931_s5 + $0x28] sm:$0xff] }
0x199a   :  { %6098 = vmatprep.subr.mxu1 %v5462_v0 }
0x199b   :  { %6088 = vmatprep.mubr.msk.f32.mxu1 %vm52_vm0, %v3502_v18 }
0x1a26   :  { %v3491_v25 = vpop.xlane.xlu0 %3490 }
0x1a27   :  { %6840 = vrcp.f32 %v3491_v25 }
0x1a2d   :  { %v6097_v3 = vpop.f32.mrb[48].mxu0 }
0x1a2e   :  { %v3671_v30 = vpop.f32.mrb[49].mxu0 }
0x1a31   :  { %v6841_v29 = vpop.eup %6840 }
0x1a32   :  { %v3503_v8 = vmul.f32 %v6841_v29, %v6837_v1 }
0x1a34   :  { %6089 = vmatmul.mubr.msk.f32.vlgmr.msra.gmra.mrb[20].mxu1 %vm52_vm0, %v3503_v8  ;;  %v5463_v8 = vld [vmem:[%s7931_s5 + $0x30] sm:$0xff] }
0x1a35   :  { %6099 = vmatpush3.msra.mxu1 %v5462_v0 }
0x1a36   :  { %6106 = vmatprep.subr.mxu1 %v5461_v39 }
0x1a38   :  { %v6120_v10 = vpop.f32.mrb[50].mxu0 }
0x1a39   :  { %v3956_v9 = vpop.f32.mrb[51].mxu0  ;;  %v4059_v32 = vsel %vm52_vm0, %v6120_v10, -inf }
0x1a3a   :  { %4060 = vmax.xlane.f32.xlu0 %v4059_v32  ;;  %v4056_v35 = vsel %vm52_vm0, %v3956_v9, -inf }
0x1a3e   :  { %4057 = vmax.xlane.f32.xlu0 %v4056_v35 }
0x1a40   :  { %v6127_v61 = vpop.f32.mrb[52].mxu0 }
0x1a41   :  { %v4047_v60 = vpop.f32.mrb[53].mxu0  ;;  %v4065_v36 = vsel %vm52_vm0, %v6127_v61, -inf }
0x1a42   :  { %v4062_v2 = vsel %vm52_vm0, %v4047_v60, -inf }
0x1a43   :  { %4063 = vmax.xlane.f32.xlu0 %v4062_v2 }
0x1a47   :  { %4066 = vmax.xlane.f32.xlu0 %v4065_v36 }
0x1ac7   :  { %v4061_v40 = vpop.xlane.xlu0 %4060 }
0x1ac8   :  { %v4069_v41 = vsub.f32 %v6120_v10, %v4061_v40 }
0x1aca   :  { %v4074_v42 = vmul.f32 1.442695, %v4069_v41 }
0x1acb   :  { %v4058_v48 = vpop.xlane.xlu0 %4057 }
0x1acc   :  { %6842 = vpow2.f32 %v4074_v42  ;;  %v4068_v63 = vsub.f32 %v3956_v9, %v4058_v48 }
0x1ace   :  { %v4072_v49 = vmul.f32 1.442695, %v4068_v63 }
0x1ad0   :  { %6844 = vpow2.f32 %v4072_v49  ;;  %v4064_v52 = vpop.xlane.xlu0 %4063 }
0x1ad1   :  { %v4070_v53 = vsub.f32 %v4047_v60, %v4064_v52 }
0x1ad3   :  { %v4076_v13 = vmul.f32 1.442695, %v4070_v53 }
0x1ad4   :  { %v4067_v54 = vpop.xlane.xlu0 %4066 }
0x1ad5   :  { %v4071_v56 = vsub.f32 %v6127_v61, %v4067_v54 }
0x1ad6   :  { %v7658_v12 = vpop.eup %6842 }
0x1ad7   :  { %v4078_v7 = vmul.f32 1.442695, %v4071_v56  ;;  %v4083_v14 = vsel %vm52_vm0, %v7658_v12, 0.0 }
0x1ad8   :  { %4084 = vadd.xlane.f32.xlu0 %v4083_v14 }
0x1ad9   :  { %6846 = vpow2.f32 %v4078_v7 }
0x1ada   :  { %v6845_v11 = vpop.eup %6844  ;;  %6848 = vpow2.f32 %v4076_v13 }
0x1adb   :  { %v4080_v15 = vsel %vm52_vm0, %v6845_v11, 0.0 }
0x1adc   :  { %4081 = vadd.xlane.f32.xlu1 %v4080_v15 }
0x1ae3   :  { %v6847_v16 = vpop.eup %6846 }
0x1ae4   :  { %v4089_v17 = vsel %vm52_vm0, %v6847_v16, 0.0  ;;  %v6849_v50 = vpop.eup %6848 }
0x1ae5   :  { %4090 = vadd.xlane.f32.xlu0 %v4089_v17  ;;  %v4086_v62 = vsel %vm52_vm0, %v6849_v50, 0.0 }
0x1ae9   :  { %4087 = vadd.xlane.f32.xlu0 %v4086_v62 }
0x1aed   :  { %6690 = vrot.lane.b32.xlu1 %v7538_v59, %s6923_s22 }
0x1af1   :  { %4468 = vrot.lane.b32.xlu1 %v7530_v19, %s6925_s24 }
0x1aff   :  { %6685 = vrot.lane.b32.xlu0 %v7528_v34, %s6923_s22 }
0x1b03   :  { %6695 = vrot.lane.b32.xlu0 %v7528_v34, %s6924_s23 }
0x1b07   :  { %v6090_v20 = vpop.f32.mrb[20].mxu1  ;;  %6700 = vrot.lane.b32.xlu0 %v7538_v59, %s6924_s23 }
0x1b08   :  { %v3584_v21 = vpop.f32.mrb[21].mxu1 }
0x1b09   :  { %6100 = vmatprep.mubr.msk.f32.mxu1 %vm339_vm2, %v3584_v21 }
0x1b0a   :  { %6101 = vmatmul.mubr.msk.f32.vlgmr.msra.gmra.mrb[22].mxu1 %vm339_vm2, %v6090_v20 }
0x1b0b   :  { %4375 = vrot.lane.b32.xlu0 %v7522_v24, %s6925_s24  ;;  %6103 = vmatprep.mubr.msk.f32.mxu1 %vm339_vm2, %v3671_v30 }
0x1b0c   :  { %6107 = vmatpush3.msra.mxu1 %v5461_v39 }
0x1b0e   :  { %6104 = vmatmul.mubr.msk.f32.gmra.mrb[24].mxu1 %vm339_vm2, %v6097_v3 }
0x1b0f   :  { %4377 = vrot.lane.b32.xlu0 %v7520_v23, %s6925_s24  ;;  %6108 = vmatprep.mubr.msk.f32.mxu1 %vm339_vm2, %v7598_v5 }
0x1b12   :  { %6109 = vmatmul.mubr.msk.f32.vlgmr.msra.gmra.mrb[22].mxu1 %vm339_vm2, %v7596_v58 }
0x1b13   :  { %4466 = vrot.lane.b32.xlu0 %v7534_v27, %s6925_s24  ;;  %6111 = vmatprep.mubr.msk.f32.mxu1 %vm339_vm2, %v7602_v31 }
0x1b16   :  { %6112 = vmatmul.mubr.msk.f32.gmra.mrb[24].mxu1 %vm339_vm2, %v7600_v6 }
0x1b65   :  { %v4085_v1 = vpop.xlane.xlu0 %4084 }
0x1b69   :  { %v4082_v24 = vpop.xlane.xlu1 %4081 }
0x1b6a   :  { %6850 = vrcp.f32 %v4082_v24 }
0x1b6b   :  { %6852 = vrcp.f32 %v4085_v1 }
0x1b6d   :  { %v6691_v19 = vpop.permute.xlu1 %6690 }
0x1b6e   :  { %v6693_v23 = vunpack.i.h.bf16 %v6691_v19  ;;  %v6692_v22 = vunpack.i.l.bf16 %v6691_v19 }
0x1b70   :  { %v6445_v51 = vpack.c.bf16 %v6693_v23, %v6692_v22 }
0x1b71   :  { %v4469_v56 = vpop.permute.xlu1 %4468 }
0x1b72   :  { %6446 = vmatprep.subr.bf16.mxu0 %v6445_v51  ;;  %v4091_v5 = vpop.xlane.xlu0 %4090 }
0x1b73   :  { %6448 = vmatpush3.bf16.msra.mxu0 %v6445_v51  ;;  %6854 = vrcp.f32 %v4091_v5 }
0x1b74   :  { %v6851_v58 = vpop.eup %6850 }
0x1b75   :  { %v4096_v18 = vmul.f32 %v6851_v58, %v6845_v11  ;;  %v6853_v30 = vpop.eup %6852 }
0x1b76   :  { %v4088_v27 = vpop.xlane.xlu0 %4087  ;;  %v4097_v61 = vmul.f32 %v6853_v30, %v7658_v12 }
0x1b77   :  { %6856 = vrcp.f32 %v4088_v27  ;;  %6132 = vmatprep.mubr.msk.f32.mxu1 %vm52_vm0, %v4096_v18 }
0x1b7a   :  { %v6686_v31 = vpop.permute.xlu0 %6685 }
0x1b7b   :  { %v6688_v6 = vunpack.i.h.bf16 %v6686_v31  ;;  %v6687_v25 = vunpack.i.l.bf16 %v6686_v31 }
0x1b7d   :  { %v6441_v3 = vpack.c.bf16 %v6688_v6, %v6687_v25  ;;  %v6855_v32 = vpop.eup %6854 }
0x1b7e   :  { %v6696_v29 = vpop.permute.xlu0 %6695  ;;  %v4099_v0 = vmul.f32 %v6855_v32, %v6847_v16 }
0x1b7f   :  { %v6698_v10 = vunpack.i.h.bf16 %v6696_v29  ;;  %v6697_v9 = vunpack.i.l.bf16 %v6696_v29  ;;  %6442 = vmatprep.subr.bf16.mxu1 %v6441_v3 }
0x1b80   :  { %6444 = vmatpush3.bf16.msra.mxu1 %v6441_v3 }
0x1b81   :  { %v6857_v35 = vpop.eup %6856  ;;  %v6449_v60 = vpack.c.bf16 %v6698_v10, %v6697_v9  ;;  %6142 = vmatprep.subr.mxu1 %v5463_v8 }
0x1b82   :  { %v6701_v2 = vpop.permute.xlu0 %6700  ;;  %v4098_v36 = vmul.f32 %v6857_v35, %v6849_v50 }
0x1b83   :  { %v6703_v39 = vunpack.i.h.bf16 %v6701_v2  ;;  %v6702_v40 = vunpack.i.l.bf16 %v6701_v2  ;;  %6133 = vmatmul.mubr.msk.f32.vlgmr.msra.gmra.mrb[26].mxu1 %vm52_vm0, %v4097_v61  ;;  %6451 = vmatprep.subr.msk.bf16.mxu0 %vm7114_vm3, %v6449_v60 }
0x1b84   :  { %6139 = vmatprep.mubr.msk.f32.mxu0 %vm52_vm0, %v4098_v36  ;;  %6143 = vmatpush3.msra.mxu1 %v5463_v8 }
0x1b85   :  { %v6455_v41 = vpack.c.bf16 %v6703_v39, %v6702_v40  ;;  %6140 = vmatmul.mubr.msk.f32.vlgmr.msra.gmra.mrb[54].mxu0 %vm52_vm0, %v4099_v0 }
0x1b86   :  { %6454 = vmatpush3.bf16.xpose.msk.msra.mxu0 %vm7114_vm3, %v6449_v60  ;;  %v4376_v42 = vpop.permute.xlu0 %4375 }
0x1b87   :  { %6154 = vmatprep.mubr.msk.f32.mxu0 %vm339_vm2, %v4376_v42  ;;  %6457 = vmatprep.subr.msk.bf16.mxu1 %vm7114_vm3, %v6455_v41 }
0x1b8a   :  { %v4378_v48 = vpop.permute.xlu0 %4377 }
0x1b8d   :  { %6155 = vmatmul.mubr.msk.f32.vlgmr.msra.gmra.mrb[56].mxu0 %vm339_vm2, %v4378_v48 }
0x1b8e   :  { %v4467_v54 = vpop.permute.xlu0 %4466 }
0x1c56   :  { %v6134_v63 = vpop.f32.mrb[26].mxu1 }
0x1c57   :  { %v4178_v49 = vpop.f32.mrb[27].mxu1 }
0x1c58   :  { %v6141_v52 = vpop.f32.mrb[54].mxu0  ;;  %6144 = vmatprep.mubr.msk.f32.mxu1 %vm339_vm2, %v4178_v49 }
0x1c59   :  { %v4265_v53 = vpop.f32.mrb[55].mxu0  ;;  %6145 = vmatmul.mubr.msk.f32.vlgmr.msra.gmra.mrb[22].mxu1 %vm339_vm2, %v6134_v63 }
0x1c5a   :  { %6460 = vmatpush3.bf16.xpose.msk.msra.mxu1 %vm7114_vm3, %v6455_v41  ;;  %6147 = vmatprep.mubr.msk.f32.mxu1 %vm339_vm2, %v4265_v53 }
0x1c5d   :  { %6148 = vmatmul.mubr.msk.f32.gmra.mrb[24].mxu1 %vm339_vm2, %v6141_v52  ;;  %v5464_v52 = vld [vmem:[%s7931_s5 + $0x38] sm:$0xff]  ;;  %s6930_s5 = smov [#allocation2]  }
0x1c5e   :  { %6161 = vmatprep.mubr.msk.f32.mxu1 %vm339_vm2, %v4467_v54  ;;  %s5364_s22 = sshll.u32 %s6930_s5, 4  ;;  %s5365_s22 = int_to_ptr.vmem [resolvable:$true] %s5364_s22 }
0x1c5f   :  { %s6892_s23 = scalar_lea.vmem %s5365_s22, 32  ;;  %p6897_p1 = scmp.lt.s32.totalorder %s5365_s22, %s5365_s22 }
0x1c60   :  { %v6156_v12 = vpop.f32.mrb[56].mxu0  ;;  %p6893_p0 = scmp.ne.s32.totalorder %s5365_s22, %s6892_s23  ;;  %p6898_p2 = scmp.lt.s32.totalorder %s6892_s23, %s6892_s23 }
0x1c61   :  { %v4457_v13 = vpop.f32.mrb[57].mxu0  ;;  %v4560_v7 = vsel %vm52_vm0, %v6156_v12, -inf  ;;  %6162 = vmatmul.mubr.msk.f32.vlgmr.msra.gmra.mrb[28].mxu1 %vm339_vm2, %v4469_v56 }
0x1c62   :  { %4561 = vmax.xlane.f32.xlu1 %v4560_v7  ;;  %v4557_v14 = vsel %vm52_vm0, %v4457_v13, -inf  ;;  %p6899_p3 = por %p6898_p2, %p6897_p1 }
0x1c63   :  { %4558 = vmax.xlane.f32.xlu0 %v4557_v14 }
0x1c64   :  { %p6900_p4 = pnand %p6899_p3, %p6893_p0 }
0x1cef   :  { %v4562_v50 = vpop.xlane.xlu1 %4561 }
0x1cf0   :  { %v4559_v38 = vpop.xlane.xlu0 %4558  ;;  %v4570_v62 = vsub.f32 %v6156_v12, %v4562_v50 }
0x1cf1   :  { %v4569_v11 = vsub.f32 %v4457_v13, %v4559_v38  ;;  %v4883_v13 = vrot.slane %v7505_v55, %v2332_v37 }
0x1cf2   :  { %v4575_v20 = vmul.f32 1.442695, %v4570_v62 }
0x1cf3   :  { %v4573_v15 = vmul.f32 1.442695, %v4569_v11 }
0x1cf5   :  { %6858 = vpow2.f32 %v4573_v15 }
0x1cf6   :  { %6860 = vpow2.f32 %v4575_v20 }
0x1cff   :  { %v6859_v16 = vpop.eup %6858 }
0x1d00   :  { %v4581_v17 = vsel %vm52_vm0, %v6859_v16, 0.0  ;;  %v6861_v23 = vpop.eup %6860 }
0x1d01   :  { %4582 = vadd.xlane.f32.xlu1 %v4581_v17  ;;  %v4584_v22 = vsel %vm52_vm0, %v6861_v23, 0.0 }
0x1d34   :  { %v6163_v21 = vpop.f32.mrb[28].mxu1 }
0x1d35   :  { %v4548_v24 = vpop.f32.mrb[29].mxu1  ;;  %v4566_v1 = vsel %vm52_vm0, %v6163_v21, -inf }
0x1d36   :  { %v4563_v19 = vsel %vm52_vm0, %v4548_v24, -inf }
0x1d37   :  { %4564 = vmax.xlane.f32.xlu0 %v4563_v19 }
0x1d3b   :  { %4567 = vmax.xlane.f32.xlu0 %v4566_v1 }
0x1d3f   :  { %4585 = vadd.xlane.f32.xlu0 %v4584_v22 }
0x1d8e   :  { %v4583_v51 = vpop.xlane.xlu1 %4582 }
0x1d8f   :  { %6862 = vrcp.f32 %v4583_v51 }
0x1d99   :  { %v6863_v5 = vpop.eup %6862 }
0x1d9a   :  { %v4597_v58 = vmul.f32 %v6863_v5, %v6859_v16 }
0x1d9c   :  { %6168 = vmatprep.mubr.msk.f32.mxu0 %vm52_vm0, %v4597_v58 }
0x1dc4   :  { %v4565_v18 = vpop.xlane.xlu0 %4564 }
0x1dc5   :  { %v4571_v27 = vsub.f32 %v4548_v24, %v4565_v18 }
0x1dc7   :  { %v4577_v31 = vmul.f32 1.442695, %v4571_v27 }
0x1dc8   :  { %v4568_v6 = vpop.xlane.xlu0 %4567 }
0x1dc9   :  { %6864 = vpow2.f32 %v4577_v31  ;;  %v4572_v25 = vsub.f32 %v6163_v21, %v4568_v6 }
0x1dcb   :  { %v4579_v3 = vmul.f32 1.442695, %v4572_v25 }
0x1dcc   :  { %v4586_v9 = vpop.xlane.xlu0 %4585 }
0x1dcd   :  { %6866 = vpow2.f32 %v4579_v3 }
0x1dce   :  { %6868 = vrcp.f32 %v4586_v9 }
0x1dd3   :  { %v6865_v30 = vpop.eup %6864 }
0x1dd4   :  { %v4587_v29 = vsel %vm52_vm0, %v6865_v30, 0.0 }
0x1dd5   :  { %4588 = vadd.xlane.f32.xlu1 %v4587_v29 }
0x1dd7   :  { %v6867_v8 = vpop.eup %6866 }
0x1dd8   :  { %v4590_v10 = vsel %vm52_vm0, %v6867_v8, 0.0  ;;  %v6869_v0 = vpop.eup %6868 }
0x1dd9   :  { %4591 = vadd.xlane.f32.xlu0 %v4590_v10  ;;  %v4598_v42 = vmul.f32 %v6869_v0, %v6861_v23 }
0x1de6   :  { %6705 = vrot.lane.b32.xlu1 %v7528_v34, %s6926_s27 }
0x1def   :  { %6710 = vrot.lane.b32.xlu0 %v7538_v59, %s6926_s27 }
0x1e62   :  { %v4589_v32 = vpop.xlane.xlu1 %4588 }
0x1e63   :  { %6870 = vrcp.f32 %v4589_v32 }
0x1e66   :  { %v6706_v35 = vpop.permute.xlu1 %6705  ;;  %v4592_v61 = vpop.xlane.xlu0 %4591 }
0x1e67   :  { %v6708_v60 = vunpack.i.h.bf16 %v6706_v35  ;;  %v6707_v2 = vunpack.i.l.bf16 %v6706_v35  ;;  %6872 = vrcp.f32 %v4592_v61 }
0x1e69   :  { %v6461_v36 = vpack.c.bf16 %v6708_v60, %v6707_v2  ;;  %v5529_v2 = vld [vmem:[%s7932_s6 + $0x20] sm:$0xff] }
0x1e6a   :  { %v6711_v39 = vpop.permute.xlu0 %6710 }
0x1e6b   :  { %v6713_v40 = vunpack.i.h.bf16 %v6711_v39  ;;  %v6712_v41 = vunpack.i.l.bf16 %v6711_v39  ;;  %6462 = vmatprep.subr.bf16.mxu0 %v6461_v36  ;;  %v5531_v39 = vld [vmem:[%s7932_s6 + $0x30] sm:$0xff] }
0x1e6c   :  { %6464 = vmatpush3.bf16.msra.mxu0 %v6461_v36  ;;  %v5530_v36 = vld [vmem:[%s7932_s6 + $0x28] sm:$0xff] }
0x1e6d   :  { %v6871_v34 = vpop.eup %6870  ;;  %v6465_v48 = vpack.c.bf16 %v6713_v40, %v6712_v41  ;;  %v6469_v0 = vpack.c.bf16 %v5530_v36, %v5529_v2  ;;  %v5532_v40 = vld [vmem:[%s7932_s6 + $0x38] sm:$0xff] }
0x1e6e   :  { %v4599_v59 = vmul.f32 %v6871_v34, %v6865_v30  ;;  %v6473_v41 = vpack.c.bf16 %v5532_v40, %v5531_v39  ;;  %v5539_v34 = vld [vmem:[%s7934_s8 + $0x80] sm:$0xff] }
0x1e6f   :  { %6169 = vmatmul.mubr.msk.f32.vlgmr.msra.gmra.mrb[58].mxu0 %vm52_vm0, %v4598_v42  ;;  %6466 = vmatprep.subr.bf16.mxu1 %v6465_v48  ;;  %v5540_v42 = vld [vmem:[%s7934_s8 + $0x88] sm:$0xff] }
0x1e70   :  { %6468 = vmatpush3.bf16.msra.mxu1 %v6465_v48  ;;  %6175 = vmatprep.mubr.msk.f32.mxu1 %vm52_vm0, %v4599_v59  ;;  %v5541_v48 = vld [vmem:[%s7934_s8 + $0x90] sm:$0xff]  ;;  %v6477_v59 = vpack.c.bf16 %v5540_v42, %v5539_v34 }
0x1e71   :  { %v6873_v63 = vpop.eup %6872  ;;  %6178 = vmatprep.subr.mxu1 %v5464_v52  ;;  %6470 = vmatprep.subr.bf16.mxu0 %v6469_v0 }
0x1e72   :  { %v4600_v49 = vmul.f32 %v6873_v63, %v6867_v8  ;;  %6472 = vmatpush3.bf16.msra.mxu0 %v6469_v0  ;;  %v5542_v63 = vld [vmem:[%s7934_s8 + $0x98] sm:$0xff] }
0x1e73   :  { %6474 = vmatprep.subr.bf16.mxu0 %v6473_v41 }
0x1e74   :  { %6176 = vmatmul.mubr.msk.f32.vlgmr.msra.gmra.mrb[30].mxu1 %vm52_vm0, %v4600_v49  ;;  %v6481_v49 = vpack.c.bf16 %v5542_v63, %v5541_v48 }
0x1e75   :  { %6179 = vmatpush3.msra.mxu1 %v5464_v52  ;;  %v5543_v52 = vld [vmem:[%s7934_s8 + $0xa0] sm:$0xff] }
0x1e76   :  { %6476 = vmatpush3.bf16.msra.mxu0 %v6473_v41  ;;  %6478 = vmatprep.subr.bf16.mxu1 %v6477_v59 }
0x1f42   :  { %v6170_v53 = vpop.f32.mrb[58].mxu0 }
0x1f43   :  { %v4679_v54 = vpop.f32.mrb[59].mxu0 }
0x1f44   :  { %6180 = vmatprep.mubr.msk.f32.mxu1 %vm339_vm2, %v4679_v54 }
0x1f45   :  { %6181 = vmatmul.mubr.msk.f32.vlgmr.msra.gmra.mrb[22].mxu1 %vm339_vm2, %v6170_v53  ;;  %v5544_v53 = vld [vmem:[%s7934_s8 + $0xa8] sm:$0xff] }
0x1f46   :  { %6480 = vmatpush3.bf16.msra.mxu1 %v6477_v59  ;;  %v6485_v54 = vpack.c.bf16 %v5544_v53, %v5543_v52  ;;  %v5534_v59 = vld [vmem:[%s7933_s7 + $0x1] ss:$0 sm:$0xff] }
0x1f47   :  { %v6177_v56 = vpop.f32.mrb[30].mxu1  ;;  %6482 = vmatprep.subr.bf16.mxu1 %v6481_v49 }
0x1f48   :  { %v4766_v12 = vpop.f32.mrb[31].mxu1 }
0x1f49   :  { %6183 = vmatprep.mubr.msk.f32.mxu1 %vm339_vm2, %v4766_v12  ;;  %v5546_v12 = vld [vmem:[%s7934_s8 + $0xb8] sm:$0xff] }
0x1f4a   :  { %6184 = vmatmul.mubr.msk.f32.gmra.mrb[24].mxu1 %vm339_vm2, %v6177_v56  ;;  %v5545_v56 = vld [vmem:[%s7934_s8 + $0xb0] sm:$0xff] }
0x1f4b   :  { %6484 = vmatpush3.bf16.msra.mxu1 %v6481_v49 }
0x1f4c   :  { %6486 = vmatprep.subr.bf16.mxu1 %v6485_v54 }
0x1f4f   :  { %6488 = vmatpush3.bf16.msra.mxu1 %v6485_v54 }
0x2018   :  { %v6182_v7 = vpop.f32.mrb[22].mxu1 }
0x2019   :  { %v4877_v14 = vadd.f32 %v6182_v7, %v7466_v4  ;;  %v4853_v38 = vpop.f32.mrb[23].mxu1  ;;  %v5547_v7 = vld [vmem:[%s7934_s8 + $0xc0] sm:$0xff] }
0x201a   :  { %v4876_v11 = vadd.f32 %v4853_v38, %v7468_v28 }
0x201b   :  { %v7745_v15 = vadd.f32 %v4883_v13, %v4877_v14  ;;  %v5548_v14 = vld [vmem:[%s7934_s8 + $0xc8] sm:$0xff] }
0x201c   :  { %v7747_v16 = vadd.f32 %v4883_v13, %v4876_v11  ;;  %v6493_v38 = vpack.c.bf16 %v5548_v14, %v5547_v7  ;;  %v5549_v11 = vld [vmem:[%s7934_s8 + $0xd0] sm:$0xff] }
0x201d   :  { %v6185_v17 = vpop.f32.mrb[24].mxu1  ;;  %v4891_v50 = vsel %vm151_vm1, %v7745_v15, 0.0 }
0x201e   :  { %v4879_v62 = vadd.f32 %v6185_v17, %v7474_v43  ;;  %4892 = vadd.xlane.f32.xlu0 %v4891_v50  ;;  %v4863_v20 = vpop.f32.mrb[25].mxu1  ;;  %v4888_v37 = vsel %vm151_vm1, %v7747_v16, 0.0  ;;  %v5550_v17 = vld [vmem:[%s7934_s8 + $0xd8] sm:$0xff] }
0x201f   :  { %v4878_v55 = vadd.f32 %v4863_v20, %v7476_v44  ;;  %4889 = vadd.xlane.f32.xlu1 %v4888_v37  ;;  %v6497_v50 = vpack.c.bf16 %v5550_v17, %v5549_v11  ;;  %v5552_v20 = vld [vmem:[%s7934_s8 + $0xe8] sm:$0xff] }
0x2020   :  { %v7755_v21 = vadd.f32 %v4883_v13, %v4879_v62  ;;  %v5551_v62 = vld [vmem:[%s7934_s8 + $0xe0] sm:$0xff] }
0x2021   :  { %v7757_v24 = vadd.f32 %v4883_v13, %v4878_v55  ;;  %v6489_v13 = vpack.c.bf16 %v5546_v12, %v5545_v56  ;;  %v6501_v37 = vpack.c.bf16 %v5552_v20, %v5551_v62 }
0x2022   :  { %v4897_v19 = vsel %vm151_vm1, %v7755_v21, 0.0 }
0x2023   :  { %4898 = vadd.xlane.f32.xlu0 %v4897_v19  ;;  %v4894_v1 = vsel %vm151_vm1, %v7757_v24, 0.0  ;;  %6490 = vmatprep.subr.bf16.mxu1 %v6489_v13 }
0x2024   :  { %4895 = vadd.xlane.f32.xlu1 %v4894_v1  ;;  %6492 = vmatpush3.bf16.msra.mxu1 %v6489_v13 }
0x2025   :  { %6494 = vmatprep.subr.bf16.mxu1 %v6493_v38 }
0x2028   :  { %6496 = vmatpush3.bf16.msra.mxu1 %v6493_v38 }
0x2029   :  { %6498 = vmatprep.subr.bf16.mxu1 %v6497_v50 }
0x202c   :  { %6500 = vmatpush3.bf16.msra.mxu1 %v6497_v50 }
0x202d   :  { %6502 = vmatprep.subr.bf16.mxu1 %v6501_v37 }
0x2030   :  { %6504 = vmatpush3.bf16.msra.mxu1 %v6501_v37 }
0x20ab   :  { %v4893_v23 = vpop.xlane.xlu0 %4892 }
0x20ac   :  { %v4901_v22 = vmul.f32 0.03125, %v4893_v23  ;;  %v4890_v51 = vpop.xlane.xlu1 %4889 }
0x20ad   :  { %v4900_v5 = vmul.f32 0.03125, %v4890_v51 }
0x20ae   :  { %v7764_v58 = vsub.f32 %v7745_v15, %v4901_v22 }
0x20af   :  { %v7767_v18 = vsub.f32 %v7747_v16, %v4900_v5 }
0x20b0   :  { %v4899_v27 = vpop.xlane.xlu0 %4898  ;;  %v4909_v31 = vmul.f32 %v7764_v58, %v7764_v58 }
0x20b1   :  { %v4903_v6 = vmul.f32 0.03125, %v4899_v27  ;;  %v4896_v25 = vpop.xlane.xlu1 %4895  ;;  %v4908_v3 = vmul.f32 %v7767_v18, %v7767_v18 }
0x20b2   :  { %v4902_v30 = vmul.f32 0.03125, %v4896_v25  ;;  %v4915_v29 = vsel %vm151_vm1, %v4909_v31, 0.0 }
0x20b3   :  { %v7775_v8 = vsub.f32 %v7755_v21, %v4903_v6  ;;  %4916 = vadd.xlane.f32.xlu0 %v4915_v29  ;;  %v4912_v10 = vsel %vm151_vm1, %v4908_v3, 0.0 }
0x20b4   :  { %v7779_v9 = vsub.f32 %v7757_v24, %v4902_v30  ;;  %4913 = vadd.xlane.f32.xlu1 %v4912_v10  ;;  %v7844_v30 = vld [vmem:[%s7935_s9 + $0x8] sm:$0xff] }
0x20b5   :  { %v4911_v32 = vmul.f32 %v7775_v8, %v7775_v8  ;;  %v4943_v29 = vrot.slane %v7844_v30, %v2392_v33  ;;  %v5090_v17 = vrot.slane %v7844_v30, %v2536_v47 }
0x20b6   :  { %v4910_v35 = vmul.f32 %v7779_v9, %v7779_v9 }
0x20b7   :  { %v4921_v61 = vsel %vm151_vm1, %v4911_v32, 0.0 }
0x20b8   :  { %4922 = vadd.xlane.f32.xlu0 %v4921_v61  ;;  %v4918_v60 = vsel %vm151_vm1, %v4910_v35, 0.0 }
0x20b9   :  { %4919 = vadd.xlane.f32.xlu1 %v4918_v60  ;;  %v4951_v60 = vrot.slane %v7844_v30, %v2400_v26  ;;  %v5553_v26 = vld [vmem:[%s7934_s8 + $0xf0] sm:$0xff] }
0x2140   :  { %v4917_v55 = vpop.xlane.xlu0 %4916 }
0x2141   :  { %v4925_v19 = vmul.f32 0.03125, %v4917_v55  ;;  %v4914_v1 = vpop.xlane.xlu1 %4913 }
0x2142   :  { %v4924_v23 = vmul.f32 0.03125, %v4914_v1 }
0x2143   :  { %v4929_v22 = vadd.f32 1e-05, %v4925_v19 }
0x2144   :  { %v4928_v51 = vadd.f32 1e-05, %v4924_v23 }
0x2145   :  { %6874 = vrsqrt.f32 %v4929_v22  ;;  %v4923_v5 = vpop.xlane.xlu0 %4922 }
0x2146   :  { %6876 = vrsqrt.f32 %v4928_v51  ;;  %v4927_v27 = vmul.f32 0.03125, %v4923_v5  ;;  %v4920_v31 = vpop.xlane.xlu1 %4919 }
0x2147   :  { %v4926_v6 = vmul.f32 0.03125, %v4920_v31 }
0x2148   :  { %v4931_v25 = vadd.f32 1e-05, %v4927_v27 }
0x2149   :  { %v4930_v3 = vadd.f32 1e-05, %v4926_v6 }
0x214a   :  { %6878 = vrsqrt.f32 %v4931_v25 }
0x214b   :  { %6880 = vrsqrt.f32 %v4930_v3 }
0x214f   :  { %v6875_v10 = vpop.eup %6874 }
0x2150   :  { %v6877_v32 = vpop.eup %6876  ;;  %v4937_v35 = vmul.f32 %v6875_v10, %v7764_v58 }
0x2151   :  { %v4936_v61 = vmul.f32 %v6877_v32, %v7767_v18 }
0x2152   :  { %v4945_v2 = vmul.f32 %v4943_v29, %v4937_v35 }
0x2153   :  { %v4944_v36 = vmul.f32 %v4943_v29, %v4936_v61 }
0x2154   :  { %v6879_v0 = vpop.eup %6878  ;;  %v4953_v34 = vadd.f32 %v4951_v60, %v4945_v2 }
0x2155   :  { %v6881_v39 = vpop.eup %6880  ;;  %v4952_v40 = vadd.f32 %v4951_v60, %v4944_v36  ;;  %v4939_v41 = vmul.f32 %v6879_v0, %v7775_v8  ;;  %v5554_v8 = vld [vmem:[%s7934_s8 + $0xf8] sm:$0xff] }
0x2156   :  { %v4938_v33 = vmul.f32 %v6881_v39, %v7779_v9  ;;  %v6505_v9 = vpack.c.bf16 %v5554_v8, %v5553_v26  ;;  %v6927_v26 = vmov 0.0|0.0  }
0x2157   :  { %6194 = vmatprep.mubr.msk.f32.mxu0 %vm151_vm1, %v4952_v40  ;;  %v4947_v42 = vmul.f32 %v4943_v29, %v4939_v41  ;;  %6509 = vmatprep.subr.bf16.mxu0 %v6927_v26 }
0x2158   :  { %6195 = vmatmul.mubr.msk.f32.vlgmr.msra.gmra.mrb[60].mxu0 %vm151_vm1, %v4953_v34  ;;  %v4946_v58 = vmul.f32 %v4943_v29, %v4938_v33  ;;  %6506 = vmatprep.subr.bf16.mxu1 %v6505_v9 }
0x2159   :  { %v4955_v48 = vadd.f32 %v4951_v60, %v4947_v42  ;;  %6508 = vmatpush3.bf16.msra.mxu1 %v6505_v9  ;;  %v5273_v9 = vld [vmem:[%s7936_s10 + $0x18] sm:$0xff] }
0x215a   :  { %v4954_v18 = vadd.f32 %v4951_v60, %v4946_v58  ;;  %v5270_v58 = vld [vmem:[%s7936_s10] sm:$0xff] }
0x215c   :  { %6197 = vmatprep.mubr.msk.f32.mxu0 %vm151_vm1, %v4954_v18  ;;  %v5271_v18 = vld [vmem:[%s7936_s10 + $0x8] sm:$0xff] }
0x215d   :  { %6198 = vmatmul.mubr.msk.f32.gmra.mrb[62].mxu0 %vm151_vm1, %v4955_v48  ;;  %v5272_v48 = vld [vmem:[%s7936_s10 + $0x10] sm:$0xff]  ;;  %v6510_v8 = vpack.c.bf16 %v5271_v18, %v5270_v58 }
0x215f   :  { %6511 = vmatpush3.bf16.msra.mxu0 %v6510_v8 }
0x2160   :  { %6512 = vmatprep.subr.bf16.mxu0 %v6927_v26 }
0x222b   :  { %v6196_v63 = vpop.f32.mrb[60].mxu0 }
0x222c   :  { %v5053_v49 = vadd.f32 %v6196_v63, %v5534_v59  ;;  %v5047_v52 = vpop.f32.mrb[61].mxu0  ;;  %v6513_v63 = vpack.c.bf16 %v5273_v9, %v5272_v48 }
0x222d   :  { %v5048_v53 = vadd.f32 %v5534_v59, %v5047_v52 }
0x222e   :  { %v5067_v56 = vmax.f32 %v5053_v49, 0.0  ;;  %6514 = vmatpush3.bf16.msra.mxu0 %v6513_v63 }
0x222f   :  { %v5066_v54 = vmax.f32 %v5048_v53, 0.0 }
0x2230   :  { %v6199_v12 = vpop.f32.mrb[62].mxu0 }
0x2231   :  { %v5063_v13 = vadd.f32 %v6199_v12, %v5534_v59  ;;  %v5057_v7 = vpop.f32.mrb[63].mxu0  ;;  %6232 = vmatprep.mubr.f32.mxu1 %v5066_v54 }
0x2232   :  { %v5058_v14 = vadd.f32 %v5534_v59, %v5057_v7  ;;  %6233 = vmatmul.mubr.f32.vlgmr.msra.gmra.mrb[32].mxu1 %v5067_v56  ;;  %v6929_v59 = vmov 0.0  }
0x2233   :  { %v5069_v11 = vmax.f32 %v5063_v13, 0.0  ;;  %6246 = vmatprep.mubr.msk.f32.mxu0 %vm6928_vm4, %v6929_v59 }
0x2234   :  { %v5068_v38 = vmax.f32 %v5058_v14, 0.0 }
0x2236   :  { %6235 = vmatprep.mubr.f32.mxu1 %v5068_v38 }
0x2237   :  { %6236 = vmatmul.mubr.f32.gmra.mrb[34].mxu1 %v5069_v11 }
0x2305   :  { %v6234_v50 = vpop.f32.mrb[32].mxu1 }
0x2306   :  { %v5163_v62 = vadd.f32 %v6234_v50, %v5090_v17  ;;  %v5157_v20 = vpop.f32.mrb[33].mxu1  ;;  %v5239_v50 = vrot.slane %v7844_v30, %v2685_v45 }
0x2307   :  { %v5158_v37 = vadd.f32 %v5157_v20, %v5090_v17 }
0x2308   :  { %v5177_v55 = vadd.f32 %v5163_v62, %v7745_v15 }
0x2309   :  { %v5176_v19 = vadd.f32 %v5158_v37, %v7747_v16  ;;  %v5247_v37 = vrot.slane %v7844_v30, %v2693_v46 }
0x230a   :  { %v6237_v1 = vpop.f32.mrb[34].mxu1  ;;  %v5181_v23 = vadd.f32 %v5177_v55, %v7466_v4 }
0x230b   :  { %v5173_v22 = vadd.f32 %v6237_v1, %v5090_v17  ;;  %v5167_v51 = vpop.f32.mrb[35].mxu1  ;;  %v5180_v5 = vadd.f32 %v5176_v19, %v7468_v28 }
0x230c   :  { %v5168_v27 = vadd.f32 %v5167_v51, %v5090_v17  ;;  %v5187_v31 = vsel %vm151_vm1, %v5181_v23, 0.0 }
0x230d   :  { %v5179_v47 = vadd.f32 %v5173_v22, %v7755_v21  ;;  %5188 = vadd.xlane.f32.xlu0 %v5187_v31  ;;  %v5184_v6 = vsel %vm151_vm1, %v5180_v5, 0.0 }
0x230e   :  { %v5178_v25 = vadd.f32 %v5168_v27, %v7757_v24  ;;  %5185 = vadd.xlane.f32.xlu1 %v5184_v6 }
0x230f   :  { %v5183_v15 = vadd.f32 %v5179_v47, %v7474_v43 }
0x2310   :  { %v5182_v16 = vadd.f32 %v5178_v25, %v7476_v44 }
0x2311   :  { %v5193_v4 = vsel %vm151_vm1, %v5183_v15, 0.0 }
0x2312   :  { %5194 = vadd.xlane.f32.xlu0 %v5193_v4  ;;  %v5190_v28 = vsel %vm151_vm1, %v5182_v16, 0.0 }
0x2313   :  { %5191 = vadd.xlane.f32.xlu1 %v5190_v28 }
0x239a   :  { %v5189_v3 = vpop.xlane.xlu0 %5188 }
0x239b   :  { %v5197_v29 = vmul.f32 0.03125, %v5189_v3  ;;  %v5186_v10 = vpop.xlane.xlu1 %5185 }
0x239c   :  { %v5196_v21 = vmul.f32 0.03125, %v5186_v10 }
0x239d   :  { %v5201_v32 = vsub.f32 %v5181_v23, %v5197_v29 }
0x239e   :  { %v5200_v35 = vsub.f32 %v5180_v5, %v5196_v21 }
0x239f   :  { %v5195_v61 = vpop.xlane.xlu0 %5194  ;;  %v5205_v60 = vmul.f32 %v5201_v32, %v5201_v32 }
0x23a0   :  { %v5199_v24 = vmul.f32 0.03125, %v5195_v61  ;;  %v5192_v2 = vpop.xlane.xlu1 %5191  ;;  %v5204_v36 = vmul.f32 %v5200_v35, %v5200_v35 }
0x23a1   :  { %v5198_v43 = vmul.f32 0.03125, %v5192_v2  ;;  %v5211_v44 = vsel %vm151_vm1, %v5205_v60, 0.0 }
0x23a2   :  { %v5203_v0 = vsub.f32 %v5183_v15, %v5199_v24  ;;  %5212 = vadd.xlane.f32.xlu0 %v5211_v44  ;;  %v5208_v39 = vsel %vm151_vm1, %v5204_v36, 0.0 }
0x23a3   :  { %v5202_v40 = vsub.f32 %v5182_v16, %v5198_v43  ;;  %5209 = vadd.xlane.f32.xlu1 %v5208_v39 }
0x23a4   :  { %v5207_v41 = vmul.f32 %v5203_v0, %v5203_v0 }
0x23a5   :  { %v5206_v34 = vmul.f32 %v5202_v40, %v5202_v40 }
0x23a6   :  { %v5217_v33 = vsel %vm151_vm1, %v5207_v41, 0.0 }
0x23a7   :  { %5218 = vadd.xlane.f32.xlu0 %v5217_v33  ;;  %v5214_v42 = vsel %vm151_vm1, %v5206_v34, 0.0 }
0x23a8   :  { %5215 = vadd.xlane.f32.xlu1 %v5214_v42 }
0x242f   :  { %v5213_v49 = vpop.xlane.xlu0 %5212 }
0x2430   :  { %v5221_v52 = vmul.f32 0.03125, %v5213_v49  ;;  %v5210_v53 = vpop.xlane.xlu1 %5209 }
0x2431   :  { %v5220_v54 = vmul.f32 0.03125, %v5210_v53 }
0x2432   :  { %v5225_v56 = vadd.f32 1e-05, %v5221_v52 }
0x2433   :  { %v5224_v12 = vadd.f32 1e-05, %v5220_v54 }
0x2434   :  { %6882 = vrsqrt.f32 %v5225_v56  ;;  %v5219_v13 = vpop.xlane.xlu0 %5218 }
0x2435   :  { %6884 = vrsqrt.f32 %v5224_v12  ;;  %v5223_v7 = vmul.f32 0.03125, %v5219_v13  ;;  %v5216_v14 = vpop.xlane.xlu1 %5215 }
0x2436   :  { %v5222_v38 = vmul.f32 0.03125, %v5216_v14 }
0x2437   :  { %v5227_v11 = vadd.f32 1e-05, %v5223_v7 }
0x2438   :  { %v5226_v17 = vadd.f32 1e-05, %v5222_v38 }
0x2439   :  { %6886 = vrsqrt.f32 %v5227_v11 }
0x243a   :  { %6888 = vrsqrt.f32 %v5226_v17 }
0x243e   :  { %v6883_v62 = vpop.eup %6882 }
0x243f   :  { %v6885_v20 = vpop.eup %6884  ;;  %v5233_v55 = vmul.f32 %v6883_v62, %v5201_v32 }
0x2440   :  { %v5232_v19 = vmul.f32 %v6885_v20, %v5200_v35 }
0x2441   :  { %v5241_v1 = vmul.f32 %v5239_v50, %v5233_v55 }
0x2442   :  { %v5240_v23 = vmul.f32 %v5239_v50, %v5232_v19 }
0x2443   :  { %v6887_v22 = vpop.eup %6886  ;;  %v5249_v51 = vadd.f32 %v5247_v37, %v5241_v1 }
0x2444   :  { %v6889_v5 = vpop.eup %6888  ;;  %v5248_v27 = vadd.f32 %v5247_v37, %v5240_v23  ;;  %v5235_v31 = vmul.f32 %v6887_v22, %v5203_v0  ;;  %v5555_v0 = vld [vmem:[%s7937_s11] ss:$0 sm:$0xff] }
0x2445   :  { %v5253_v47 = vsel %vm151_vm1, %v5249_v51, -inf  ;;  %v5234_v6 = vmul.f32 %v6889_v5, %v5202_v40 }
0x2446   :  { %v5252_v45 = vsel %vm151_vm1, %v5248_v27, -inf  ;;  %v5243_v25 = vmul.f32 %v5239_v50, %v5235_v31 }
0x2447   :  { %v5242_v15 = vmul.f32 %v5239_v50, %v5234_v6  ;;  %v5254_v16 = vmax.f32 %v5252_v45, %v5253_v47 }
0x2448   :  { %v5251_v57 = vadd.f32 %v5247_v37, %v5243_v25 }
0x2449   :  { %v5250_v4 = vadd.f32 %v5247_v37, %v5242_v15  ;;  %v5255_v46 = vrot.slane %v5254_v16, 4 }
0x244a   :  { %v5262_v30 = vsel %vm151_vm1, %v5251_v57, -inf }
0x244b   :  { %v5261_v28 = vsel %vm151_vm1, %v5250_v4, -inf  ;;  %v5256_v3 = vmax.f32 %v5254_v16, %v5255_v46 }
0x244c   :  { %v5263_v29 = vmax.f32 %v5261_v28, %v5262_v30 }
0x244d   :  { %v5257_v10 = vrot.slane %v5256_v3, 2 }
0x244e   :  { %v5264_v21 = vrot.slane %v5263_v29, 4 }
0x244f   :  { %v5258_v32 = vmax.f32 %v5256_v3, %v5257_v10 }
0x2450   :  { %v5265_v35 = vmax.f32 %v5263_v29, %v5264_v21 }
0x2451   :  { %v5259_v60 = vrot.slane %v5258_v32, 1 }
0x2452   :  { %v5266_v61 = vrot.slane %v5265_v35, 2 }
0x2453   :  { %v5260_v36 = vmax.f32 %v5258_v32, %v5259_v60 }
0x2454   :  { %v5267_v24 = vmax.f32 %v5265_v35, %v5266_v61 }
0x2456   :  { %v5268_v2 = vrot.slane %v5267_v24, 1 }
0x2458   :  { %v5269_v43 = vmax.f32 %v5267_v24, %v5268_v2 }
0x245a   :  { %v5284_v44 = vsel %vm5283_vm5, %v5269_v43, %v5260_v36 }
0x245b   :  { %6247 = vmatmul.mubr.msk.f32.vlgmr.msra.gmra.mrb[64].mxu0 %vm151_vm1, %v5284_v44 }
0x252e   :  { %v5353_v39 = vpop.f32.mrb[64].mxu0 }
0x252f   :  { %v5354_v40 = vadd.f32 %v5555_v0, %v5353_v39  ;;  %v6248_v41 = vpop.f32.mrb[65].mxu0 }
0x2531   :  { %5357 = vst [vmem:[#allocation2] sm:$0x3] %v5354_v40 }
0x2532   :  { %6903 = shalt.err (!%p6900_p4)
}
0x2533   :  { %s6904_s21 = scalar_lea.hbm %s7938_s12, 32 }
0x2534   :  { %p6905_p5 = scmp.ne.s32.totalorder %s7938_s12, %s6904_s21  ;;  %p6908_p6 = scmp.lt.u32.totalorder %s6904_s21, %s7938_s12 }
0x2536   :  { %p6910_p7 = pnand %p6908_p6, %p6905_p5 }
0x2538   :  { %6913 = shalt.err (!%p6910_p7)
}
0x2539   :  { %5367 = dma.vmem_to_hbm [thread:$0]  %s5365_s22, 32, %s7938_s12, [#allocation3]  }
0x253a   :  { %6914 = dma.done.wait [#allocation3], 32  }
0x253b   :  { %6915 = vsyncadd [#allocation3], 4294967264 }
0x253c   :  { %5371 = vsyncpa [#allocation3], 1 }

</bundles_post_ra>
